<compile_context>
chip_gen: v7x
topology: tpu7x:2x2x1
jax: 0.10.0
libtpu: 0.0.40
codegen_flags: <defaults>
</compile_context>

<pallas_src>
import functools

import jax
import jax.numpy as jnp
from jax import lax
from jax.experimental import pallas as pl
from jax.experimental.pallas import tpu as pltpu

_SQRT_HALF = 0.7071067811865476


def _round_up(x: int, m: int) -> int:
    return ((x + m - 1) // m) * m


def _erf_approx(x):
    """erf via Abramowitz & Stegun 7.1.26 (max abs err ~1.5e-7).

    Uses only abs/mul/add/div/exp/select, all of which lower cleanly in Mosaic,
    so the kernel does not depend on an erf lowering rule.
    """
    a = jnp.abs(x)
    t = 1.0 / (1.0 + 0.3275911 * a)
    poly = t * (0.254829592
                + t * (-0.284496736
                       + t * (1.421413741
                              + t * (-1.453152027 + t * 1.061405429))))
    y = 1.0 - poly * jnp.exp(-(a * a))
    return jnp.where(x < 0.0, -y, y)


def _gelu(y, approximate: bool):
    if approximate:
        # tanh approximation: rides the EUP slot (useful if VALU binds on
        # v6e/v7x), but deviates slightly from torch's exact-erf F.gelu.
        c = 0.7978845608028654  # sqrt(2/pi)
        return 0.5 * y * (1.0 + jnp.tanh(c * (y + 0.044715 * y * y * y)))
    return 0.5 * y * (1.0 + _erf_approx(y * _SQRT_HALF))


def _vae_encoder_kernel(x_ref, eps_ref,
                        w1_ref, b1_ref, w2_ref, b2_ref, w3_ref, b3_ref,
                        w4_ref, b4_ref,
                        z_ref, kl_ref, *,
                        latent_dims: int, batch: int, lp: int,
                        approx_gelu: bool):
    """Fused 4-stage MLP + reparameterization + masked KL partial for one tile.

    bf16 MXU matmuls with f32 accumulate; bias/GELU/exp/KL math in f32.
    w4/b4 are the fused [mu | log_sigma] head (each padded to `lp` lanes).
    """
    tb = x_ref.shape[0]

    x = x_ref[...]                                     # bf16 (tb, 784)
    h = jnp.dot(x, w1_ref[...], preferred_element_type=jnp.float32) + b1_ref[...]
    h = _gelu(h, approx_gelu)
    h = jnp.dot(h.astype(jnp.bfloat16), w2_ref[...],
                preferred_element_type=jnp.float32) + b2_ref[...]
    h = _gelu(h, approx_gelu)
    h = jnp.dot(h.astype(jnp.bfloat16), w3_ref[...],
                preferred_element_type=jnp.float32) + b3_ref[...]
    h = _gelu(h, approx_gelu)
    head = jnp.dot(h.astype(jnp.bfloat16), w4_ref[...],
                   preferred_element_type=jnp.float32) + b4_ref[...]

    mu = head[:, :lp]                                  # (tb, lp), lane-aligned slice
    log_sigma = head[:, lp:]
    sigma = jnp.exp(log_sigma)                         # EUP transcendental
    z_ref[...] = (mu + sigma * eps_ref[...]).astype(z_ref.dtype)

    # KL partial sum, masked to real batch rows and real latent lanes.
    terms = sigma * sigma + mu * mu - log_sigma - 0.5
    row = lax.broadcasted_iota(jnp.int32, (tb, lp), 0) + pl.program_id(0) * tb
    lane = lax.broadcasted_iota(jnp.int32, (tb, lp), 1)
    terms = jnp.where((row < batch) & (lane < latent_dims), terms, 0.0)
    # Vreg-aligned sublane-group reduction (tb,lp) -> (8,lp); the tiny final
    # cross-sublane/lane reduction happens in the wrapper.
    kl_ref[...] = jnp.sum(terms.reshape(tb // 8, 8, lp), axis=0).reshape(1, 8, lp)


def init_params(latent_dims: int, key):
    """Deterministic f32 params, stored as (in_features, out_features)."""
    dims = [(28 * 28, 1024), (1024, 512), (512, 256),
            (256, latent_dims), (256, latent_dims)]  # fc1..fc3, fc4_mu, fc4_sigma
    params = []
    for fan_in, fan_out in dims:
        kw, kb, key = jax.random.split(key, 3)
        bound = fan_in ** -0.5
        w = jax.random.uniform(kw, (fan_in, fan_out), jnp.float32, -bound, bound)
        b = jax.random.uniform(kb, (fan_out,), jnp.float32, -bound, bound)
        params.append((w, b))
    return params


def pack_params(params, latent_dims: int):
    """Fuse the mu/sigma head, pad latent lanes to 128, cast W to bf16."""
    (w1, b1), (w2, b2), (w3, b3), (wmu, bmu), (wsig, bsig) = params
    lp = _round_up(latent_dims, 128)        # latent padded to a full lane group
    w4 = jnp.concatenate(
        [jnp.pad(wmu, ((0, 0), (0, lp - latent_dims))),
         jnp.pad(wsig, ((0, 0), (0, lp - latent_dims)))], axis=1)
    b4 = jnp.concatenate([jnp.pad(bmu, (0, lp - latent_dims)),
                          jnp.pad(bsig, (0, lp - latent_dims))])
    as_bias = lambda b: b.reshape(1, -1).astype(jnp.float32)
    return dict(
        w1=w1.astype(jnp.bfloat16), b1=as_bias(b1),      # W1 keeps 784 rows (no pad)
        w2=w2.astype(jnp.bfloat16), b2=as_bias(b2),
        w3=w3.astype(jnp.bfloat16), b3=as_bias(b3),
        w4=w4.astype(jnp.bfloat16), b4=as_bias(b4),
    )


def variational_encoder_forward(x_nchw, packed, eps, *, latent_dims: int,
                                approx_gelu: bool = False):
    """Returns (z, kl) matching VariationalEncoder.forward semantics."""
    B = x_nchw.shape[0]
    x = x_nchw.reshape(B, -1).astype(jnp.bfloat16)   # flatten; dropout p=0 -> identity
    d_in = x.shape[1]                                # 784, unpadded
    lp = packed["w4"].shape[1] // 2                  # padded latent width (128)
    n1 = packed["w2"].shape[0]                       # 1024
    n2 = packed["w3"].shape[0]                       # 512
    n3 = packed["w4"].shape[0]                       # 256

    # Batch tile: multiple of 16 (bf16 min sublane tile), capped at 512, and
    # sized so B > 16 always yields >= 2 tiles (lets v7x shard the parallel
    # axis across its two TensorCores).
    tb = max(16, min(512, _round_up(pl.cdiv(B, 2), 16)))
    b_pad = _round_up(B, tb)
    n_tiles = b_pad // tb

    if b_pad != B:
        x = jnp.pad(x, ((0, b_pad - B), (0, 0)))
    eps_p = eps.astype(jnp.float32)
    if b_pad != B or lp != latent_dims:
        eps_p = jnp.pad(eps_p, ((0, b_pad - B), (0, lp - latent_dims)))

    kernel = functools.partial(_vae_encoder_kernel, latent_dims=latent_dims,
                               batch=B, lp=lp, approx_gelu=approx_gelu)
    const = lambda i: (0, 0)      # weights resident in VMEM across all tiles
    batch_map = lambda i: (i, 0)  # batch-tiled tensors

    z_pad, kl_tiles = pl.pallas_call(
        kernel,
        out_shape=(jax.ShapeDtypeStruct((b_pad, lp), jnp.float32),
                   jax.ShapeDtypeStruct((n_tiles, 8, 128), jnp.float32)),
        grid=(n_tiles,),
        in_specs=[
            pl.BlockSpec((tb, d_in), batch_map),   # x tile (bf16, 784 == full dim)
            pl.BlockSpec((tb, lp), batch_map),     # eps tile
            pl.BlockSpec((d_in, n1), const),       # W1
            pl.BlockSpec((1, n1), const),          # b1
            pl.BlockSpec((n1, n2), const),         # W2
            pl.BlockSpec((1, n2), const),          # b2
            pl.BlockSpec((n2, n3), const),         # W3
            pl.BlockSpec((1, n3), const),          # b3
            pl.BlockSpec((n3, 2 * lp), const),     # fused [W_mu | W_sigma]
            pl.BlockSpec((1, 2 * lp), const),      # fused [b_mu | b_sigma]
        ],
        out_specs=(pl.BlockSpec((tb, lp), batch_map),
                   pl.BlockSpec((1, 8, 128), lambda i: (i, 0, 0))),
        compiler_params=pltpu.CompilerParams(
            dimension_semantics=("parallel",),
            vmem_limit_bytes=32 * 1024 * 1024,
        ),
    )(x, eps_p, packed["w1"], packed["b1"], packed["w2"], packed["b2"],
      packed["w3"], packed["b3"], packed["w4"], packed["b4"])

    z = z_pad[:B, :latent_dims]
    kl = jnp.sum(kl_tiles)        # padded rows/lanes were zeroed in-kernel
    return z, kl


def reference_forward(x_nchw, params, eps):
    """Pure-JAX reference with matching bf16-matmul / f32-accumulate numerics."""
    (w1, b1), (w2, b2), (w3, b3), (wmu, bmu), (wsig, bsig) = params
    h = x_nchw.reshape(x_nchw.shape[0], -1).astype(jnp.float32)

    def lin(h, w, b):
        return jnp.dot(h.astype(jnp.bfloat16), w.astype(jnp.bfloat16),
                       preferred_element_type=jnp.float32) + b

    gelu = lambda y: 0.5 * y * (1.0 + lax.erf(y * _SQRT_HALF))  # exact erf
    h = gelu(lin(h, w1, b1))
    h = gelu(lin(h, w2, b2))
    h = gelu(lin(h, w3, b3))
    mu = lin(h, wmu, bmu)
    log_sigma = lin(h, wsig, bsig)
    sigma = jnp.exp(log_sigma)
    z = mu + sigma * eps.astype(jnp.float32)
    kl = jnp.sum(sigma ** 2 + mu ** 2 - log_sigma - 0.5)
    return z, kl


if __name__ == "__main__":
    latent_dims = 32
    batch = 2

    key = jax.random.PRNGKey(0)
    kx, kp, ke = jax.random.split(key, 3)
    x = jax.random.normal(kx, (batch, 1, 28, 28), jnp.float32)   # MNIST-shaped input
    params = init_params(latent_dims, kp)
    packed = pack_params(params, latent_dims)
    eps = jax.random.normal(ke, (batch, latent_dims), jnp.float32)  # N(0,1) sample

    fwd = jax.jit(functools.partial(variational_encoder_forward,
                                    latent_dims=latent_dims))
    z, kl = fwd(x, packed, eps)
    z, kl = jax.block_until_ready((z, kl))
    assert z.shape == (batch, latent_dims), z.shape

    z_ref, kl_ref = reference_forward(x, params, eps)
    assert jnp.allclose(z, z_ref, atol=2e-3, rtol=2e-3), \
        float(jnp.max(jnp.abs(z - z_ref)))
    assert jnp.allclose(kl, kl_ref, atol=5e-2, rtol=2e-3), \
        (float(kl), float(kl_ref))

    print("KERNEL_OK")
</pallas_src>

<mosaic_0001>
module attributes {stable_mosaic.version = 11 : i64} {
  func.func @_vae_encoder_kernel(%arg0: i32, %arg1: memref<16x784xbf16, #tpu.memory_space<vmem>>, %arg2: memref<16x128xf32, #tpu.memory_space<vmem>>, %arg3: memref<784x1024xbf16, #tpu.memory_space<vmem>>, %arg4: memref<1x1024xf32, #tpu.memory_space<vmem>>, %arg5: memref<1024x512xbf16, #tpu.memory_space<vmem>>, %arg6: memref<1x512xf32, #tpu.memory_space<vmem>>, %arg7: memref<512x256xbf16, #tpu.memory_space<vmem>>, %arg8: memref<1x256xf32, #tpu.memory_space<vmem>>, %arg9: memref<256x256xbf16, #tpu.memory_space<vmem>>, %arg10: memref<1x256xf32, #tpu.memory_space<vmem>>, %arg11: memref<16x128xf32, #tpu.memory_space<vmem>>, %arg12: memref<1x8x128xf32, #tpu.memory_space<vmem>>) attributes {dimension_semantics = [#tpu.dimension_semantics<parallel>], iteration_bounds = array<i64: 1>, scalar_prefetch = 0 : i64, scratch_operands = 0 : i64, tpu.core_type = #tpu.core_type<tc>, window_params = [{transform_indices = @transform_0, window_bounds = array<i64: 16, 784>}, {transform_indices = @transform_1, window_bounds = array<i64: 16, 128>}, {pipeline_mode = #tpu.pipeline_mode<synchronous>, transform_indices = @transform_2, window_bounds = array<i64: 784, 1024>}, {pipeline_mode = #tpu.pipeline_mode<synchronous>, transform_indices = @transform_3, window_bounds = array<i64: 1, 1024>}, {pipeline_mode = #tpu.pipeline_mode<synchronous>, transform_indices = @transform_4, window_bounds = array<i64: 1024, 512>}, {pipeline_mode = #tpu.pipeline_mode<synchronous>, transform_indices = @transform_5, window_bounds = array<i64: 1, 512>}, {pipeline_mode = #tpu.pipeline_mode<synchronous>, transform_indices = @transform_6, window_bounds = array<i64: 512, 256>}, {pipeline_mode = #tpu.pipeline_mode<synchronous>, transform_indices = @transform_7, window_bounds = array<i64: 1, 256>}, {pipeline_mode = #tpu.pipeline_mode<synchronous>, transform_indices = @transform_8, window_bounds = array<i64: 256, 256>}, {pipeline_mode = #tpu.pipeline_mode<synchronous>, transform_indices = @transform_9, window_bounds = array<i64: 1, 256>}, {transform_indices = @transform_10, window_bounds = array<i64: 16, 128>}, {transform_indices = @transform_11, window_bounds = array<i64: 1, 8, 128>}]} {
    %c0 = arith.constant 0 : index
    %c0_0 = arith.constant 0 : index
    %0 = vector.load %arg1[%c0, %c0_0] : memref<16x784xbf16, #tpu.memory_space<vmem>>, vector<16x784xbf16>
    %c0_1 = arith.constant 0 : index
    %c0_2 = arith.constant 0 : index
    %1 = vector.load %arg3[%c0_1, %c0_2] : memref<784x1024xbf16, #tpu.memory_space<vmem>>, vector<784x1024xbf16>
    %cst = arith.constant dense<0.000000e+00> : vector<16x1024xf32>
    %2 = tpu.matmul %0, %1, %cst {dimension_numbers = #tpu.dot_dimension_numbers<[1], [0], [0], [1], [0, 0, 1, 1], [], []>} : vector<16x784xbf16>, vector<784x1024xbf16>, vector<16x1024xf32> -> vector<16x1024xf32>
    %c0_3 = arith.constant 0 : index
    %c0_4 = arith.constant 0 : index
    %3 = vector.load %arg4[%c0_3, %c0_4] : memref<1x1024xf32, #tpu.memory_space<vmem>>, vector<1x1024xf32>
    %4 = vector.broadcast %3 : vector<1x1024xf32> to vector<16x1024xf32>
    %5 = arith.addf %2, %4 : vector<16x1024xf32>
    %cst_5 = arith.constant 5.000000e-01 : f32
    %6 = vector.broadcast %cst_5 : f32 to vector<16x1024xf32>
    %7 = arith.mulf %6, %5 : vector<16x1024xf32>
    %cst_6 = arith.constant 0.707106769 : f32
    %8 = vector.broadcast %cst_6 : f32 to vector<16x1024xf32>
    %9 = arith.mulf %5, %8 : vector<16x1024xf32>
    %10 = math.absf %9 : vector<16x1024xf32>
    %cst_7 = arith.constant 0.327591091 : f32
    %11 = vector.broadcast %cst_7 : f32 to vector<16x1024xf32>
    %12 = arith.mulf %11, %10 : vector<16x1024xf32>
    %cst_8 = arith.constant 1.000000e+00 : f32
    %13 = vector.broadcast %cst_8 : f32 to vector<16x1024xf32>
    %14 = arith.addf %13, %12 : vector<16x1024xf32>
    %cst_9 = arith.constant 1.000000e+00 : f32
    %15 = vector.broadcast %cst_9 : f32 to vector<16x1024xf32>
    %16 = arith.divf %15, %14 : vector<16x1024xf32>
    %cst_10 = arith.constant 1.06140542 : f32
    %17 = vector.broadcast %cst_10 : f32 to vector<16x1024xf32>
    %18 = arith.mulf %16, %17 : vector<16x1024xf32>
    %cst_11 = arith.constant -1.45315206 : f32
    %19 = vector.broadcast %cst_11 : f32 to vector<16x1024xf32>
    %20 = arith.addf %19, %18 : vector<16x1024xf32>
    %21 = arith.mulf %16, %20 : vector<16x1024xf32>
    %cst_12 = arith.constant 1.42141378 : f32
    %22 = vector.broadcast %cst_12 : f32 to vector<16x1024xf32>
    %23 = arith.addf %22, %21 : vector<16x1024xf32>
    %24 = arith.mulf %16, %23 : vector<16x1024xf32>
    %cst_13 = arith.constant -0.284496725 : f32
    %25 = vector.broadcast %cst_13 : f32 to vector<16x1024xf32>
    %26 = arith.addf %25, %24 : vector<16x1024xf32>
    %27 = arith.mulf %16, %26 : vector<16x1024xf32>
    %cst_14 = arith.constant 0.254829586 : f32
    %28 = vector.broadcast %cst_14 : f32 to vector<16x1024xf32>
    %29 = arith.addf %28, %27 : vector<16x1024xf32>
    %30 = arith.mulf %16, %29 : vector<16x1024xf32>
    %31 = arith.mulf %10, %10 : vector<16x1024xf32>
    %cst_15 = arith.constant 0.000000e+00 : f32
    %32 = vector.broadcast %cst_15 : f32 to vector<16x1024xf32>
    %33 = arith.subf %32, %31 : vector<16x1024xf32>
    %34 = math.exp %33 : vector<16x1024xf32>
    %35 = arith.mulf %30, %34 : vector<16x1024xf32>
    %cst_16 = arith.constant 1.000000e+00 : f32
    %36 = vector.broadcast %cst_16 : f32 to vector<16x1024xf32>
    %37 = arith.subf %36, %35 : vector<16x1024xf32>
    %cst_17 = arith.constant 0.000000e+00 : f32
    %38 = vector.broadcast %cst_17 : f32 to vector<16x1024xf32>
    %39 = arith.cmpf olt, %9, %38 : vector<16x1024xf32>
    %cst_18 = arith.constant 0.000000e+00 : f32
    %40 = vector.broadcast %cst_18 : f32 to vector<16x1024xf32>
    %41 = arith.subf %40, %37 : vector<16x1024xf32>
    %42 = arith.select %39, %41, %37 : vector<16x1024xi1>, vector<16x1024xf32>
    %cst_19 = arith.constant 1.000000e+00 : f32
    %43 = vector.broadcast %cst_19 : f32 to vector<16x1024xf32>
    %44 = arith.addf %43, %42 : vector<16x1024xf32>
    %45 = arith.mulf %7, %44 : vector<16x1024xf32>
    %46 = arith.truncf %45 : vector<16x1024xf32> to vector<16x1024xbf16>
    %c0_20 = arith.constant 0 : index
    %c0_21 = arith.constant 0 : index
    %47 = vector.load %arg5[%c0_20, %c0_21] : memref<1024x512xbf16, #tpu.memory_space<vmem>>, vector<1024x512xbf16>
    %cst_22 = arith.constant dense<0.000000e+00> : vector<16x512xf32>
    %48 = tpu.matmul %46, %47, %cst_22 {dimension_numbers = #tpu.dot_dimension_numbers<[1], [0], [0], [1], [0, 0, 1, 1], [], []>} : vector<16x1024xbf16>, vector<1024x512xbf16>, vector<16x512xf32> -> vector<16x512xf32>
    %c0_23 = arith.constant 0 : index
    %c0_24 = arith.constant 0 : index
    %49 = vector.load %arg6[%c0_23, %c0_24] : memref<1x512xf32, #tpu.memory_space<vmem>>, vector<1x512xf32>
    %50 = vector.broadcast %49 : vector<1x512xf32> to vector<16x512xf32>
    %51 = arith.addf %48, %50 : vector<16x512xf32>
    %cst_25 = arith.constant 5.000000e-01 : f32
    %52 = vector.broadcast %cst_25 : f32 to vector<16x512xf32>
    %53 = arith.mulf %52, %51 : vector<16x512xf32>
    %cst_26 = arith.constant 0.707106769 : f32
    %54 = vector.broadcast %cst_26 : f32 to vector<16x512xf32>
    %55 = arith.mulf %51, %54 : vector<16x512xf32>
    %56 = math.absf %55 : vector<16x512xf32>
    %cst_27 = arith.constant 0.327591091 : f32
    %57 = vector.broadcast %cst_27 : f32 to vector<16x512xf32>
    %58 = arith.mulf %57, %56 : vector<16x512xf32>
    %cst_28 = arith.constant 1.000000e+00 : f32
    %59 = vector.broadcast %cst_28 : f32 to vector<16x512xf32>
    %60 = arith.addf %59, %58 : vector<16x512xf32>
    %cst_29 = arith.constant 1.000000e+00 : f32
    %61 = vector.broadcast %cst_29 : f32 to vector<16x512xf32>
    %62 = arith.divf %61, %60 : vector<16x512xf32>
    %cst_30 = arith.constant 1.06140542 : f32
    %63 = vector.broadcast %cst_30 : f32 to vector<16x512xf32>
    %64 = arith.mulf %62, %63 : vector<16x512xf32>
    %cst_31 = arith.constant -1.45315206 : f32
    %65 = vector.broadcast %cst_31 : f32 to vector<16x512xf32>
    %66 = arith.addf %65, %64 : vector<16x512xf32>
    %67 = arith.mulf %62, %66 : vector<16x512xf32>
    %cst_32 = arith.constant 1.42141378 : f32
    %68 = vector.broadcast %cst_32 : f32 to vector<16x512xf32>
    %69 = arith.addf %68, %67 : vector<16x512xf32>
    %70 = arith.mulf %62, %69 : vector<16x512xf32>
    %cst_33 = arith.constant -0.284496725 : f32
    %71 = vector.broadcast %cst_33 : f32 to vector<16x512xf32>
    %72 = arith.addf %71, %70 : vector<16x512xf32>
    %73 = arith.mulf %62, %72 : vector<16x512xf32>
    %cst_34 = arith.constant 0.254829586 : f32
    %74 = vector.broadcast %cst_34 : f32 to vector<16x512xf32>
    %75 = arith.addf %74, %73 : vector<16x512xf32>
    %76 = arith.mulf %62, %75 : vector<16x512xf32>
    %77 = arith.mulf %56, %56 : vector<16x512xf32>
    %cst_35 = arith.constant 0.000000e+00 : f32
    %78 = vector.broadcast %cst_35 : f32 to vector<16x512xf32>
    %79 = arith.subf %78, %77 : vector<16x512xf32>
    %80 = math.exp %79 : vector<16x512xf32>
    %81 = arith.mulf %76, %80 : vector<16x512xf32>
    %cst_36 = arith.constant 1.000000e+00 : f32
    %82 = vector.broadcast %cst_36 : f32 to vector<16x512xf32>
    %83 = arith.subf %82, %81 : vector<16x512xf32>
    %cst_37 = arith.constant 0.000000e+00 : f32
    %84 = vector.broadcast %cst_37 : f32 to vector<16x512xf32>
    %85 = arith.cmpf olt, %55, %84 : vector<16x512xf32>
    %cst_38 = arith.constant 0.000000e+00 : f32
    %86 = vector.broadcast %cst_38 : f32 to vector<16x512xf32>
    %87 = arith.subf %86, %83 : vector<16x512xf32>
    %88 = arith.select %85, %87, %83 : vector<16x512xi1>, vector<16x512xf32>
    %cst_39 = arith.constant 1.000000e+00 : f32
    %89 = vector.broadcast %cst_39 : f32 to vector<16x512xf32>
    %90 = arith.addf %89, %88 : vector<16x512xf32>
    %91 = arith.mulf %53, %90 : vector<16x512xf32>
    %92 = arith.truncf %91 : vector<16x512xf32> to vector<16x512xbf16>
    %c0_40 = arith.constant 0 : index
    %c0_41 = arith.constant 0 : index
    %93 = vector.load %arg7[%c0_40, %c0_41] : memref<512x256xbf16, #tpu.memory_space<vmem>>, vector<512x256xbf16>
    %cst_42 = arith.constant dense<0.000000e+00> : vector<16x256xf32>
    %94 = tpu.matmul %92, %93, %cst_42 {dimension_numbers = #tpu.dot_dimension_numbers<[1], [0], [0], [1], [0, 0, 1, 1], [], []>} : vector<16x512xbf16>, vector<512x256xbf16>, vector<16x256xf32> -> vector<16x256xf32>
    %c0_43 = arith.constant 0 : index
    %c0_44 = arith.constant 0 : index
    %95 = vector.load %arg8[%c0_43, %c0_44] : memref<1x256xf32, #tpu.memory_space<vmem>>, vector<1x256xf32>
    %96 = vector.broadcast %95 : vector<1x256xf32> to vector<16x256xf32>
    %97 = arith.addf %94, %96 : vector<16x256xf32>
    %cst_45 = arith.constant 5.000000e-01 : f32
    %98 = vector.broadcast %cst_45 : f32 to vector<16x256xf32>
    %99 = arith.mulf %98, %97 : vector<16x256xf32>
    %cst_46 = arith.constant 0.707106769 : f32
    %100 = vector.broadcast %cst_46 : f32 to vector<16x256xf32>
    %101 = arith.mulf %97, %100 : vector<16x256xf32>
    %102 = math.absf %101 : vector<16x256xf32>
    %cst_47 = arith.constant 0.327591091 : f32
    %103 = vector.broadcast %cst_47 : f32 to vector<16x256xf32>
    %104 = arith.mulf %103, %102 : vector<16x256xf32>
    %cst_48 = arith.constant 1.000000e+00 : f32
    %105 = vector.broadcast %cst_48 : f32 to vector<16x256xf32>
    %106 = arith.addf %105, %104 : vector<16x256xf32>
    %cst_49 = arith.constant 1.000000e+00 : f32
    %107 = vector.broadcast %cst_49 : f32 to vector<16x256xf32>
    %108 = arith.divf %107, %106 : vector<16x256xf32>
    %cst_50 = arith.constant 1.06140542 : f32
    %109 = vector.broadcast %cst_50 : f32 to vector<16x256xf32>
    %110 = arith.mulf %108, %109 : vector<16x256xf32>
    %cst_51 = arith.constant -1.45315206 : f32
    %111 = vector.broadcast %cst_51 : f32 to vector<16x256xf32>
    %112 = arith.addf %111, %110 : vector<16x256xf32>
    %113 = arith.mulf %108, %112 : vector<16x256xf32>
    %cst_52 = arith.constant 1.42141378 : f32
    %114 = vector.broadcast %cst_52 : f32 to vector<16x256xf32>
    %115 = arith.addf %114, %113 : vector<16x256xf32>
    %116 = arith.mulf %108, %115 : vector<16x256xf32>
    %cst_53 = arith.constant -0.284496725 : f32
    %117 = vector.broadcast %cst_53 : f32 to vector<16x256xf32>
    %118 = arith.addf %117, %116 : vector<16x256xf32>
    %119 = arith.mulf %108, %118 : vector<16x256xf32>
    %cst_54 = arith.constant 0.254829586 : f32
    %120 = vector.broadcast %cst_54 : f32 to vector<16x256xf32>
    %121 = arith.addf %120, %119 : vector<16x256xf32>
    %122 = arith.mulf %108, %121 : vector<16x256xf32>
    %123 = arith.mulf %102, %102 : vector<16x256xf32>
    %cst_55 = arith.constant 0.000000e+00 : f32
    %124 = vector.broadcast %cst_55 : f32 to vector<16x256xf32>
    %125 = arith.subf %124, %123 : vector<16x256xf32>
    %126 = math.exp %125 : vector<16x256xf32>
    %127 = arith.mulf %122, %126 : vector<16x256xf32>
    %cst_56 = arith.constant 1.000000e+00 : f32
    %128 = vector.broadcast %cst_56 : f32 to vector<16x256xf32>
    %129 = arith.subf %128, %127 : vector<16x256xf32>
    %cst_57 = arith.constant 0.000000e+00 : f32
    %130 = vector.broadcast %cst_57 : f32 to vector<16x256xf32>
    %131 = arith.cmpf olt, %101, %130 : vector<16x256xf32>
    %cst_58 = arith.constant 0.000000e+00 : f32
    %132 = vector.broadcast %cst_58 : f32 to vector<16x256xf32>
    %133 = arith.subf %132, %129 : vector<16x256xf32>
    %134 = arith.select %131, %133, %129 : vector<16x256xi1>, vector<16x256xf32>
    %cst_59 = arith.constant 1.000000e+00 : f32
    %135 = vector.broadcast %cst_59 : f32 to vector<16x256xf32>
    %136 = arith.addf %135, %134 : vector<16x256xf32>
    %137 = arith.mulf %99, %136 : vector<16x256xf32>
    %138 = arith.truncf %137 : vector<16x256xf32> to vector<16x256xbf16>
    %c0_60 = arith.constant 0 : index
    %c0_61 = arith.constant 0 : index
    %139 = vector.load %arg9[%c0_60, %c0_61] : memref<256x256xbf16, #tpu.memory_space<vmem>>, vector<256x256xbf16>
    %cst_62 = arith.constant dense<0.000000e+00> : vector<16x256xf32>
    %140 = tpu.matmul %138, %139, %cst_62 {dimension_numbers = #tpu.dot_dimension_numbers<[1], [0], [0], [1], [0, 0, 1, 1], [], []>} : vector<16x256xbf16>, vector<256x256xbf16>, vector<16x256xf32> -> vector<16x256xf32>
    %c0_63 = arith.constant 0 : index
    %c0_64 = arith.constant 0 : index
    %141 = vector.load %arg10[%c0_63, %c0_64] : memref<1x256xf32, #tpu.memory_space<vmem>>, vector<1x256xf32>
    %142 = vector.broadcast %141 : vector<1x256xf32> to vector<16x256xf32>
    %143 = arith.addf %140, %142 : vector<16x256xf32>
    %144 = vector.extract_strided_slice %143 {offsets = [0, 0], sizes = [16, 128], strides = [1, 1]} : vector<16x256xf32> to vector<16x128xf32>
    %145 = vector.extract_strided_slice %143 {offsets = [0, 128], sizes = [16, 128], strides = [1, 1]} : vector<16x256xf32> to vector<16x128xf32>
    %146 = math.exp %145 : vector<16x128xf32>
    %c0_65 = arith.constant 0 : index
    %c0_66 = arith.constant 0 : index
    %147 = vector.load %arg2[%c0_65, %c0_66] : memref<16x128xf32, #tpu.memory_space<vmem>>, vector<16x128xf32>
    %148 = arith.mulf %146, %147 : vector<16x128xf32>
    %149 = arith.addf %144, %148 : vector<16x128xf32>
    %c0_67 = arith.constant 0 : index
    %c0_68 = arith.constant 0 : index
    %150 = vector.load %arg11[%c0_67, %c0_68] : memref<16x128xf32, #tpu.memory_space<vmem>>, vector<16x128xf32>
    tpu.vector_store %arg11[%c0_67, %c0_68], %149 {strides = array<i32>} : memref<16x128xf32, #tpu.memory_space<vmem>>, vector<16x128xf32>,
    %151 = arith.mulf %146, %146 : vector<16x128xf32>
    %152 = arith.mulf %144, %144 : vector<16x128xf32>
    %153 = arith.addf %151, %152 : vector<16x128xf32>
    %154 = arith.subf %153, %145 : vector<16x128xf32>
    %cst_69 = arith.constant 5.000000e-01 : f32
    %155 = vector.broadcast %cst_69 : f32 to vector<16x128xf32>
    %156 = arith.subf %154, %155 : vector<16x128xf32>
    %157 = tpu.iota {dimensions = array<i32: 0>} : vector<16x128xi32>
    %c16_i32 = arith.constant 16 : i32
    %158 = arith.muli %arg0, %c16_i32 : i32
    %159 = vector.broadcast %158 : i32 to vector<16x128xi32>
    %160 = arith.addi %157, %159 : vector<16x128xi32>
    %161 = tpu.iota {dimensions = array<i32: 1>} : vector<16x128xi32>
    %c2_i32 = arith.constant 2 : i32
    %162 = vector.broadcast %c2_i32 : i32 to vector<16x128xi32>
    %163 = arith.cmpi slt, %160, %162 : vector<16x128xi32>
    %c32_i32 = arith.constant 32 : i32
    %164 = vector.broadcast %c32_i32 : i32 to vector<16x128xi32>
    %165 = arith.cmpi slt, %161, %164 : vector<16x128xi32>
    %166 = arith.andi %163, %165 : vector<16x128xi1>
    %cst_70 = arith.constant 0.000000e+00 : f32
    %167 = vector.broadcast %cst_70 : f32 to vector<16x128xf32>
    %168 = arith.select %166, %156, %167 : vector<16x128xi1>, vector<16x128xf32>
    %169 = vector.shape_cast %168 : vector<16x128xf32> to vector<2x8x128xf32>
    %cst_71 = arith.constant dense<0.000000e+00> : vector<8x128xf32>
    %170 = vector.multi_reduction <add>, %169, %cst_71 [0] : vector<2x8x128xf32> to vector<8x128xf32>
    %171 = vector.shape_cast %170 : vector<8x128xf32> to vector<1x8x128xf32>
    %c0_72 = arith.constant 0 : index
    %c0_73 = arith.constant 0 : index
    %c0_74 = arith.constant 0 : index
    %172 = vector.load %arg12[%c0_72, %c0_73, %c0_74] : memref<1x8x128xf32, #tpu.memory_space<vmem>>, vector<1x8x128xf32>
    tpu.vector_store %arg12[%c0_72, %c0_73, %c0_74], %171 {strides = array<i32>} : memref<1x8x128xf32, #tpu.memory_space<vmem>>, vector<1x8x128xf32>,
    return
  }
  func.func @transform_0(%arg0: i32) -> (i32, i32) {
    %c0_i32 = arith.constant 0 : i32
    %c0_i32_0 = arith.constant 0 : i32
    return %arg0, %c0_i32 : i32, i32
  }
  func.func @transform_1(%arg0: i32) -> (i32, i32) {
    %c0_i32 = arith.constant 0 : i32
    %c0_i32_0 = arith.constant 0 : i32
    return %arg0, %c0_i32 : i32, i32
  }
  func.func @transform_2(%arg0: i32) -> (i32, i32) {
    %c0_i32 = arith.constant 0 : i32
    %c0_i32_0 = arith.constant 0 : i32
    %c0_i32_1 = arith.constant 0 : i32
    return %c0_i32, %c0_i32_0 : i32, i32
  }
  func.func @transform_3(%arg0: i32) -> (i32, i32) {
    %c0_i32 = arith.constant 0 : i32
    %c0_i32_0 = arith.constant 0 : i32
    %c0_i32_1 = arith.constant 0 : i32
    return %c0_i32, %c0_i32_0 : i32, i32
  }
  func.func @transform_4(%arg0: i32) -> (i32, i32) {
    %c0_i32 = arith.constant 0 : i32
    %c0_i32_0 = arith.constant 0 : i32
    %c0_i32_1 = arith.constant 0 : i32
    return %c0_i32, %c0_i32_0 : i32, i32
  }
  func.func @transform_5(%arg0: i32) -> (i32, i32) {
    %c0_i32 = arith.constant 0 : i32
    %c0_i32_0 = arith.constant 0 : i32
    %c0_i32_1 = arith.constant 0 : i32
    return %c0_i32, %c0_i32_0 : i32, i32
  }
  func.func @transform_6(%arg0: i32) -> (i32, i32) {
    %c0_i32 = arith.constant 0 : i32
    %c0_i32_0 = arith.constant 0 : i32
    %c0_i32_1 = arith.constant 0 : i32
    return %c0_i32, %c0_i32_0 : i32, i32
  }
  func.func @transform_7(%arg0: i32) -> (i32, i32) {
    %c0_i32 = arith.constant 0 : i32
    %c0_i32_0 = arith.constant 0 : i32
    %c0_i32_1 = arith.constant 0 : i32
    return %c0_i32, %c0_i32_0 : i32, i32
  }
  func.func @transform_8(%arg0: i32) -> (i32, i32) {
    %c0_i32 = arith.constant 0 : i32
    %c0_i32_0 = arith.constant 0 : i32
    %c0_i32_1 = arith.constant 0 : i32
    return %c0_i32, %c0_i32_0 : i32, i32
  }
  func.func @transform_9(%arg0: i32) -> (i32, i32) {
    %c0_i32 = arith.constant 0 : i32
    %c0_i32_0 = arith.constant 0 : i32
    %c0_i32_1 = arith.constant 0 : i32
    return %c0_i32, %c0_i32_0 : i32, i32
  }
  func.func @transform_10(%arg0: i32) -> (i32, i32) {
    %c0_i32 = arith.constant 0 : i32
    %c0_i32_0 = arith.constant 0 : i32
    return %arg0, %c0_i32 : i32, i32
  }
  func.func @transform_11(%arg0: i32) -> (i32, i32, i32) {
    %c0_i32 = arith.constant 0 : i32
    %c0_i32_0 = arith.constant 0 : i32
    %c0_i32_1 = arith.constant 0 : i32
    return %arg0, %c0_i32, %c0_i32_0 : i32, i32, i32
  }
}

</mosaic_0001>

<bundles_post_ra>
// kernel: variational_encoder_forward.1
= control target key start
LH: loop header
LB: loop body
LE: loop exit
PB: predicated region body
PF: predicated region fallthrough
CT: control target
= control target key end

     0   :  { %17 = vsyncpa [#allocation3], 0  ;;  %s9211_s0 = inlined_call_operand.vmem [shape: bf16[16,784], index: 0, kind: input, shape index: {}]   ;;  %s9212_s1 = inlined_call_operand.vmem [shape: f32[16,128], index: 1, kind: input, shape index: {}]   ;;  %s9213_s2 = inlined_call_operand.hbm [shape: bf16[784,1024], index: 2, kind: input, shape index: {}]   ;;  %s9214_s3 = inlined_call_operand.hbm [shape: f32[1,1024], index: 3, kind: input, shape index: {}]   ;;  %s9215_s4 = inlined_call_operand.hbm [shape: bf16[1024,512], index: 4, kind: input, shape index: {}]   ;;  %s9216_s5 = inlined_call_operand.hbm [shape: f32[1,512], index: 5, kind: input, shape index: {}]   ;;  %s9217_s6 = inlined_call_operand.hbm [shape: bf16[512,256], index: 6, kind: input, shape index: {}]   ;;  %s9218_s7 = inlined_call_operand.hbm [shape: f32[1,256], index: 7, kind: input, shape index: {}]   ;;  %s9219_s8 = inlined_call_operand.hbm [shape: bf16[256,256], index: 8, kind: input, shape index: {}]   ;;  %s9220_s9 = inlined_call_operand.hbm [shape: f32[1,256], index: 9, kind: input, shape index: {}]   ;;  %s9221_s10 = inlined_call_operand.vmem [shape: f32[16,128], index: 10, kind: output, shape index: {0}]   ;;  %s9222_s11 = inlined_call_operand.vmem [shape: f32[1,8,128], index: 11, kind: output, shape index: {1}]  }
   0x1   :  { %18 = vsyncpa [#allocation5], 0 }
   0x2   :  { %19 = vsyncpa [#allocation8], 0 }
   0x3   :  { %20 = vsyncpa [#allocation11], 0 }
   0x4   :  { %21 = vsyncpa [#allocation14], 0  ;;  %s8447_s17 = smov [#allocation4]   ;;  %s8448_s19 = smov [#allocation7]  }
   0x5   :  { %s44_s18 = sshll.u32 %s8447_s17, 4  ;;  %s66_s20 = sshll.u32 %s8448_s19, 4  ;;  %s45_s18 = int_to_ptr.vmem [resolvable:$true] %s44_s18  ;;  %s67_s20 = int_to_ptr.vmem [resolvable:$true] %s66_s20 }
   0x6   :  { %s8261_s23 = scalar_lea.hbm %s9214_s3, 128 }
   0x7   :  { %p8262_p0 = scmp.ne.s32.totalorder %s9214_s3, %s8261_s23  ;;  %p8265_p1 = scmp.lt.u32.totalorder %s8261_s23, %s9214_s3 }
   0x9   :  { %p8267_p2 = pnand %p8265_p1, %p8262_p0 }
   0xb   :  { %8270 = shalt.err (!%p8267_p2)
}
   0xc   :  { %s8271_s28 = scalar_lea.vmem %s45_s18, 128  ;;  %p8276_p4 = scmp.lt.s32.totalorder %s45_s18, %s45_s18 }
   0xd   :  { %p8272_p3 = scmp.ne.s32.totalorder %s45_s18, %s8271_s28  ;;  %p8277_p5 = scmp.lt.s32.totalorder %s8271_s28, %s8271_s28 }
   0xf   :  { %p8278_p6 = por %p8277_p5, %p8276_p4 }
  0x11   :  { %p8279_p7 = pnand %p8278_p6, %p8272_p3 }
  0x13   :  { %8282 = shalt.err (!%p8279_p7)
}
  0x14   :  { %47 = dma.hbm_to_vmem [thread:$0]  %s9214_s3, 128, %s45_s18, [#allocation5]  }
  0x15   :  { %s8283_s14 = scalar_lea.hbm %s9216_s5, 64 }
  0x16   :  { %p8284_p8 = scmp.ne.s32.totalorder %s9216_s5, %s8283_s14  ;;  %p8287_p9 = scmp.lt.u32.totalorder %s8283_s14, %s9216_s5 }
  0x18   :  { %p8289_p10 = pnand %p8287_p9, %p8284_p8 }
  0x1a   :  { %8292 = shalt.err (!%p8289_p10)
}
  0x1b   :  { %s8293_s21 = scalar_lea.vmem %s67_s20, 64  ;;  %p8298_p12 = scmp.lt.s32.totalorder %s67_s20, %s67_s20 }
  0x1c   :  { %p8294_p11 = scmp.ne.s32.totalorder %s67_s20, %s8293_s21  ;;  %p8299_p13 = scmp.lt.s32.totalorder %s8293_s21, %s8293_s21 }
  0x1e   :  { %p8300_p0 = por %p8299_p13, %p8298_p12 }
  0x20   :  { %p8301_p1 = pnand %p8300_p0, %p8294_p11 }
  0x22   :  { %8304 = shalt.err (!%p8301_p1)
}
  0x23   :  { %69 = dma.hbm_to_vmem [thread:$0]  %s9216_s5, 64, %s67_s20, [#allocation8]  }
  0x24   :  { %s8449_s22 = smov [#allocation10]   ;;  %s8450_s24 = smov [#allocation2]  }
  0x25   :  { %s88_s23 = sshll.u32 %s8449_s22, 4  ;;  %s31_s25 = sshll.u32 %s8450_s24, 4  ;;  %s89_s23 = int_to_ptr.vmem [resolvable:$true] %s88_s23  ;;  %s8546_s25 = int_to_ptr.vmem [resolvable:$true] %s31_s25 }
  0x26   :  { %s8305_s28 = scalar_lea.hbm %s9218_s7, 32 }
  0x27   :  { %p8306_p2 = scmp.ne.s32.totalorder %s9218_s7, %s8305_s28  ;;  %p8309_p3 = scmp.lt.u32.totalorder %s8305_s28, %s9218_s7 }
  0x29   :  { %p8311_p4 = pnand %p8309_p3, %p8306_p2 }
  0x2b   :  { %8314 = shalt.err (!%p8311_p4)
}
  0x2c   :  { %s8315_s5 = scalar_lea.vmem %s89_s23, 32  ;;  %p8320_p6 = scmp.lt.s32.totalorder %s89_s23, %s89_s23 }
  0x2d   :  { %p8316_p5 = scmp.ne.s32.totalorder %s89_s23, %s8315_s5  ;;  %p8321_p7 = scmp.lt.s32.totalorder %s8315_s5, %s8315_s5 }
  0x2f   :  { %p8322_p8 = por %p8321_p7, %p8320_p6 }
  0x31   :  { %p8323_p9 = pnand %p8322_p8, %p8316_p5 }
  0x33   :  { %8326 = shalt.err (!%p8323_p9)
}
  0x34   :  { %91 = dma.hbm_to_vmem [thread:$0]  %s9218_s7, 32, %s89_s23, [#allocation11]  }
  0x35   :  { %s8327_s17 = scalar_lea.hbm %s9213_s2, 50176 }
  0x36   :  { %p8328_p10 = scmp.ne.s32.totalorder %s9213_s2, %s8327_s17  ;;  %p8331_p11 = scmp.lt.u32.totalorder %s8327_s17, %s9213_s2 }
  0x38   :  { %p8333_p12 = pnand %p8331_p11, %p8328_p10 }
  0x3a   :  { %8336 = shalt.err (!%p8333_p12)
}
  0x3b   :  { %s8337_s22 = scalar_lea.vmem %s8546_s25, 50176  ;;  %p8342_p0 = scmp.lt.s32.totalorder %s8546_s25, %s8546_s25 }
  0x3c   :  { %p8338_p13 = scmp.ne.s32.totalorder %s8546_s25, %s8337_s22  ;;  %p8343_p1 = scmp.lt.s32.totalorder %s8337_s22, %s8337_s22 }
  0x3e   :  { %p8344_p2 = por %p8343_p1, %p8342_p0 }
  0x40   :  { %p8345_p3 = pnand %p8344_p2, %p8338_p13 }
  0x42   :  { %8348 = shalt.err (!%p8345_p3)
}
  0x43   :  { %s8451_s7 = smov 512   ;;  %s8452_s23 = smov 32  }
  0x44   :  { %37 = dma.hbm_to_vmem [thread:$0]  %s9213_s2, 50176, %s8546_s25, [#allocation3], %s8451_s7, %s8451_s7, %s8452_s23  }
  0x45   :  { %s8453_s27 = smov [#allocation6]   ;;  %s8349_s12 = scalar_lea.hbm %s9215_s4, 32768 }
  0x46   :  { %s53_s28 = sshll.u32 %s8453_s27, 4  ;;  %p8350_p4 = scmp.ne.s32.totalorder %s9215_s4, %s8349_s12  ;;  %s54_s28 = int_to_ptr.vmem [resolvable:$true] %s53_s28 }
  0x47   :  { %p8353_p5 = scmp.lt.u32.totalorder %s8349_s12, %s9215_s4 }
  0x49   :  { %p8355_p6 = pnand %p8353_p5, %p8350_p4 }
  0x4b   :  { %8358 = shalt.err (!%p8355_p6)
}
  0x4c   :  { %s8359_s15 = scalar_lea.vmem %s54_s28, 32768  ;;  %p8364_p8 = scmp.lt.s32.totalorder %s54_s28, %s54_s28 }
  0x4d   :  { %p8360_p7 = scmp.ne.s32.totalorder %s54_s28, %s8359_s15  ;;  %p8365_p9 = scmp.lt.s32.totalorder %s8359_s15, %s8359_s15 }
  0x4f   :  { %p8366_p10 = por %p8365_p9, %p8364_p8 }
  0x51   :  { %p8367_p11 = pnand %p8366_p10, %p8360_p7 }
  0x53   :  { %8370 = shalt.err (!%p8367_p11)
}
  0x54   :  { %s8454_s2 = smov 256   ;;  %s8455_s25 = smov 16  }
  0x55   :  { %59 = dma.hbm_to_vmem [thread:$0]  %s9215_s4, 32768, %s54_s28, [#allocation5], %s8454_s2, %s8454_s2, %s8455_s25  }
  0x56   :  { %s8456_s19 = smov [#allocation9]   ;;  %s8371_s22 = scalar_lea.hbm %s9217_s6, 8192 }
  0x57   :  { %s75_s21 = sshll.u32 %s8456_s19, 4  ;;  %p8372_p12 = scmp.ne.s32.totalorder %s9217_s6, %s8371_s22  ;;  %s76_s21 = int_to_ptr.vmem [resolvable:$true] %s75_s21 }
  0x58   :  { %p8375_p13 = scmp.lt.u32.totalorder %s8371_s22, %s9217_s6 }
  0x5a   :  { %p8377_p0 = pnand %p8375_p13, %p8372_p12 }
  0x5c   :  { %8380 = shalt.err (!%p8377_p0)
}
  0x5d   :  { %s8381_s27 = scalar_lea.vmem %s76_s21, 8192  ;;  %p8386_p2 = scmp.lt.s32.totalorder %s76_s21, %s76_s21 }
  0x5e   :  { %p8382_p1 = scmp.ne.s32.totalorder %s76_s21, %s8381_s27  ;;  %p8387_p3 = scmp.lt.s32.totalorder %s8381_s27, %s8381_s27 }
  0x60   :  { %p8388_p4 = por %p8387_p3, %p8386_p2 }
  0x62   :  { %p8389_p5 = pnand %p8388_p4, %p8382_p1 }
  0x64   :  { %8392 = shalt.err (!%p8389_p5)
}
  0x65   :  { %s8457_s4 = smov 128   ;;  %s8458_s28 = smov 8  }
  0x66   :  { %81 = dma.hbm_to_vmem [thread:$0]  %s9217_s6, 8192, %s76_s21, [#allocation8], %s8457_s4, %s8457_s4, %s8458_s28  }
  0x67   :  { %s8459_s12 = smov [#allocation12]   ;;  %s8460_s5 = smov [#allocation13]  }
  0x68   :  { %s97_s13 = sshll.u32 %s8459_s12, 4  ;;  %s110_s20 = sshll.u32 %s8460_s5, 4  ;;  %s98_s13 = int_to_ptr.vmem [resolvable:$true] %s97_s13  ;;  %s111_s20 = int_to_ptr.vmem [resolvable:$true] %s110_s20 }
  0x69   :  { %s8393_s2 = scalar_lea.hbm %s9219_s8, 4096 }
  0x6a   :  { %p8394_p6 = scmp.ne.s32.totalorder %s9219_s8, %s8393_s2  ;;  %p8397_p7 = scmp.lt.u32.totalorder %s8393_s2, %s9219_s8 }
  0x6c   :  { %p8399_p8 = pnand %p8397_p7, %p8394_p6 }
  0x6e   :  { %8402 = shalt.err (!%p8399_p8)
}
  0x6f   :  { %s8403_s6 = scalar_lea.vmem %s98_s13, 4096  ;;  %p8408_p10 = scmp.lt.s32.totalorder %s98_s13, %s98_s13 }
  0x70   :  { %p8404_p9 = scmp.ne.s32.totalorder %s98_s13, %s8403_s6  ;;  %p8409_p11 = scmp.lt.s32.totalorder %s8403_s6, %s8403_s6 }
  0x72   :  { %p8410_p12 = por %p8409_p11, %p8408_p10 }
  0x74   :  { %p8411_p13 = pnand %p8410_p12, %p8404_p9 }
  0x76   :  { %8414 = shalt.err (!%p8411_p13)
}
  0x77   :  { %103 = dma.hbm_to_vmem [thread:$0]  %s9219_s8, 4096, %s98_s13, [#allocation11], %s8457_s4, %s8457_s4, %s8458_s28  }
  0x78   :  { %s8415_s7 = scalar_lea.hbm %s9220_s9, 32 }
  0x79   :  { %p8416_p0 = scmp.ne.s32.totalorder %s9220_s9, %s8415_s7  ;;  %p8419_p1 = scmp.lt.u32.totalorder %s8415_s7, %s9220_s9 }
  0x7b   :  { %p8421_p2 = pnand %p8419_p1, %p8416_p0 }
  0x7d   :  { %8424 = shalt.err (!%p8421_p2)
}
  0x7e   :  { %s8425_s29 = scalar_lea.vmem %s111_s20, 32  ;;  %p8430_p4 = scmp.lt.s32.totalorder %s111_s20, %s111_s20 }
  0x7f   :  { %p8426_p3 = scmp.ne.s32.totalorder %s111_s20, %s8425_s29  ;;  %p8431_p5 = scmp.lt.s32.totalorder %s8425_s29, %s8425_s29 }
  0x81   :  { %p8432_p6 = por %p8431_p5, %p8430_p4 }
  0x83   :  { %p8433_p7 = pnand %p8432_p6, %p8426_p3 }
  0x85   :  { %8436 = shalt.err (!%p8433_p7)
}
  0x86   :  { %113 = dma.hbm_to_vmem [thread:$0]  %s9220_s9, 32, %s111_s20, [#allocation14]  }
  0x87   :  { %8437 = dma.done.wait [#allocation3], 50176  }
  0x88   :  { %8438 = vsyncadd [#allocation3], 4294917120 }
  0x89   :  { %8439 = dma.done.wait [#allocation5], 32896  }
  0x8a   :  { %8440 = vsyncadd [#allocation5], 4294934400 }
  0x8b   :  { %8441 = dma.done.wait [#allocation8], 8256  }
  0x8c   :  { %8442 = vsyncadd [#allocation8], 4294959040 }
  0x8d   :  { %8443 = dma.done.wait [#allocation11], 4128  }
  0x8e   :  { %8444 = vsyncadd [#allocation11], 4294963168 }
  0x8f   :  { %8445 = dma.done.wait [#allocation14], 32  }
  0x90   :  { %8446 = vsyncadd [#allocation14], 4294967264  ;;  %v8461_v0 = vmov 0   ;;  %v147_v1 = vld [vmem:[#allocation2] sm:$0xff]  ;;  %v148_v12 = vld [vmem:[#allocation2 + $0x8] sm:$0xff]  ;;  %vm2576_vm0 = vcmask 130048  }
  0x91   :  { %2741 = vmatprep.mubr.bf16.mxu1 %v8461_v0  ;;  %v151_v2 = vld [vmem:[#allocation2 + $0x20] sm:$0xff]  ;;  %v152_v13 = vld [vmem:[#allocation2 + $0x28] sm:$0xff]  ;;  %v7598_v15 = vld [vmem:[%s9211_s0 + $0x18] ss:$28 sps:$4 sm:$0xff]  }
  0x92   :  { %v531_v3 = vld [vmem:[#allocation2 + $0xc00] sm:$0xff]  ;;  %v6730_v4 = vcombine.high %v147_v1, %v151_v2  ;;  %v6729_v6 = vcombine.low %v147_v1, %v151_v2  ;;  %v6732_v14 = vcombine.high %v148_v12, %v152_v13  ;;  %v156_v19 = vld [vmem:[#allocation2 + $0x48] sm:$0xff]  ;;  %v6731_v21 = vcombine.low %v148_v12, %v152_v13 }
  0x93   :  { %v535_v5 = vld [vmem:[#allocation2 + $0xc20] sm:$0xff]  ;;  %v160_v20 = vld [vmem:[#allocation2 + $0x68] sm:$0xff] }
  0x94   :  { %v155_v7 = vld [vmem:[#allocation2 + $0x40] sm:$0xff]  ;;  %v7114_v9 = vcombine.high %v531_v3, %v535_v5  ;;  %v7113_v10 = vcombine.low %v531_v3, %v535_v5  ;;  %2580 = vmatprep.subr.bf16.mxu0 %v6730_v4  ;;  %v6740_v23 = vcombine.high %v156_v19, %v160_v20  ;;  %v164_v26 = vld [vmem:[#allocation2 + $0x88] sm:$0xff]  ;;  %v6739_v29 = vcombine.low %v156_v19, %v160_v20 }
  0x95   :  { %v159_v8 = vld [vmem:[#allocation2 + $0x60] sm:$0xff]  ;;  %2581 = vmatpush1.bf16.msra.mxu0 %v6729_v6  ;;  %v168_v27 = vld [vmem:[#allocation2 + $0xa8] sm:$0xff] }
  0x96   :  { %v6738_v11 = vcombine.high %v155_v7, %v159_v8  ;;  %v163_v16 = vld [vmem:[#allocation2 + $0x80] sm:$0xff]  ;;  %2709 = vmatprep.subr.bf16.mxu1 %v7114_v9  ;;  %v6737_v17 = vcombine.low %v155_v7, %v159_v8  ;;  %v6748_v31 = vcombine.high %v164_v26, %v168_v27  ;;  %v172_v34 = vld [vmem:[#allocation2 + $0xc8] sm:$0xff]  ;;  %v6747_v37 = vcombine.low %v164_v26, %v168_v27 }
  0x97   :  { %v167_v18 = vld [vmem:[#allocation2 + $0xa0] sm:$0xff]  ;;  %2710 = vmatpush1.bf16.msra.mxu1 %v7113_v10  ;;  %v176_v35 = vld [vmem:[#allocation2 + $0xe8] sm:$0xff] }
  0x98   :  { %2582 = vmatprep.subr.bf16.mxu0 %v6738_v11  ;;  %v6746_v22 = vcombine.high %v163_v16, %v167_v18  ;;  %2752 = vmatprep.subr.bf16.mxu1 %v6732_v14  ;;  %v171_v24 = vld [vmem:[#allocation2 + $0xc0] sm:$0xff]  ;;  %v6745_v28 = vcombine.low %v163_v16, %v167_v18  ;;  %v6756_v39 = vcombine.high %v172_v34, %v176_v35  ;;  %v180_v42 = vld [vmem:[#allocation2 + $0x108] sm:$0xff] }
  0x99   :  { %v175_v25 = vld [vmem:[#allocation2 + $0xe0] sm:$0xff]  ;;  %2583 = vmatpush1.bf16.msra.mxu0 %v6737_v17  ;;  %v184_v43 = vld [vmem:[#allocation2 + $0x128] sm:$0xff]  ;;  %v6755_v45 = vcombine.low %v172_v34, %v176_v35 }
  0x9a   :  { %7121 = vmatmul.mubr.msk.bf16.vlgmr.msra.gmra.mrb[0].mxu1 %vm2576_vm0, %v7598_v15  ;;  %2584 = vmatprep.subr.bf16.mxu0 %v6746_v22  ;;  %v6754_v30 = vcombine.high %v171_v24, %v175_v25  ;;  %v179_v32 = vld [vmem:[#allocation2 + $0x100] sm:$0xff]  ;;  %v6753_v36 = vcombine.low %v171_v24, %v175_v25  ;;  %v6764_v47 = vcombine.high %v180_v42, %v184_v43  ;;  %v188_v50 = vld [vmem:[#allocation2 + $0x148] sm:$0xff] }
  0x9b   :  { %2753 = vmatpush1.bf16.msra.mxu1 %v6731_v21  ;;  %v183_v33 = vld [vmem:[#allocation2 + $0x120] sm:$0xff]  ;;  %v192_v51 = vld [vmem:[#allocation2 + $0x168] sm:$0xff]  ;;  %v6763_v53 = vcombine.low %v180_v42, %v184_v43 }
  0x9c   :  { %2754 = vmatprep.subr.bf16.mxu1 %v6740_v23  ;;  %v6762_v38 = vcombine.high %v179_v32, %v183_v33  ;;  %v187_v40 = vld [vmem:[#allocation2 + $0x140] sm:$0xff]  ;;  %v6761_v44 = vcombine.low %v179_v32, %v183_v33  ;;  %v6772_v56 = vcombine.high %v188_v50, %v192_v51  ;;  %v196_v58 = vld [vmem:[#allocation2 + $0x188] sm:$0xff]  ;;  %v6771_v62 = vcombine.low %v188_v50, %v192_v51 }
  0x9d   :  { %2585 = vmatpush1.bf16.msra.mxu0 %v6745_v28  ;;  %v191_v41 = vld [vmem:[#allocation2 + $0x160] sm:$0xff]  ;;  %v200_v59 = vld [vmem:[#allocation2 + $0x1a8] sm:$0xff] }
  0x9e   :  { %2586 = vmatprep.subr.bf16.mxu0 %v6754_v30  ;;  %v6770_v46 = vcombine.high %v187_v40, %v191_v41  ;;  %v195_v48 = vld [vmem:[#allocation2 + $0x180] sm:$0xff]  ;;  %v6769_v52 = vcombine.low %v187_v40, %v191_v41  ;;  %v6780_v1 = vcombine.high %v196_v58, %v200_v59  ;;  %v204_v4 = vld [vmem:[#allocation2 + $0x1c8] sm:$0xff]  ;;  %v6779_v7 = vcombine.low %v196_v58, %v200_v59 }
  0x9f   :  { %2755 = vmatpush1.bf16.msra.mxu1 %v6739_v29  ;;  %v199_v49 = vld [vmem:[#allocation2 + $0x1a0] sm:$0xff]  ;;  %v208_v5 = vld [vmem:[#allocation2 + $0x1e8] sm:$0xff] }
  0xa0   :  { %2756 = vmatprep.subr.bf16.mxu1 %v6748_v31  ;;  %v6778_v54 = vcombine.high %v195_v48, %v199_v49  ;;  %v203_v55 = vld [vmem:[#allocation2 + $0x1c0] sm:$0xff]  ;;  %v6777_v61 = vcombine.low %v195_v48, %v199_v49  ;;  %v6788_v9 = vcombine.high %v204_v4, %v208_v5  ;;  %v212_v12 = vld [vmem:[#allocation2 + $0x208] sm:$0xff]  ;;  %v6787_v15 = vcombine.low %v204_v4, %v208_v5 }
  0xa1   :  { %2587 = vmatpush1.bf16.msra.mxu0 %v6753_v36  ;;  %v207_v57 = vld [vmem:[#allocation2 + $0x1e0] sm:$0xff]  ;;  %v216_v13 = vld [vmem:[#allocation2 + $0x228] sm:$0xff] }
  0xa2   :  { %2588 = vmatprep.subr.bf16.mxu0 %v6762_v38  ;;  %v7599_v60 = vld [vmem:[%s9211_s0 + $0x4] ss:$28 sps:$4 sm:$0xff]   ;;  %v6786_v63 = vcombine.high %v203_v55, %v207_v57  ;;  %v6785_v6 = vcombine.low %v203_v55, %v207_v57  ;;  %v6796_v17 = vcombine.high %v212_v12, %v216_v13  ;;  %v220_v20 = vld [vmem:[#allocation2 + $0x248] sm:$0xff]  ;;  %v6795_v23 = vcombine.low %v212_v12, %v216_v13 }
  0xa3   :  { %2757 = vmatpush1.bf16.msra.mxu1 %v6747_v37  ;;  %v211_v2 = vld [vmem:[#allocation2 + $0x200] sm:$0xff]  ;;  %2612 = vmatprep.mubr.bf16.mxu0 %v7599_v60  ;;  %v224_v21 = vld [vmem:[#allocation2 + $0x268] sm:$0xff] }
  0xa4   :  { %2758 = vmatprep.subr.bf16.mxu1 %v6756_v39  ;;  %v215_v3 = vld [vmem:[#allocation2 + $0x220] sm:$0xff]  ;;  %2784 = vmatprep.mubr.bf16.mxu1 %v7599_v60  ;;  %v6804_v25 = vcombine.high %v220_v20, %v224_v21  ;;  %v228_v28 = vld [vmem:[#allocation2 + $0x288] sm:$0xff]  ;;  %v6803_v31 = vcombine.low %v220_v20, %v224_v21 }
  0xa5   :  { %2589 = vmatpush1.bf16.msra.mxu0 %v6761_v44  ;;  %v6794_v8 = vcombine.high %v211_v2, %v215_v3  ;;  %v219_v10 = vld [vmem:[#allocation2 + $0x240] sm:$0xff]  ;;  %v6793_v14 = vcombine.low %v211_v2, %v215_v3  ;;  %v232_v29 = vld [vmem:[#allocation2 + $0x2a8] sm:$0xff] }
  0xa6   :  { %2590 = vmatprep.subr.bf16.mxu0 %v6770_v46  ;;  %v223_v11 = vld [vmem:[#allocation2 + $0x260] sm:$0xff]  ;;  %v6812_v33 = vcombine.high %v228_v28, %v232_v29  ;;  %v236_v36 = vld [vmem:[#allocation2 + $0x2c8] sm:$0xff]  ;;  %v6811_v39 = vcombine.low %v228_v28, %v232_v29 }
  0xa7   :  { %2759 = vmatpush1.bf16.msra.mxu1 %v6755_v45  ;;  %v6802_v16 = vcombine.high %v219_v10, %v223_v11  ;;  %v227_v18 = vld [vmem:[#allocation2 + $0x280] sm:$0xff]  ;;  %v6801_v22 = vcombine.low %v219_v10, %v223_v11  ;;  %v240_v37 = vld [vmem:[#allocation2 + $0x2e8] sm:$0xff] }
  0xa8   :  { %2760 = vmatprep.subr.bf16.mxu1 %v6764_v47  ;;  %v231_v19 = vld [vmem:[#allocation2 + $0x2a0] sm:$0xff]  ;;  %v6820_v41 = vcombine.high %v236_v36, %v240_v37  ;;  %v244_v44 = vld [vmem:[#allocation2 + $0x308] sm:$0xff]  ;;  %v6819_v47 = vcombine.low %v236_v36, %v240_v37 }
  0xa9   :  { %2591 = vmatpush1.bf16.msra.mxu0 %v6769_v52  ;;  %v6810_v24 = vcombine.high %v227_v18, %v231_v19  ;;  %v235_v26 = vld [vmem:[#allocation2 + $0x2c0] sm:$0xff]  ;;  %v6809_v30 = vcombine.low %v227_v18, %v231_v19  ;;  %v248_v45 = vld [vmem:[#allocation2 + $0x328] sm:$0xff] }
  0xaa   :  { %2592 = vmatprep.subr.bf16.mxu0 %v6778_v54  ;;  %v239_v27 = vld [vmem:[#allocation2 + $0x2e0] sm:$0xff]  ;;  %v6828_v49 = vcombine.high %v244_v44, %v248_v45  ;;  %v252_v52 = vld [vmem:[#allocation2 + $0x348] sm:$0xff]  ;;  %v6827_v55 = vcombine.low %v244_v44, %v248_v45 }
  0xab   :  { %2761 = vmatpush1.bf16.msra.mxu1 %v6763_v53  ;;  %v6818_v32 = vcombine.high %v235_v26, %v239_v27  ;;  %v243_v34 = vld [vmem:[#allocation2 + $0x300] sm:$0xff]  ;;  %v6817_v38 = vcombine.low %v235_v26, %v239_v27  ;;  %v256_v53 = vld [vmem:[#allocation2 + $0x368] sm:$0xff] }
  0xac   :  { %2762 = vmatprep.subr.bf16.mxu1 %v6772_v56  ;;  %v247_v35 = vld [vmem:[#allocation2 + $0x320] sm:$0xff]  ;;  %v6836_v57 = vcombine.high %v252_v52, %v256_v53  ;;  %v260_v60 = vld [vmem:[#allocation2 + $0x388] sm:$0xff] }
  0xad   :  { %2593 = vmatpush1.bf16.msra.mxu0 %v6777_v61  ;;  %v6826_v40 = vcombine.high %v243_v34, %v247_v35  ;;  %v251_v42 = vld [vmem:[#allocation2 + $0x340] sm:$0xff]  ;;  %v6825_v46 = vcombine.low %v243_v34, %v247_v35  ;;  %v264_v61 = vld [vmem:[#allocation2 + $0x3a8] sm:$0xff] }
  0xae   :  { %2594 = vmatprep.subr.bf16.mxu0 %v6786_v63  ;;  %v255_v43 = vld [vmem:[#allocation2 + $0x360] sm:$0xff]  ;;  %v6835_v63 = vcombine.low %v252_v52, %v256_v53  ;;  %v6844_v2 = vcombine.high %v260_v60, %v264_v61  ;;  %v268_v5 = vld [vmem:[#allocation2 + $0x3c8] sm:$0xff] }
  0xaf   :  { %2763 = vmatpush1.bf16.msra.mxu1 %v6771_v62  ;;  %v6834_v48 = vcombine.high %v251_v42, %v255_v43  ;;  %v259_v50 = vld [vmem:[#allocation2 + $0x380] sm:$0xff]  ;;  %v6833_v54 = vcombine.low %v251_v42, %v255_v43 }
  0xb0   :  { %2764 = vmatprep.subr.bf16.mxu1 %v6780_v1  ;;  %v263_v51 = vld [vmem:[#allocation2 + $0x3a0] sm:$0xff] }
  0xb1   :  { %2595 = vmatpush1.bf16.msra.mxu0 %v6785_v6  ;;  %v6842_v56 = vcombine.high %v259_v50, %v263_v51  ;;  %v267_v58 = vld [vmem:[#allocation2 + $0x3c0] sm:$0xff]  ;;  %v6841_v62 = vcombine.low %v259_v50, %v263_v51  ;;  %v272_v6 = vld [vmem:[#allocation2 + $0x3e8] sm:$0xff] }
  0xb2   :  { %2596 = vmatprep.subr.bf16.mxu0 %v6794_v8  ;;  %v271_v59 = vld [vmem:[#allocation2 + $0x3e0] sm:$0xff]  ;;  %v6843_v8 = vcombine.low %v260_v60, %v264_v61  ;;  %v6852_v10 = vcombine.high %v268_v5, %v272_v6  ;;  %v6851_v18 = vcombine.low %v268_v5, %v272_v6 }
  0xb3   :  { %2765 = vmatpush1.bf16.msra.mxu1 %v6779_v7  ;;  %v6850_v1 = vcombine.high %v267_v58, %v271_v59  ;;  %v275_v3 = vld [vmem:[#allocation2 + $0x400] sm:$0xff]  ;;  %v6849_v7 = vcombine.low %v267_v58, %v271_v59 }
  0xb4   :  { %2766 = vmatprep.subr.bf16.mxu1 %v6788_v9  ;;  %v279_v4 = vld [vmem:[#allocation2 + $0x420] sm:$0xff] }
  0xb5   :  { %2597 = vmatpush1.bf16.msra.mxu0 %v6793_v14  ;;  %v6858_v9 = vcombine.high %v275_v3, %v279_v4  ;;  %v283_v11 = vld [vmem:[#allocation2 + $0x440] sm:$0xff]  ;;  %v276_v14 = vld [vmem:[#allocation2 + $0x408] sm:$0xff] }
  0xb6   :  { %2598 = vmatprep.subr.bf16.mxu0 %v6802_v16  ;;  %v287_v12 = vld [vmem:[#allocation2 + $0x460] sm:$0xff]  ;;  %v6857_v16 = vcombine.low %v275_v3, %v279_v4 }
  0xb7   :  { %2767 = vmatpush1.bf16.msra.mxu1 %v6787_v15  ;;  %v7601_v13 = vld [vmem:[%s9211_s0] ss:$28 sps:$4 sm:$0xff]   ;;  %v280_v15 = vld [vmem:[#allocation2 + $0x428] sm:$0xff]  ;;  %v6866_v19 = vcombine.high %v283_v11, %v287_v12 }
  0xb8   :  { %2768 = vmatprep.subr.bf16.mxu1 %v6796_v17  ;;  %v7602_v17 = vld [vmem:[%s9211_s0 + $0xc] ss:$28 sps:$4 sm:$0xff]   ;;  %v6860_v20 = vcombine.high %v276_v14, %v280_v15  ;;  %v291_v21 = vld [vmem:[#allocation2 + $0x480] sm:$0xff]  ;;  %v6859_v26 = vcombine.low %v276_v14, %v280_v15 }
  0xb9   :  { %2599 = vmatpush1.bf16.msra.mxu0 %v6801_v22  ;;  %v295_v22 = vld [vmem:[#allocation2 + $0x4a0] sm:$0xff] }
  0xba   :  { %2600 = vmatprep.subr.bf16.mxu0 %v6810_v24  ;;  %v288_v24 = vld [vmem:[#allocation2 + $0x468] sm:$0xff]  ;;  %v6874_v27 = vcombine.high %v291_v21, %v295_v22  ;;  %v299_v28 = vld [vmem:[#allocation2 + $0x4c0] sm:$0xff] }
  0xbb   :  { %2769 = vmatpush1.bf16.msra.mxu1 %v6795_v23  ;;  %v284_v23 = vld [vmem:[#allocation2 + $0x448] sm:$0xff]  ;;  %v307_v34 = vld [vmem:[#allocation2 + $0x500] sm:$0xff] }
  0xbc   :  { %2770 = vmatprep.subr.bf16.mxu1 %v6804_v25  ;;  %v6865_v25 = vcombine.low %v283_v11, %v287_v12  ;;  %v6868_v29 = vcombine.high %v284_v23, %v288_v24  ;;  %v311_v35 = vld [vmem:[#allocation2 + $0x520] sm:$0xff]  ;;  %v6867_v36 = vcombine.low %v284_v23, %v288_v24  ;;  %v348_v24 = vld [vmem:[#allocation2 + $0x648] sm:$0xff] }
  0xbd   :  { %2601 = vmatpush1.bf16.msra.mxu0 %v6809_v30  ;;  %v303_v30 = vld [vmem:[#allocation2 + $0x4e0] sm:$0xff]  ;;  %v6890_v45 = vcombine.high %v307_v34, %v311_v35 }
  0xbe   :  { %2602 = vmatprep.subr.bf16.mxu0 %v6818_v32  ;;  %v296_v32 = vld [vmem:[#allocation2 + $0x4a8] sm:$0xff]  ;;  %v6882_v37 = vcombine.high %v299_v28, %v303_v30  ;;  %v315_v42 = vld [vmem:[#allocation2 + $0x540] sm:$0xff] }
  0xbf   :  { %2771 = vmatpush1.bf16.msra.mxu1 %v6803_v31  ;;  %v292_v31 = vld [vmem:[#allocation2 + $0x488] sm:$0xff]  ;;  %v319_v43 = vld [vmem:[#allocation2 + $0x560] sm:$0xff] }
  0xc0   :  { %2772 = vmatprep.subr.bf16.mxu1 %v6812_v33  ;;  %v6873_v33 = vcombine.low %v291_v21, %v295_v22  ;;  %v6875_v44 = vcombine.low %v292_v31, %v296_v32  ;;  %v323_v50 = vld [vmem:[#allocation2 + $0x580] sm:$0xff]  ;;  %v6898_v53 = vcombine.high %v315_v42, %v319_v43 }
  0xc1   :  { %2603 = vmatpush1.bf16.msra.mxu0 %v6817_v38  ;;  %v300_v38 = vld [vmem:[#allocation2 + $0x4c8] sm:$0xff]  ;;  %v327_v51 = vld [vmem:[#allocation2 + $0x5a0] sm:$0xff] }
  0xc2   :  { %2604 = vmatprep.subr.bf16.mxu0 %v6826_v40  ;;  %v6876_v40 = vcombine.high %v292_v31, %v296_v32  ;;  %v331_v58 = vld [vmem:[#allocation2 + $0x5c0] sm:$0xff]  ;;  %v6906_v61 = vcombine.high %v323_v50, %v327_v51  ;;  %v356_v32 = vld [vmem:[#allocation2 + $0x688] sm:$0xff] }
  0xc3   :  { %2773 = vmatpush1.bf16.msra.mxu1 %v6811_v39  ;;  %v304_v39 = vld [vmem:[#allocation2 + $0x4e8] sm:$0xff]  ;;  %v335_v59 = vld [vmem:[#allocation2 + $0x5e0] sm:$0xff] }
  0xc4   :  { %2774 = vmatprep.subr.bf16.mxu1 %v6820_v41  ;;  %v6881_v41 = vcombine.low %v299_v28, %v303_v30  ;;  %v6883_v52 = vcombine.low %v300_v38, %v304_v39  ;;  %v339_v3 = vld [vmem:[#allocation2 + $0x600] sm:$0xff]  ;;  %v6914_v6 = vcombine.high %v331_v58, %v335_v59 }
  0xc5   :  { %2605 = vmatpush1.bf16.msra.mxu0 %v6825_v46  ;;  %v308_v46 = vld [vmem:[#allocation2 + $0x508] sm:$0xff]  ;;  %v343_v4 = vld [vmem:[#allocation2 + $0x620] sm:$0xff] }
  0xc6   :  { %2606 = vmatprep.subr.bf16.mxu0 %v6834_v48  ;;  %v6884_v48 = vcombine.high %v300_v38, %v304_v39  ;;  %v6922_v12 = vcombine.high %v339_v3, %v343_v4  ;;  %v351_v14 = vld [vmem:[#allocation2 + $0x660] sm:$0xff] }
  0xc7   :  { %2775 = vmatpush1.bf16.msra.mxu1 %v6819_v47  ;;  %v312_v47 = vld [vmem:[#allocation2 + $0x528] sm:$0xff]  ;;  %v355_v21 = vld [vmem:[#allocation2 + $0x680] sm:$0xff] }
  0xc8   :  { %2776 = vmatprep.subr.bf16.mxu1 %v6828_v49  ;;  %v6889_v49 = vcombine.low %v307_v34, %v311_v35  ;;  %v6891_v60 = vcombine.low %v308_v46, %v312_v47  ;;  %v359_v22 = vld [vmem:[#allocation2 + $0x6a0] sm:$0xff] }
  0xc9   :  { %2607 = vmatpush1.bf16.msra.mxu0 %v6833_v54  ;;  %v316_v54 = vld [vmem:[#allocation2 + $0x548] sm:$0xff]  ;;  %v6938_v28 = vcombine.high %v355_v21, %v359_v22  ;;  %v367_v30 = vld [vmem:[#allocation2 + $0x6e0] sm:$0xff]  ;;  %v6937_v34 = vcombine.low %v355_v21, %v359_v22 }
  0xca   :  { %2608 = vmatprep.subr.bf16.mxu0 %v6842_v56  ;;  %v6892_v56 = vcombine.high %v308_v46, %v312_v47  ;;  %v375_v38 = vld [vmem:[#allocation2 + $0x720] sm:$0xff] }
  0xcb   :  { %2777 = vmatpush1.bf16.msra.mxu1 %v6827_v55  ;;  %v320_v55 = vld [vmem:[#allocation2 + $0x568] sm:$0xff]  ;;  %v383_v46 = vld [vmem:[#allocation2 + $0x760] sm:$0xff] }
  0xcc   :  { %2778 = vmatprep.subr.bf16.mxu1 %v6836_v57  ;;  %v6897_v57 = vcombine.low %v315_v42, %v319_v43  ;;  %v6899_v5 = vcombine.low %v316_v54, %v320_v55 }
  0xcd   :  { %2609 = vmatpush1.bf16.msra.mxu0 %v6841_v62  ;;  %v324_v62 = vld [vmem:[#allocation2 + $0x588] sm:$0xff] }
  0xce   :  { %2610 = vmatprep.subr.bf16.mxu0 %v6850_v1  ;;  %v6900_v1 = vcombine.high %v316_v54, %v320_v55  ;;  %v391_v54 = vld [vmem:[#allocation2 + $0x7a0] sm:$0xff] }
  0xcf   :  { %2779 = vmatpush1.bf16.msra.mxu1 %v6835_v63  ;;  %v328_v63 = vld [vmem:[#allocation2 + $0x5a8] sm:$0xff] }
  0xd0   :  { %2780 = vmatprep.subr.bf16.mxu1 %v6844_v2  ;;  %v6905_v2 = vcombine.low %v323_v50, %v327_v51  ;;  %v6907_v11 = vcombine.low %v324_v62, %v328_v63 }
  0xd1   :  { %2611 = vmatpush1.bf16.msra.mxu0 %v6849_v7  ;;  %v332_v7 = vld [vmem:[#allocation2 + $0x5c8] sm:$0xff] }
  0xd2   :  { %2623 = vmatprep.subr.bf16.mxu0 %v6858_v9  ;;  %v6908_v9 = vcombine.high %v324_v62, %v328_v63  ;;  %v399_v62 = vld [vmem:[#allocation2 + $0x7e0] sm:$0xff] }
  0xd3   :  { %2781 = vmatpush1.bf16.msra.mxu1 %v6843_v8  ;;  %v336_v8 = vld [vmem:[#allocation2 + $0x5e8] sm:$0xff] }
  0xd4   :  { %2782 = vmatprep.subr.bf16.mxu1 %v6852_v10  ;;  %2613 = vmatmul.mubr.bf16.vlgmr.msra.gmra.mrb[0].mxu0 %v7601_v13  ;;  %v6913_v10 = vcombine.low %v331_v58, %v335_v59  ;;  %v6916_v15 = vcombine.high %v332_v7, %v336_v8 }
  0xd5   :  { %2624 = vmatpush1.bf16.msra.mxu0 %v6857_v16  ;;  %2655 = vmatprep.mubr.bf16.mxu0 %v7602_v17  ;;  %v340_v16 = vld [vmem:[#allocation2 + $0x608] sm:$0xff] }
  0xd6   :  { %2625 = vmatprep.subr.bf16.mxu0 %v6866_v19  ;;  %v6915_v19 = vcombine.low %v332_v7, %v336_v8  ;;  %v407_v7 = vld [vmem:[#allocation2 + $0x820] sm:$0xff] }
  0xd7   :  { %2783 = vmatpush1.bf16.msra.mxu1 %v6851_v18  ;;  %v6921_v18 = vcombine.low %v339_v3, %v343_v4 }
  0xd8   :  { %2795 = vmatprep.subr.bf16.mxu1 %v6860_v20 }
  0xd9   :  { %2626 = vmatpush1.bf16.msra.mxu0 %v6865_v25  ;;  %v352_v25 = vld [vmem:[#allocation2 + $0x668] sm:$0xff] }
  0xda   :  { %2785 = vmatmul.mubr.bf16.vlgmr.msra.gmra.mrb[4].mxu1 %v7601_v13  ;;  %2627 = vmatprep.subr.bf16.mxu0 %v6874_v27  ;;  %v347_v13 = vld [vmem:[#allocation2 + $0x640] sm:$0xff]  ;;  %v6932_v31 = vcombine.high %v348_v24, %v352_v25  ;;  %v6931_v35 = vcombine.low %v348_v24, %v352_v25 }
  0xdb   :  { %2796 = vmatpush1.bf16.msra.mxu1 %v6859_v26  ;;  %2827 = vmatprep.mubr.bf16.mxu1 %v7602_v17  ;;  %v344_v17 = vld [vmem:[#allocation2 + $0x628] sm:$0xff]  ;;  %v6930_v20 = vcombine.high %v347_v13, %v351_v14  ;;  %v6929_v26 = vcombine.low %v347_v13, %v351_v14  ;;  %v419_v24 = vld [vmem:[#allocation2 + $0x880] sm:$0xff] }
  0xdc   :  { %2797 = vmatprep.subr.bf16.mxu1 %v6868_v29  ;;  %v6924_v23 = vcombine.high %v340_v16, %v344_v17  ;;  %v6923_v27 = vcombine.low %v340_v16, %v344_v17  ;;  %v363_v29 = vld [vmem:[#allocation2 + $0x6c0] sm:$0xff]  ;;  %v404_v17 = vld [vmem:[#allocation2 + $0x808] sm:$0xff] }
  0xdd   :  { %2628 = vmatpush1.bf16.msra.mxu0 %v6873_v33  ;;  %v360_v33 = vld [vmem:[#allocation2 + $0x6a8] sm:$0xff]  ;;  %v6945_v42 = vcombine.low %v363_v29, %v367_v30  ;;  %v415_v16 = vld [vmem:[#allocation2 + $0x860] sm:$0xff] }
  0xde   :  { %2629 = vmatprep.subr.bf16.mxu0 %v6882_v37  ;;  %v371_v37 = vld [vmem:[#allocation2 + $0x700] sm:$0xff]  ;;  %v6940_v39 = vcombine.high %v356_v32, %v360_v33  ;;  %v6939_v43 = vcombine.low %v356_v32, %v360_v33 }
  0xdf   :  { %2798 = vmatpush1.bf16.msra.mxu1 %v6867_v36  ;;  %v6946_v36 = vcombine.high %v363_v29, %v367_v30  ;;  %v6953_v50 = vcombine.low %v371_v37, %v375_v38  ;;  %v423_v25 = vld [vmem:[#allocation2 + $0x8a0] sm:$0xff] }
  0xe0   :  { %2799 = vmatprep.subr.bf16.mxu1 %v6876_v40  ;;  %v364_v40 = vld [vmem:[#allocation2 + $0x6c8] sm:$0xff]  ;;  %v427_v32 = vld [vmem:[#allocation2 + $0x8c0] sm:$0xff] }
  0xe1   :  { %2630 = vmatpush1.bf16.msra.mxu0 %v6881_v41  ;;  %v368_v41 = vld [vmem:[#allocation2 + $0x6e8] sm:$0xff]  ;;  %v431_v33 = vld [vmem:[#allocation2 + $0x8e0] sm:$0xff] }
  0xe2   :  { %2631 = vmatprep.subr.bf16.mxu0 %v6890_v45  ;;  %v379_v45 = vld [vmem:[#allocation2 + $0x740] sm:$0xff]  ;;  %v6948_v47 = vcombine.high %v364_v40, %v368_v41  ;;  %v6947_v51 = vcombine.low %v364_v40, %v368_v41 }
  0xe3   :  { %2800 = vmatpush1.bf16.msra.mxu1 %v6875_v44  ;;  %v6954_v44 = vcombine.high %v371_v37, %v375_v38  ;;  %v6961_v58 = vcombine.low %v379_v45, %v383_v46  ;;  %v7001_v37 = vcombine.low %v419_v24, %v423_v25  ;;  %v435_v40 = vld [vmem:[#allocation2 + $0x900] sm:$0xff] }
  0xe4   :  { %2801 = vmatprep.subr.bf16.mxu1 %v6884_v48  ;;  %v372_v48 = vld [vmem:[#allocation2 + $0x708] sm:$0xff]  ;;  %v439_v41 = vld [vmem:[#allocation2 + $0x920] sm:$0xff] }
  0xe5   :  { %2632 = vmatpush1.bf16.msra.mxu0 %v6889_v49  ;;  %v376_v49 = vld [vmem:[#allocation2 + $0x728] sm:$0xff] }
  0xe6   :  { %2633 = vmatprep.subr.bf16.mxu0 %v6898_v53  ;;  %v387_v53 = vld [vmem:[#allocation2 + $0x780] sm:$0xff]  ;;  %v6956_v55 = vcombine.high %v372_v48, %v376_v49  ;;  %v6955_v59 = vcombine.low %v372_v48, %v376_v49 }
  0xe7   :  { %2802 = vmatpush1.bf16.msra.mxu1 %v6883_v52  ;;  %v6962_v52 = vcombine.high %v379_v45, %v383_v46  ;;  %v6969_v3 = vcombine.low %v387_v53, %v391_v54  ;;  %v7009_v45 = vcombine.low %v427_v32, %v431_v33  ;;  %v443_v48 = vld [vmem:[#allocation2 + $0x940] sm:$0xff] }
  0xe8   :  { %2803 = vmatprep.subr.bf16.mxu1 %v6892_v56  ;;  %v380_v56 = vld [vmem:[#allocation2 + $0x748] sm:$0xff]  ;;  %v447_v49 = vld [vmem:[#allocation2 + $0x960] sm:$0xff] }
  0xe9   :  { %2634 = vmatpush1.bf16.msra.mxu0 %v6897_v57  ;;  %v384_v57 = vld [vmem:[#allocation2 + $0x768] sm:$0xff] }
  0xea   :  { %2635 = vmatprep.subr.bf16.mxu0 %v6906_v61  ;;  %v395_v61 = vld [vmem:[#allocation2 + $0x7c0] sm:$0xff]  ;;  %v6964_v63 = vcombine.high %v380_v56, %v384_v57  ;;  %v6963_v4 = vcombine.low %v380_v56, %v384_v57 }
  0xeb   :  { %2804 = vmatpush1.bf16.msra.mxu1 %v6891_v60  ;;  %v6970_v60 = vcombine.high %v387_v53, %v391_v54  ;;  %v7017_v53 = vcombine.low %v435_v40, %v439_v41  ;;  %v451_v56 = vld [vmem:[#allocation2 + $0x980] sm:$0xff] }
  0xec   :  { %2805 = vmatprep.subr.bf16.mxu1 %v6900_v1  ;;  %v388_v1 = vld [vmem:[#allocation2 + $0x788] sm:$0xff]  ;;  %v455_v57 = vld [vmem:[#allocation2 + $0x9a0] sm:$0xff] }
  0xed   :  { %2636 = vmatpush1.bf16.msra.mxu0 %v6905_v2  ;;  %v392_v2 = vld [vmem:[#allocation2 + $0x7a8] sm:$0xff] }
  0xee   :  { %2637 = vmatprep.subr.bf16.mxu0 %v6914_v6  ;;  %v403_v6 = vld [vmem:[#allocation2 + $0x800] sm:$0xff]  ;;  %v6972_v8 = vcombine.high %v388_v1, %v392_v2  ;;  %v6971_v13 = vcombine.low %v388_v1, %v392_v2 }
  0xef   :  { %2806 = vmatpush1.bf16.msra.mxu1 %v6899_v5  ;;  %v6978_v5 = vcombine.high %v395_v61, %v399_v62  ;;  %v6986_v14 = vcombine.high %v403_v6, %v407_v7  ;;  %v6985_v21 = vcombine.low %v403_v6, %v407_v7  ;;  %v459_v1 = vld [vmem:[#allocation2 + $0x9c0] sm:$0xff]  ;;  %v7033_v6 = vcombine.low %v451_v56, %v455_v57 }
  0xf0   :  { %2807 = vmatprep.subr.bf16.mxu1 %v6908_v9  ;;  %v396_v9 = vld [vmem:[#allocation2 + $0x7c8] sm:$0xff]  ;;  %v463_v2 = vld [vmem:[#allocation2 + $0x9e0] sm:$0xff] }
  0xf1   :  { %2638 = vmatpush1.bf16.msra.mxu0 %v6913_v10  ;;  %v400_v10 = vld [vmem:[#allocation2 + $0x7e8] sm:$0xff] }
  0xf2   :  { %2639 = vmatprep.subr.bf16.mxu0 %v6922_v12  ;;  %v411_v12 = vld [vmem:[#allocation2 + $0x840] sm:$0xff]  ;;  %v6979_v22 = vcombine.low %v396_v9, %v400_v10 }
  0xf3   :  { %2808 = vmatpush1.bf16.msra.mxu1 %v6907_v11  ;;  %v6977_v11 = vcombine.low %v395_v61, %v399_v62  ;;  %v6993_v29 = vcombine.low %v411_v12, %v415_v16  ;;  %v7025_v61 = vcombine.low %v443_v48, %v447_v49 }
  0xf4   :  { %2809 = vmatprep.subr.bf16.mxu1 %v6916_v15  ;;  %v7604_v15 = vld [vmem:[%s9211_s0 + $0x8] ss:$28 sps:$4 sm:$0xff]  }
  0xf5   :  { %2640 = vmatpush1.bf16.msra.mxu0 %v6921_v18  ;;  %v6980_v18 = vcombine.high %v396_v9, %v400_v10  ;;  %v467_v9 = vld [vmem:[#allocation2 + $0xa00] sm:$0xff] }
  0xf6   :  { %2641 = vmatprep.subr.bf16.mxu0 %v6930_v20  ;;  %v7605_v20 = vld [vmem:[%s9211_s0 + $0x14] ss:$28 sps:$4 sm:$0xff]   ;;  %v471_v10 = vld [vmem:[#allocation2 + $0xa20] sm:$0xff] }
  0xf7   :  { %2810 = vmatpush1.bf16.msra.mxu1 %v6915_v19  ;;  %v408_v19 = vld [vmem:[#allocation2 + $0x828] sm:$0xff] }
  0xf8   :  { %2811 = vmatprep.subr.bf16.mxu1 %v6924_v23  ;;  %v6994_v23 = vcombine.high %v411_v12, %v415_v16  ;;  %v6987_v30 = vcombine.low %v404_v17, %v408_v19  ;;  %v460_v12 = vld [vmem:[#allocation2 + $0x9c8] sm:$0xff]  ;;  %v7050_v16 = vcombine.high %v467_v9, %v471_v10 }
  0xf9   :  { %2642 = vmatpush1.bf16.msra.mxu0 %v6929_v26  ;;  %v6988_v26 = vcombine.high %v404_v17, %v408_v19  ;;  %v475_v17 = vld [vmem:[#allocation2 + $0xa40] sm:$0xff] }
  0xfa   :  { %2643 = vmatprep.subr.bf16.mxu0 %v6938_v28  ;;  %v416_v28 = vld [vmem:[#allocation2 + $0x868] sm:$0xff] }
  0xfb   :  { %2812 = vmatpush1.bf16.msra.mxu1 %v6923_v27  ;;  %v412_v27 = vld [vmem:[#allocation2 + $0x848] sm:$0xff] }
  0xfc   :  { %2813 = vmatprep.subr.bf16.mxu1 %v6932_v31  ;;  %v7002_v31 = vcombine.high %v419_v24, %v423_v25  ;;  %v6995_v38 = vcombine.low %v412_v27, %v416_v28  ;;  %v483_v25 = vld [vmem:[#allocation2 + $0xa80] sm:$0xff] }
  0xfd   :  { %2644 = vmatpush1.bf16.msra.mxu0 %v6937_v34  ;;  %v6996_v34 = vcombine.high %v412_v27, %v416_v28  ;;  %v476_v28 = vld [vmem:[#allocation2 + $0xa48] sm:$0xff] }
  0xfe   :  { %2645 = vmatprep.subr.bf16.mxu0 %v6946_v36  ;;  %v424_v36 = vld [vmem:[#allocation2 + $0x8a8] sm:$0xff] }
  0xff   :  { %2814 = vmatpush1.bf16.msra.mxu1 %v6931_v35  ;;  %v420_v35 = vld [vmem:[#allocation2 + $0x888] sm:$0xff] }
 0x100   :  { %2815 = vmatprep.subr.bf16.mxu1 %v6940_v39  ;;  %v7010_v39 = vcombine.high %v427_v32, %v431_v33  ;;  %v7003_v46 = vcombine.low %v420_v35, %v424_v36  ;;  %v491_v33 = vld [vmem:[#allocation2 + $0xac0] sm:$0xff] }
 0x101   :  { %2646 = vmatpush1.bf16.msra.mxu0 %v6945_v42  ;;  %v7004_v42 = vcombine.high %v420_v35, %v424_v36  ;;  %v484_v36 = vld [vmem:[#allocation2 + $0xa88] sm:$0xff] }
 0x102   :  { %2647 = vmatprep.subr.bf16.mxu0 %v6954_v44  ;;  %v432_v44 = vld [vmem:[#allocation2 + $0x8e8] sm:$0xff] }
 0x103   :  { %2816 = vmatpush1.bf16.msra.mxu1 %v6939_v43  ;;  %v428_v43 = vld [vmem:[#allocation2 + $0x8c8] sm:$0xff] }
 0x104   :  { %2817 = vmatprep.subr.bf16.mxu1 %v6948_v47  ;;  %v7018_v47 = vcombine.high %v435_v40, %v439_v41  ;;  %v7011_v54 = vcombine.low %v428_v43, %v432_v44  ;;  %v499_v41 = vld [vmem:[#allocation2 + $0xb00] sm:$0xff] }
 0x105   :  { %2648 = vmatpush1.bf16.msra.mxu0 %v6953_v50  ;;  %v7012_v50 = vcombine.high %v428_v43, %v432_v44  ;;  %v492_v44 = vld [vmem:[#allocation2 + $0xac8] sm:$0xff] }
 0x106   :  { %2649 = vmatprep.subr.bf16.mxu0 %v6962_v52  ;;  %v440_v52 = vld [vmem:[#allocation2 + $0x928] sm:$0xff] }
 0x107   :  { %2818 = vmatpush1.bf16.msra.mxu1 %v6947_v51  ;;  %v436_v51 = vld [vmem:[#allocation2 + $0x908] sm:$0xff] }
 0x108   :  { %2819 = vmatprep.subr.bf16.mxu1 %v6956_v55  ;;  %v7026_v55 = vcombine.high %v443_v48, %v447_v49  ;;  %v7019_v62 = vcombine.low %v436_v51, %v440_v52  ;;  %v507_v49 = vld [vmem:[#allocation2 + $0xb40] sm:$0xff] }
 0x109   :  { %2650 = vmatpush1.bf16.msra.mxu0 %v6961_v58  ;;  %v7020_v58 = vcombine.high %v436_v51, %v440_v52  ;;  %v500_v52 = vld [vmem:[#allocation2 + $0xb08] sm:$0xff] }
 0x10a   :  { %2651 = vmatprep.subr.bf16.mxu0 %v6970_v60  ;;  %v448_v60 = vld [vmem:[#allocation2 + $0x968] sm:$0xff] }
 0x10b   :  { %2820 = vmatpush1.bf16.msra.mxu1 %v6955_v59  ;;  %v444_v59 = vld [vmem:[#allocation2 + $0x948] sm:$0xff] }
 0x10c   :  { %2821 = vmatprep.subr.bf16.mxu1 %v6964_v63  ;;  %v7034_v63 = vcombine.high %v451_v56, %v455_v57  ;;  %v7027_v7 = vcombine.low %v444_v59, %v448_v60  ;;  %v515_v57 = vld [vmem:[#allocation2 + $0xb80] sm:$0xff] }
 0x10d   :  { %2652 = vmatpush1.bf16.msra.mxu0 %v6969_v3  ;;  %v7028_v3 = vcombine.high %v444_v59, %v448_v60  ;;  %v508_v60 = vld [vmem:[#allocation2 + $0xb48] sm:$0xff] }
 0x10e   :  { %2653 = vmatprep.subr.bf16.mxu0 %v6978_v5  ;;  %v456_v5 = vld [vmem:[#allocation2 + $0x9a8] sm:$0xff] }
 0x10f   :  { %2822 = vmatpush1.bf16.msra.mxu1 %v6963_v4  ;;  %v452_v4 = vld [vmem:[#allocation2 + $0x988] sm:$0xff] }
 0x110   :  { %2823 = vmatprep.subr.bf16.mxu1 %v6972_v8  ;;  %v7042_v8 = vcombine.high %v459_v1, %v463_v2 }
 0x111   :  { %2654 = vmatpush1.bf16.msra.mxu0 %v6977_v11  ;;  %v7036_v11 = vcombine.high %v452_v4, %v456_v5 }
 0x112   :  { %2666 = vmatprep.subr.bf16.mxu0 %v6986_v14  ;;  %v7041_v14 = vcombine.low %v459_v1, %v463_v2  ;;  %v523_v2 = vld [vmem:[#allocation2 + $0xbc0] sm:$0xff] }
 0x113   :  { %2824 = vmatpush1.bf16.msra.mxu1 %v6971_v13  ;;  %v464_v13 = vld [vmem:[#allocation2 + $0x9e8] sm:$0xff] }
 0x114   :  { %2825 = vmatprep.subr.bf16.mxu1 %v6980_v18  ;;  %2656 = vmatmul.mubr.bf16.vlgmr.msra.gmra.mrb[0].mxu0 %v7604_v15  ;;  %v479_v18 = vld [vmem:[#allocation2 + $0xa60] sm:$0xff]  ;;  %v7044_v19 = vcombine.high %v460_v12, %v464_v13 }
 0x115   :  { %2667 = vmatpush1.bf16.msra.mxu0 %v6985_v21  ;;  %2698 = vmatprep.mubr.bf16.mxu0 %v7605_v20  ;;  %v472_v21 = vld [vmem:[#allocation2 + $0xa28] sm:$0xff]  ;;  %v7058_v24 = vcombine.high %v475_v17, %v479_v18 }
 0x116   :  { %2668 = vmatprep.subr.bf16.mxu0 %v6994_v23  ;;  %v7043_v23 = vcombine.low %v460_v12, %v464_v13  ;;  %v149_v13 = vld [vmem:[#allocation2 + $0x10] sm:$0xff] }
 0x117   :  { %2826 = vmatpush1.bf16.msra.mxu1 %v6979_v22  ;;  %v7049_v22 = vcombine.low %v467_v9, %v471_v10  ;;  %v524_v10 = vld [vmem:[#allocation2 + $0xbc8] sm:$0xff] }
 0x118   :  { %2838 = vmatprep.subr.bf16.mxu1 %v6988_v26  ;;  %v487_v26 = vld [vmem:[#allocation2 + $0xaa0] sm:$0xff] }
 0x119   :  { %2669 = vmatpush1.bf16.msra.mxu0 %v6993_v29  ;;  %v480_v29 = vld [vmem:[#allocation2 + $0xa68] sm:$0xff]  ;;  %v7066_v32 = vcombine.high %v483_v25, %v487_v26 }
 0x11a   :  { %2828 = vmatmul.mubr.bf16.vlgmr.msra.gmra.mrb[4].mxu1 %v7604_v15  ;;  %2670 = vmatprep.subr.bf16.mxu0 %v7002_v31  ;;  %v7035_v15 = vcombine.low %v452_v4, %v456_v5  ;;  %v7060_v35 = vcombine.high %v476_v28, %v480_v29  ;;  %v516_v5 = vld [vmem:[#allocation2 + $0xb88] sm:$0xff] }
 0x11b   :  { %2839 = vmatpush1.bf16.msra.mxu1 %v6987_v30  ;;  %2870 = vmatprep.mubr.bf16.mxu1 %v7605_v20  ;;  %v468_v20 = vld [vmem:[#allocation2 + $0xa08] sm:$0xff]  ;;  %v7057_v30 = vcombine.low %v475_v17, %v479_v18 }
 0x11c   :  { %2840 = vmatprep.subr.bf16.mxu1 %v6996_v34  ;;  %v7052_v27 = vcombine.high %v468_v20, %v472_v21  ;;  %v7051_v31 = vcombine.low %v468_v20, %v472_v21  ;;  %v495_v34 = vld [vmem:[#allocation2 + $0xae0] sm:$0xff]  ;;  %v7607_v17 = vld [vmem:[%s9211_s0 + $0x10] ss:$28 sps:$4 sm:$0xff]  }
 0x11d   :  { %2671 = vmatpush1.bf16.msra.mxu0 %v7001_v37  ;;  %v488_v37 = vld [vmem:[#allocation2 + $0xaa8] sm:$0xff]  ;;  %v7074_v40 = vcombine.high %v491_v33, %v495_v34  ;;  %v161_v20 = vld [vmem:[#allocation2 + $0x70] sm:$0xff] }
 0x11e   :  { %2672 = vmatprep.subr.bf16.mxu0 %v7010_v39  ;;  %v7059_v39 = vcombine.low %v476_v28, %v480_v29  ;;  %v7068_v43 = vcombine.high %v484_v36, %v488_v37  ;;  %v169_v28 = vld [vmem:[#allocation2 + $0xb0] sm:$0xff] }
 0x11f   :  { %2841 = vmatpush1.bf16.msra.mxu1 %v6995_v38  ;;  %v7065_v38 = vcombine.low %v483_v25, %v487_v26 }
 0x120   :  { %2842 = vmatprep.subr.bf16.mxu1 %v7004_v42  ;;  %v503_v42 = vld [vmem:[#allocation2 + $0xb20] sm:$0xff] }
 0x121   :  { %2673 = vmatpush1.bf16.msra.mxu0 %v7009_v45  ;;  %v496_v45 = vld [vmem:[#allocation2 + $0xae8] sm:$0xff]  ;;  %v7082_v48 = vcombine.high %v499_v41, %v503_v42 }
 0x122   :  { %2674 = vmatprep.subr.bf16.mxu0 %v7018_v47  ;;  %v7067_v47 = vcombine.low %v484_v36, %v488_v37  ;;  %v7076_v51 = vcombine.high %v492_v44, %v496_v45  ;;  %v173_v36 = vld [vmem:[#allocation2 + $0xd0] sm:$0xff] }
 0x123   :  { %2843 = vmatpush1.bf16.msra.mxu1 %v7003_v46  ;;  %v7073_v46 = vcombine.low %v491_v33, %v495_v34  ;;  %v8651_v33 = vld [vmem:[%s9211_s0 + $0x4] ss:$28 sps:$4 sm:$0xff]   ;;  %v177_v37 = vld [vmem:[#allocation2 + $0xf0] sm:$0xff] }
 0x124   :  { %2844 = vmatprep.subr.bf16.mxu1 %v7012_v50  ;;  %v511_v50 = vld [vmem:[#allocation2 + $0xb60] sm:$0xff] }
 0x125   :  { %2675 = vmatpush1.bf16.msra.mxu0 %v7017_v53  ;;  %v504_v53 = vld [vmem:[#allocation2 + $0xb28] sm:$0xff]  ;;  %v7090_v56 = vcombine.high %v507_v49, %v511_v50 }
 0x126   :  { %2676 = vmatprep.subr.bf16.mxu0 %v7026_v55  ;;  %v7075_v55 = vcombine.low %v492_v44, %v496_v45  ;;  %v7084_v59 = vcombine.high %v500_v52, %v504_v53  ;;  %v189_v45 = vld [vmem:[#allocation2 + $0x150] sm:$0xff] }
 0x127   :  { %2845 = vmatpush1.bf16.msra.mxu1 %v7011_v54  ;;  %v7081_v54 = vcombine.low %v499_v41, %v503_v42  ;;  %v181_v41 = vld [vmem:[#allocation2 + $0x110] sm:$0xff] }
 0x128   :  { %2846 = vmatprep.subr.bf16.mxu1 %v7020_v58  ;;  %v519_v58 = vld [vmem:[#allocation2 + $0xba0] sm:$0xff]  ;;  %v185_v42 = vld [vmem:[#allocation2 + $0x130] sm:$0xff] }
 0x129   :  { %2677 = vmatpush1.bf16.msra.mxu0 %v7025_v61  ;;  %v512_v61 = vld [vmem:[#allocation2 + $0xb68] sm:$0xff]  ;;  %v7098_v1 = vcombine.high %v515_v57, %v519_v58  ;;  %v6766_v44 = vcombine.high %v181_v41, %v185_v42 }
 0x12a   :  { %2678 = vmatprep.subr.bf16.mxu0 %v7034_v63  ;;  %v7083_v63 = vcombine.low %v500_v52, %v504_v53  ;;  %v7092_v4 = vcombine.high %v508_v60, %v512_v61  ;;  %v197_v53 = vld [vmem:[#allocation2 + $0x190] sm:$0xff] }
 0x12b   :  { %2847 = vmatpush1.bf16.msra.mxu1 %v7019_v62  ;;  %v7089_v62 = vcombine.low %v507_v49, %v511_v50  ;;  %v6765_v49 = vcombine.low %v181_v41, %v185_v42  ;;  %v245_v41 = vld [vmem:[#allocation2 + $0x310] sm:$0xff] }
 0x12c   :  { %2848 = vmatprep.subr.bf16.mxu1 %v7028_v3  ;;  %v527_v3 = vld [vmem:[#allocation2 + $0xbe0] sm:$0xff]  ;;  %v249_v42 = vld [vmem:[#allocation2 + $0x330] sm:$0xff] }
 0x12d   :  { %2679 = vmatpush1.bf16.msra.mxu0 %v7033_v6  ;;  %v520_v6 = vld [vmem:[#allocation2 + $0xba8] sm:$0xff]  ;;  %v7106_v9 = vcombine.high %v523_v2, %v527_v3 }
 0x12e   :  { %2680 = vmatprep.subr.bf16.mxu0 %v7042_v8  ;;  %v7091_v8 = vcombine.low %v508_v60, %v512_v61  ;;  %v7100_v12 = vcombine.high %v516_v5, %v520_v6  ;;  %v205_v60 = vld [vmem:[#allocation2 + $0x1d0] sm:$0xff] }
 0x12f   :  { %2849 = vmatpush1.bf16.msra.mxu1 %v7027_v7  ;;  %v7097_v7 = vcombine.low %v515_v57, %v519_v58  ;;  %v158_v58 = vld [vmem:[#allocation2 + $0x58] sm:$0xff]  ;;  %v209_v61 = vld [vmem:[#allocation2 + $0x1f0] sm:$0xff] }
 0x130   :  { %2850 = vmatprep.subr.bf16.mxu1 %v7036_v11  ;;  %v528_v11 = vld [vmem:[#allocation2 + $0xbe8] sm:$0xff] }
 0x131   :  { %2681 = vmatpush1.bf16.msra.mxu0 %v7041_v14  ;;  %v153_v14 = vld [vmem:[#allocation2 + $0x30] sm:$0xff]  ;;  %v7108_v21 = vcombine.high %v524_v10, %v528_v11  ;;  %v7107_v25 = vcombine.low %v524_v10, %v528_v11 }
 0x132   :  { %2682 = vmatprep.subr.bf16.mxu0 %v7050_v16  ;;  %v7099_v16 = vcombine.low %v516_v5, %v520_v6  ;;  %v6734_v18 = vcombine.high %v149_v13, %v153_v14  ;;  %v213_v5 = vld [vmem:[#allocation2 + $0x210] sm:$0xff] }
 0x133   :  { %2851 = vmatpush1.bf16.msra.mxu1 %v7035_v15  ;;  %v7105_v15 = vcombine.low %v523_v2, %v527_v3  ;;  %v166_v2 = vld [vmem:[#allocation2 + $0x98] sm:$0xff]  ;;  %v217_v6 = vld [vmem:[#allocation2 + $0x230] sm:$0xff] }
 0x134   :  { %2852 = vmatprep.subr.bf16.mxu1 %v7044_v19  ;;  %v157_v19 = vld [vmem:[#allocation2 + $0x50] sm:$0xff]  ;;  %v170_v3 = vld [vmem:[#allocation2 + $0xb8] sm:$0xff]  ;;  %v6798_v11 = vcombine.high %v213_v5, %v217_v6 }
 0x135   :  { %2683 = vmatpush1.bf16.msra.mxu0 %v7049_v22  ;;  %v532_v22 = vld [vmem:[#allocation2 + $0xc08] sm:$0xff]  ;;  %v6742_v26 = vcombine.high %v157_v19, %v161_v20 }
 0x136   :  { %2684 = vmatprep.subr.bf16.mxu0 %v7058_v24  ;;  %v6733_v24 = vcombine.low %v149_v13, %v153_v14  ;;  %v178_v13 = vld [vmem:[#allocation2 + $0xf8] sm:$0xff] }
 0x137   :  { %2853 = vmatpush1.bf16.msra.mxu1 %v7043_v23  ;;  %v536_v23 = vld [vmem:[#allocation2 + $0xc28] sm:$0xff] }
 0x138   :  { %2854 = vmatprep.subr.bf16.mxu1 %v7052_v27  ;;  %v165_v27 = vld [vmem:[#allocation2 + $0x90] sm:$0xff]  ;;  %v7116_v29 = vcombine.high %v532_v22, %v536_v23 }
 0x139   :  { %2685 = vmatpush1.bf16.msra.mxu0 %v7057_v30  ;;  %v533_v30 = vld [vmem:[#allocation2 + $0xc10] sm:$0xff]  ;;  %v6750_v34 = vcombine.high %v165_v27, %v169_v28 }
 0x13a   :  { %2686 = vmatprep.subr.bf16.mxu0 %v7066_v32  ;;  %v6741_v32 = vcombine.low %v157_v19, %v161_v20  ;;  %v6797_v19 = vcombine.low %v213_v5, %v217_v6  ;;  %v6751_v20 = vcombine.low %v166_v2, %v170_v3 }
 0x13b   :  { %2855 = vmatpush1.bf16.msra.mxu1 %v7051_v31  ;;  %v537_v31 = vld [vmem:[#allocation2 + $0xc30] sm:$0xff] }
 0x13c   :  { %2856 = vmatprep.subr.bf16.mxu1 %v7060_v35  ;;  %v7115_v35 = vcombine.low %v532_v22, %v536_v23  ;;  %v7117_v50 = vcombine.low %v533_v30, %v537_v31  ;;  %v182_v22 = vld [vmem:[#allocation2 + $0x118] sm:$0xff] }
 0x13d   :  { %2687 = vmatpush1.bf16.msra.mxu0 %v7065_v38  ;;  %v7118_v38 = vcombine.high %v533_v30, %v537_v31  ;;  %v186_v23 = vld [vmem:[#allocation2 + $0x138] sm:$0xff] }
 0x13e   :  { %2688 = vmatprep.subr.bf16.mxu0 %v7074_v40  ;;  %v6758_v40 = vcombine.high %v173_v36, %v177_v37  ;;  %v190_v30 = vld [vmem:[#allocation2 + $0x158] sm:$0xff] }
 0x13f   :  { %2857 = vmatpush1.bf16.msra.mxu1 %v7059_v39  ;;  %v6749_v39 = vcombine.low %v165_v27, %v169_v28  ;;  %v194_v31 = vld [vmem:[#allocation2 + $0x178] sm:$0xff] }
 0x140   :  { %2858 = vmatprep.subr.bf16.mxu1 %v7068_v43  ;;  %v6757_v43 = vcombine.low %v173_v36, %v177_v37  ;;  %v6767_v36 = vcombine.low %v182_v22, %v186_v23 }
 0x141   :  { %2689 = vmatpush1.bf16.msra.mxu0 %v7073_v46  ;;  %v193_v46 = vld [vmem:[#allocation2 + $0x170] sm:$0xff] }
 0x142   :  { %2690 = vmatprep.subr.bf16.mxu0 %v7082_v48  ;;  %v154_v48 = vld [vmem:[#allocation2 + $0x38] sm:$0xff] }
 0x143   :  { %2859 = vmatpush1.bf16.msra.mxu1 %v7067_v47  ;;  %v150_v47 = vld [vmem:[#allocation2 + $0x18] sm:$0xff] }
 0x144   :  { %2860 = vmatprep.subr.bf16.mxu1 %v7076_v51  ;;  %v6774_v51 = vcombine.high %v189_v45, %v193_v46  ;;  %v6736_v52 = vcombine.high %v150_v47, %v154_v48 }
 0x145   :  { %2691 = vmatpush1.bf16.msra.mxu0 %v7081_v54  ;;  %v201_v54 = vld [vmem:[#allocation2 + $0x1b0] sm:$0xff] }
 0x146   :  { %2692 = vmatprep.subr.bf16.mxu0 %v7090_v56  ;;  %v6773_v56 = vcombine.low %v189_v45, %v193_v46  ;;  %v6782_v57 = vcombine.high %v197_v53, %v201_v54  ;;  %v6830_v45 = vcombine.high %v245_v41, %v249_v42  ;;  %v206_v46 = vld [vmem:[#allocation2 + $0x1d8] sm:$0xff] }
 0x147   :  { %2861 = vmatpush1.bf16.msra.mxu1 %v7075_v55  ;;  %v8253_v55 = vld [vmem:[%s9211_s0 + $0x18] ss:$28 sps:$4 sm:$0xff]  }
 0x148   :  { %2862 = vmatprep.subr.bf16.mxu1 %v7084_v59  ;;  %v162_v59 = vld [vmem:[#allocation2 + $0x78] sm:$0xff] }
 0x149   :  { %2693 = vmatpush1.bf16.msra.mxu0 %v7089_v62  ;;  %v6781_v62 = vcombine.low %v197_v53, %v201_v54  ;;  %v6743_v10 = vcombine.low %v158_v58, %v162_v59  ;;  %v214_v54 = vld [vmem:[#allocation2 + $0x218] sm:$0xff] }
 0x14a   :  { %2694 = vmatprep.subr.bf16.mxu0 %v7098_v1  ;;  %v6790_v1 = vcombine.high %v205_v60, %v209_v61 }
 0x14b   :  { %2863 = vmatpush1.bf16.msra.mxu1 %v7083_v63  ;;  %v6735_v63 = vcombine.low %v150_v47, %v154_v48  ;;  %v210_v47 = vld [vmem:[#allocation2 + $0x1f8] sm:$0xff] }
 0x14c   :  { %2864 = vmatprep.subr.bf16.mxu1 %v7092_v4  ;;  %v6744_v4 = vcombine.high %v158_v58, %v162_v59  ;;  %v265_v58 = vld [vmem:[#allocation2 + $0x3b0] sm:$0xff] }
 0x14d   :  { %2695 = vmatpush1.bf16.msra.mxu0 %v7097_v7 }
 0x14e   :  { %2696 = vmatprep.subr.bf16.mxu0 %v7106_v9 }
 0x14f   :  { %2865 = vmatpush1.bf16.msra.mxu1 %v7091_v8  ;;  %v6789_v8 = vcombine.low %v205_v60, %v209_v61  ;;  %v6791_v60 = vcombine.low %v206_v46, %v210_v47 }
 0x150   :  { %2866 = vmatprep.subr.bf16.mxu1 %v7100_v12  ;;  %v174_v12 = vld [vmem:[#allocation2 + $0xd8] sm:$0xff] }
 0x151   :  { %2697 = vmatpush1.bf16.msra.mxu0 %v7105_v15  ;;  %v6752_v15 = vcombine.high %v166_v2, %v170_v3  ;;  %v6759_v28 = vcombine.low %v174_v12, %v178_v13  ;;  %v222_v2 = vld [vmem:[#allocation2 + $0x258] sm:$0xff] }
 0x152   :  { %2924 = vmatprep.subr.bf16.mxu0 %v6734_v18  ;;  %v226_v3 = vld [vmem:[#allocation2 + $0x278] sm:$0xff] }
 0x153   :  { %2867 = vmatpush1.bf16.msra.mxu1 %v7099_v16  ;;  %v221_v16 = vld [vmem:[#allocation2 + $0x250] sm:$0xff] }
 0x154   :  { %2868 = vmatprep.subr.bf16.mxu1 %v7108_v21  ;;  %2699 = vmatmul.mubr.bf16.vlgmr.msra.gmra.mrb[0].mxu0 %v7607_v17 }
 0x155   :  { %2925 = vmatpush1.bf16.msra.mxu0 %v6733_v24  ;;  %2956 = vmatprep.mubr.bf16.mxu0 %v8651_v33  ;;  %v6760_v24 = vcombine.high %v174_v12, %v178_v13  ;;  %v230_v12 = vld [vmem:[#allocation2 + $0x298] sm:$0xff] }
 0x156   :  { %2926 = vmatprep.subr.bf16.mxu0 %v6742_v26  ;;  %v233_v26 = vld [vmem:[#allocation2 + $0x2b0] sm:$0xff]  ;;  %v234_v13 = vld [vmem:[#allocation2 + $0x2b8] sm:$0xff] }
 0x157   :  { %2869 = vmatpush1.bf16.msra.mxu1 %v7107_v25  ;;  %v229_v25 = vld [vmem:[#allocation2 + $0x290] sm:$0xff] }
 0x158   :  { %2881 = vmatprep.subr.bf16.mxu1 %v7116_v29  ;;  %v6814_v29 = vcombine.high %v229_v25, %v233_v26 }
 0x159   :  { %2927 = vmatpush1.bf16.msra.mxu0 %v6741_v32  ;;  %v6768_v32 = vcombine.high %v182_v22, %v186_v23  ;;  %v238_v22 = vld [vmem:[#allocation2 + $0x2d8] sm:$0xff] }
 0x15a   :  { %2871 = vmatmul.mubr.bf16.vlgmr.msra.gmra.mrb[4].mxu1 %v7607_v17  ;;  %2928 = vmatprep.subr.bf16.mxu0 %v6750_v34  ;;  %v225_v17 = vld [vmem:[#allocation2 + $0x270] sm:$0xff]  ;;  %v242_v23 = vld [vmem:[#allocation2 + $0x2f8] sm:$0xff] }
 0x15b   :  { %2882 = vmatpush1.bf16.msra.mxu1 %v7115_v35  ;;  %2913 = vmatprep.mubr.bf16.mxu1 %v8461_v0  ;;  %v6806_v21 = vcombine.high %v221_v16, %v225_v17  ;;  %v6805_v27 = vcombine.low %v221_v16, %v225_v17  ;;  %v241_v34 = vld [vmem:[#allocation2 + $0x2f0] sm:$0xff]  ;;  %v6813_v35 = vcombine.low %v229_v25, %v233_v26 }
 0x15c   :  { %3053 = vmatprep.subr.bf16.mxu1 %v7118_v38  ;;  %v198_v38 = vld [vmem:[#allocation2 + $0x198] sm:$0xff]  ;;  %v6807_v16 = vcombine.low %v222_v2, %v226_v3  ;;  %v6815_v25 = vcombine.low %v230_v12, %v234_v13 }
 0x15d   :  { %2929 = vmatpush1.bf16.msra.mxu0 %v6749_v39  ;;  %v202_v39 = vld [vmem:[#allocation2 + $0x1b8] sm:$0xff] }
 0x15e   :  { %2930 = vmatprep.subr.bf16.mxu0 %v6758_v40  ;;  %v6776_v40 = vcombine.high %v190_v30, %v194_v31  ;;  %v6784_v48 = vcombine.high %v198_v38, %v202_v39 }
 0x161   :  { %2931 = vmatpush1.bf16.msra.mxu0 %v6757_v43 }
 0x162   :  { %2932 = vmatprep.subr.bf16.mxu0 %v6766_v44  ;;  %v6775_v44 = vcombine.low %v190_v30, %v194_v31  ;;  %v8673_v30 = vld [vmem:[%s9211_s0] ss:$28 sps:$4 sm:$0xff]  }
 0x163   :  { %v246_v31 = vld [vmem:[#allocation2 + $0x318] sm:$0xff] }
 0x165   :  { %2933 = vmatpush1.bf16.msra.mxu0 %v6765_v49  ;;  %v253_v49 = vld [vmem:[#allocation2 + $0x350] sm:$0xff] }
 0x166   :  { %7122 = vmatmul.mubr.msk.bf16.vlgmr.msra.gmra.mrb[4].mxu1 %vm2576_vm0, %v8253_v55  ;;  %2934 = vmatprep.subr.bf16.mxu0 %v6774_v51  ;;  %v6829_v51 = vcombine.low %v245_v41, %v249_v42  ;;  %v258_v41 = vld [vmem:[#allocation2 + $0x378] sm:$0xff] }
 0x167   :  { %3054 = vmatpush1.bf16.msra.mxu1 %v7117_v50  ;;  %3085 = vmatprep.mubr.bf16.mxu1 %v8461_v0  ;;  %v257_v50 = vld [vmem:[#allocation2 + $0x370] sm:$0xff] }
 0x168   :  { %3096 = vmatprep.subr.bf16.mxu1 %v6736_v52  ;;  %v6783_v52 = vcombine.low %v198_v38, %v202_v39  ;;  %v6838_v53 = vcombine.high %v253_v49, %v257_v50  ;;  %v6837_v59 = vcombine.low %v253_v49, %v257_v50  ;;  %v301_v38 = vld [vmem:[#allocation2 + $0x4d0] sm:$0xff]  ;;  %v266_v49 = vld [vmem:[#allocation2 + $0x3b8] sm:$0xff] }
 0x169   :  { %2935 = vmatpush1.bf16.msra.mxu0 %v6773_v56  ;;  %v6792_v56 = vcombine.high %v206_v46, %v210_v47  ;;  %v305_v39 = vld [vmem:[#allocation2 + $0x4f0] sm:$0xff] }
 0x16a   :  { %2936 = vmatprep.subr.bf16.mxu0 %v6782_v57  ;;  %v261_v57 = vld [vmem:[#allocation2 + $0x390] sm:$0xff]  ;;  %v6885_v50 = vcombine.low %v301_v38, %v305_v39 }
 0x16b   :  { %v6846_v61 = vcombine.high %v261_v57, %v265_v58  ;;  %v309_v46 = vld [vmem:[#allocation2 + $0x510] sm:$0xff] }
 0x16c   :  { %v313_v47 = vld [vmem:[#allocation2 + $0x530] sm:$0xff] }
 0x16d   :  { %v8660_v7 = vpop.f32.mrb[0].mxu1  ;;  %2937 = vmatpush1.bf16.msra.mxu0 %v6781_v62 }
 0x16e   :  { %7123 = vmatmul.mubr.msk.bf16.vlgmr.msra.gmra.mrb[8].mxu1 %vm2576_vm0, %v8253_v55  ;;  %v8663_v9 = vpop.f32.mrb[1].mxu1  ;;  %2938 = vmatprep.subr.bf16.mxu0 %v6790_v1  ;;  %v218_v55 = vld [vmem:[#allocation2 + $0x238] sm:$0xff]  ;;  %v273_v1 = vld [vmem:[#allocation2 + $0x3f0] sm:$0xff] }
 0x16f   :  { %3097 = vmatpush1.bf16.msra.mxu1 %v6735_v63  ;;  %v8665_v14 = vpop.f32.mrb[2].mxu1  ;;  %3128 = vmatprep.mubr.bf16.mxu1 %v8651_v33  ;;  %v237_v33 = vld [vmem:[#allocation2 + $0x2d0] sm:$0xff]  ;;  %v6800_v62 = vcombine.high %v214_v54, %v218_v55  ;;  %v6799_v5 = vcombine.low %v214_v54, %v218_v55 }
 0x170   :  { %3098 = vmatprep.subr.bf16.mxu1 %v6744_v4  ;;  %v8667_v18 = vpop.f32.mrb[3].mxu1  ;;  %v6822_v37 = vcombine.high %v237_v33, %v241_v34  ;;  %v6821_v43 = vcombine.low %v237_v33, %v241_v34  ;;  %v269_v63 = vld [vmem:[#allocation2 + $0x3d0] sm:$0xff]  ;;  %v6845_v4 = vcombine.low %v261_v57, %v265_v58  ;;  %v8679_v34 = vld [vmem:[%s9211_s0 + $0xc] ss:$28 sps:$4 sm:$0xff]   ;;  %v274_v57 = vld [vmem:[#allocation2 + $0x3f8] sm:$0xff]  ;;  %v6893_v58 = vcombine.low %v309_v46, %v313_v47 }
 0x171   :  { %2939 = vmatpush1.bf16.msra.mxu0 %v6789_v8  ;;  %v6854_v6 = vcombine.high %v269_v63, %v273_v1  ;;  %v6808_v8 = vcombine.high %v222_v2, %v226_v3  ;;  %v317_v54 = vld [vmem:[#allocation2 + $0x550] sm:$0xff]  ;;  %v282_v2 = vld [vmem:[#allocation2 + $0x438] sm:$0xff] }
 0x172   :  { %2940 = vmatprep.subr.bf16.mxu0 %v6798_v11  ;;  %v281_v11 = vld [vmem:[#allocation2 + $0x430] sm:$0xff] }
 0x173   :  { %3099 = vmatpush1.bf16.msra.mxu1 %v6743_v10  ;;  %v277_v10 = vld [vmem:[#allocation2 + $0x410] sm:$0xff] }
 0x174   :  { %3100 = vmatprep.subr.bf16.mxu1 %v6752_v15  ;;  %v6853_v15 = vcombine.low %v269_v63, %v273_v1  ;;  %v6862_v17 = vcombine.high %v277_v10, %v281_v11  ;;  %v321_v55 = vld [vmem:[#allocation2 + $0x570] sm:$0xff]  ;;  %v278_v1 = vld [vmem:[#allocation2 + $0x418] sm:$0xff] }
 0x175   :  { %2941 = vmatpush1.bf16.msra.mxu0 %v6797_v19  ;;  %v6816_v19 = vcombine.high %v230_v12, %v234_v13  ;;  %v329_v63 = vld [vmem:[#allocation2 + $0x5b0] sm:$0xff]  ;;  %v6901_v3 = vcombine.low %v317_v54, %v321_v55  ;;  %v290_v12 = vld [vmem:[#allocation2 + $0x478] sm:$0xff] }
 0x176   :  { %2942 = vmatprep.subr.bf16.mxu0 %v6806_v21  ;;  %v289_v21 = vld [vmem:[#allocation2 + $0x470] sm:$0xff] }
 0x177   :  { %3101 = vmatpush1.bf16.msra.mxu1 %v6751_v20  ;;  %v285_v20 = vld [vmem:[#allocation2 + $0x450] sm:$0xff] }
 0x178   :  { %3102 = vmatprep.subr.bf16.mxu1 %v6760_v24  ;;  %v6861_v24 = vcombine.low %v277_v10, %v281_v11  ;;  %v6870_v26 = vcombine.high %v285_v20, %v289_v21  ;;  %v6869_v33 = vcombine.low %v285_v20, %v289_v21  ;;  %v337_v10 = vld [vmem:[#allocation2 + $0x5f0] sm:$0xff]  ;;  %v286_v11 = vld [vmem:[#allocation2 + $0x458] sm:$0xff] }
 0x179   :  { %2943 = vmatpush1.bf16.msra.mxu0 %v6805_v27  ;;  %v6824_v27 = vcombine.high %v238_v22, %v242_v23  ;;  %v345_v20 = vld [vmem:[#allocation2 + $0x630] sm:$0xff]  ;;  %v294_v21 = vld [vmem:[#allocation2 + $0x498] sm:$0xff] }
 0x17a   :  { %2944 = vmatprep.subr.bf16.mxu0 %v6814_v29  ;;  %v297_v29 = vld [vmem:[#allocation2 + $0x4b0] sm:$0xff] }
 0x17b   :  { %3103 = vmatpush1.bf16.msra.mxu1 %v6759_v28  ;;  %v293_v28 = vld [vmem:[#allocation2 + $0x490] sm:$0xff] }
 0x17c   :  { %3104 = vmatprep.subr.bf16.mxu1 %v6768_v32  ;;  %v250_v32 = vld [vmem:[#allocation2 + $0x338] sm:$0xff]  ;;  %v6877_v42 = vcombine.low %v293_v28, %v297_v29 }
 0x17d   :  { %2945 = vmatpush1.bf16.msra.mxu0 %v6813_v35  ;;  %v6823_v35 = vcombine.low %v238_v22, %v242_v23  ;;  %v298_v22 = vld [vmem:[#allocation2 + $0x4b8] sm:$0xff] }
 0x17e   :  { %2946 = vmatprep.subr.bf16.mxu0 %v6822_v37  ;;  %v6832_v37 = vcombine.high %v246_v31, %v250_v32 }
 0x17f   :  { %3105 = vmatpush1.bf16.msra.mxu1 %v6767_v36  ;;  %v6878_v36 = vcombine.high %v293_v28, %v297_v29  ;;  %v353_v28 = vld [vmem:[#allocation2 + $0x670] sm:$0xff]  ;;  %v302_v29 = vld [vmem:[#allocation2 + $0x4d8] sm:$0xff] }
 0x180   :  { %3106 = vmatprep.subr.bf16.mxu1 %v6776_v40  ;;  %v254_v40 = vld [vmem:[#allocation2 + $0x358] sm:$0xff] }
 0x181   :  { %2947 = vmatpush1.bf16.msra.mxu0 %v6821_v43  ;;  %v6831_v43 = vcombine.low %v246_v31, %v250_v32  ;;  %v306_v31 = vld [vmem:[#allocation2 + $0x4f8] sm:$0xff] }
 0x182   :  { %2948 = vmatprep.subr.bf16.mxu0 %v6830_v45  ;;  %v6840_v45 = vcombine.high %v254_v40, %v258_v41 }
 0x183   :  { %3107 = vmatpush1.bf16.msra.mxu1 %v6775_v44  ;;  %v6886_v44 = vcombine.high %v301_v38, %v305_v39  ;;  %v310_v38 = vld [vmem:[#allocation2 + $0x518] sm:$0xff] }
 0x184   :  { %3108 = vmatprep.subr.bf16.mxu1 %v6784_v48  ;;  %v262_v48 = vld [vmem:[#allocation2 + $0x398] sm:$0xff] }
 0x185   :  { %2949 = vmatpush1.bf16.msra.mxu0 %v6829_v51  ;;  %v6839_v51 = vcombine.low %v254_v40, %v258_v41  ;;  %v314_v39 = vld [vmem:[#allocation2 + $0x538] sm:$0xff]  ;;  %v6887_v41 = vcombine.low %v302_v29, %v306_v31 }
 0x186   :  { %2950 = vmatprep.subr.bf16.mxu0 %v6838_v53  ;;  %v6848_v53 = vcombine.high %v262_v48, %v266_v49 }
 0x187   :  { %3109 = vmatpush1.bf16.msra.mxu1 %v6783_v52  ;;  %v6894_v52 = vcombine.high %v309_v46, %v313_v47  ;;  %v322_v46 = vld [vmem:[#allocation2 + $0x578] sm:$0xff] }
 0x188   :  { %3110 = vmatprep.subr.bf16.mxu1 %v6792_v56  ;;  %v270_v56 = vld [vmem:[#allocation2 + $0x3d8] sm:$0xff] }
 0x189   :  { %2951 = vmatpush1.bf16.msra.mxu0 %v6837_v59  ;;  %v6847_v59 = vcombine.low %v262_v48, %v266_v49  ;;  %v6895_v48 = vcombine.low %v310_v38, %v314_v39 }
 0x18a   :  { %2952 = vmatprep.subr.bf16.mxu0 %v6846_v61  ;;  %v6856_v61 = vcombine.high %v270_v56, %v274_v57 }
 0x18b   :  { %3111 = vmatpush1.bf16.msra.mxu1 %v6791_v60  ;;  %v6902_v60 = vcombine.high %v317_v54, %v321_v55  ;;  %v330_v54 = vld [vmem:[#allocation2 + $0x5b8] sm:$0xff] }
 0x18c   :  { %3112 = vmatprep.subr.bf16.mxu1 %v6800_v62  ;;  %v325_v62 = vld [vmem:[#allocation2 + $0x590] sm:$0xff] }
 0x18d   :  { %2953 = vmatpush1.bf16.msra.mxu0 %v6845_v4  ;;  %v6855_v4 = vcombine.low %v270_v56, %v274_v57  ;;  %v6909_v13 = vcombine.low %v325_v62, %v329_v63 }
 0x18e   :  { %2954 = vmatprep.subr.bf16.mxu0 %v6854_v6  ;;  %v6864_v6 = vcombine.high %v278_v1, %v282_v2 }
 0x18f   :  { %3113 = vmatpush1.bf16.msra.mxu1 %v6799_v5  ;;  %v6910_v5 = vcombine.high %v325_v62, %v329_v63  ;;  %v338_v62 = vld [vmem:[#allocation2 + $0x5f8] sm:$0xff] }
 0x190   :  { %3114 = vmatprep.subr.bf16.mxu1 %v6808_v8  ;;  %v333_v8 = vld [vmem:[#allocation2 + $0x5d0] sm:$0xff] }
 0x191   :  { %2955 = vmatpush1.bf16.msra.mxu0 %v6853_v15  ;;  %v6863_v15 = vcombine.low %v278_v1, %v282_v2  ;;  %v6917_v23 = vcombine.low %v333_v8, %v337_v10 }
 0x192   :  { %2967 = vmatprep.subr.bf16.mxu0 %v6862_v17  ;;  %v6872_v17 = vcombine.high %v286_v11, %v290_v12 }
 0x193   :  { %3115 = vmatpush1.bf16.msra.mxu1 %v6807_v16  ;;  %v6918_v16 = vcombine.high %v333_v8, %v337_v10  ;;  %v346_v8 = vld [vmem:[#allocation2 + $0x638] sm:$0xff] }
 0x194   :  { %3116 = vmatprep.subr.bf16.mxu1 %v6816_v19  ;;  %2957 = vmatmul.mubr.bf16.vlgmr.msra.gmra.mrb[4].mxu0 %v8673_v30  ;;  %v341_v19 = vld [vmem:[#allocation2 + $0x610] sm:$0xff] }
 0x195   :  { %2968 = vmatpush1.bf16.msra.mxu0 %v6861_v24  ;;  %2999 = vmatprep.mubr.bf16.mxu0 %v8679_v34  ;;  %v6871_v24 = vcombine.low %v286_v11, %v290_v12  ;;  %v6925_v32 = vcombine.low %v341_v19, %v345_v20 }
 0x196   :  { %2969 = vmatprep.subr.bf16.mxu0 %v6870_v26  ;;  %v6880_v26 = vcombine.high %v294_v21, %v298_v22 }
 0x197   :  { %3117 = vmatpush1.bf16.msra.mxu1 %v6815_v25  ;;  %v6926_v25 = vcombine.high %v341_v19, %v345_v20  ;;  %v354_v19 = vld [vmem:[#allocation2 + $0x678] sm:$0xff] }
 0x198   :  { %3118 = vmatprep.subr.bf16.mxu1 %v6824_v27  ;;  %v349_v27 = vld [vmem:[#allocation2 + $0x650] sm:$0xff] }
 0x199   :  { %2970 = vmatpush1.bf16.msra.mxu0 %v6869_v33  ;;  %v6879_v33 = vcombine.low %v294_v21, %v298_v22  ;;  %v6933_v40 = vcombine.low %v349_v27, %v353_v28 }
 0x19a   :  { %2971 = vmatprep.subr.bf16.mxu0 %v6878_v36  ;;  %v357_v36 = vld [vmem:[#allocation2 + $0x690] sm:$0xff] }
 0x19b   :  { %3119 = vmatpush1.bf16.msra.mxu1 %v6823_v35  ;;  %v6888_v35 = vcombine.high %v302_v29, %v306_v31 }
 0x19c   :  { %3120 = vmatprep.subr.bf16.mxu1 %v6832_v37  ;;  %v361_v37 = vld [vmem:[#allocation2 + $0x6b0] sm:$0xff] }
 0x19d   :  { %2972 = vmatpush1.bf16.msra.mxu0 %v6877_v42  ;;  %v6896_v42 = vcombine.high %v310_v38, %v314_v39  ;;  %v6941_v47 = vcombine.low %v357_v36, %v361_v37 }
 0x19e   :  { %2973 = vmatprep.subr.bf16.mxu0 %v6886_v44  ;;  %v369_v44 = vld [vmem:[#allocation2 + $0x6f0] sm:$0xff] }
 0x19f   :  { %3121 = vmatpush1.bf16.msra.mxu1 %v6831_v43  ;;  %v365_v43 = vld [vmem:[#allocation2 + $0x6d0] sm:$0xff] }
 0x1a0   :  { %3122 = vmatprep.subr.bf16.mxu1 %v6840_v45  ;;  %v318_v45 = vld [vmem:[#allocation2 + $0x558] sm:$0xff]  ;;  %v6950_v49 = vcombine.high %v365_v43, %v369_v44  ;;  %v6949_v55 = vcombine.low %v365_v43, %v369_v44 }
 0x1a1   :  { %2974 = vmatpush1.bf16.msra.mxu0 %v6885_v50  ;;  %v6904_v50 = vcombine.high %v318_v45, %v322_v46  ;;  %v6903_v56 = vcombine.low %v318_v45, %v322_v46  ;;  %v374_v43 = vld [vmem:[#allocation2 + $0x718] sm:$0xff]  ;;  %v8693_v46 = vld [vmem:[%s9211_s0 + $0x14] ss:$28 sps:$4 sm:$0xff]  }
 0x1a2   :  { %2975 = vmatprep.subr.bf16.mxu0 %v6894_v52  ;;  %v377_v52 = vld [vmem:[#allocation2 + $0x730] sm:$0xff]  ;;  %v378_v44 = vld [vmem:[#allocation2 + $0x738] sm:$0xff] }
 0x1a3   :  { %3123 = vmatpush1.bf16.msra.mxu1 %v6839_v51  ;;  %v373_v51 = vld [vmem:[#allocation2 + $0x710] sm:$0xff] }
 0x1a4   :  { %3124 = vmatprep.subr.bf16.mxu1 %v6848_v53  ;;  %v326_v53 = vld [vmem:[#allocation2 + $0x598] sm:$0xff]  ;;  %v6958_v57 = vcombine.high %v373_v51, %v377_v52  ;;  %v6957_v63 = vcombine.low %v373_v51, %v377_v52  ;;  %v433_v51 = vld [vmem:[#allocation2 + $0x8f0] sm:$0xff] }
 0x1a5   :  { %2976 = vmatpush1.bf16.msra.mxu0 %v6893_v58  ;;  %v6912_v58 = vcombine.high %v326_v53, %v330_v54  ;;  %v6911_v1 = vcombine.low %v326_v53, %v330_v54  ;;  %v382_v52 = vld [vmem:[#allocation2 + $0x758] sm:$0xff] }
 0x1a6   :  { %2977 = vmatprep.subr.bf16.mxu0 %v6902_v60  ;;  %v385_v60 = vld [vmem:[#allocation2 + $0x770] sm:$0xff]  ;;  %v386_v53 = vld [vmem:[#allocation2 + $0x778] sm:$0xff] }
 0x1a7   :  { %3125 = vmatpush1.bf16.msra.mxu1 %v6847_v59  ;;  %v381_v59 = vld [vmem:[#allocation2 + $0x750] sm:$0xff] }
 0x1a8   :  { %3126 = vmatprep.subr.bf16.mxu1 %v6856_v61  ;;  %v334_v61 = vld [vmem:[#allocation2 + $0x5d8] sm:$0xff]  ;;  %v6966_v2 = vcombine.high %v381_v59, %v385_v60  ;;  %v6965_v10 = vcombine.low %v381_v59, %v385_v60  ;;  %v441_v59 = vld [vmem:[#allocation2 + $0x930] sm:$0xff] }
 0x1a9   :  { %2978 = vmatpush1.bf16.msra.mxu0 %v6901_v3  ;;  %v6920_v3 = vcombine.high %v334_v61, %v338_v62  ;;  %v6919_v11 = vcombine.low %v334_v61, %v338_v62  ;;  %v390_v60 = vld [vmem:[#allocation2 + $0x798] sm:$0xff] }
 0x1aa   :  { %2979 = vmatprep.subr.bf16.mxu0 %v6910_v5  ;;  %v393_v5 = vld [vmem:[#allocation2 + $0x7b0] sm:$0xff]  ;;  %v394_v61 = vld [vmem:[#allocation2 + $0x7b8] sm:$0xff] }
 0x1ab   :  { %3127 = vmatpush1.bf16.msra.mxu1 %v6855_v4  ;;  %v389_v4 = vld [vmem:[#allocation2 + $0x790] sm:$0xff] }
 0x1ac   :  { %3139 = vmatprep.subr.bf16.mxu1 %v6864_v6  ;;  %v342_v6 = vld [vmem:[#allocation2 + $0x618] sm:$0xff]  ;;  %v6974_v12 = vcombine.high %v389_v4, %v393_v5  ;;  %v6973_v20 = vcombine.low %v389_v4, %v393_v5  ;;  %v449_v4 = vld [vmem:[#allocation2 + $0x970] sm:$0xff] }
 0x1ad   :  { %2980 = vmatpush1.bf16.msra.mxu0 %v6909_v13  ;;  %v6928_v13 = vcombine.high %v342_v6, %v346_v8  ;;  %v6927_v21 = vcombine.low %v342_v6, %v346_v8  ;;  %v398_v5 = vld [vmem:[#allocation2 + $0x7d8] sm:$0xff] }
 0x1ae   :  { %3129 = vmatmul.mubr.bf16.vlgmr.msra.gmra.mrb[12].mxu1 %v8673_v30  ;;  %2981 = vmatprep.subr.bf16.mxu0 %v6918_v16  ;;  %v6934_v30 = vcombine.high %v349_v27, %v353_v28  ;;  %v401_v16 = vld [vmem:[#allocation2 + $0x7f0] sm:$0xff]  ;;  %v362_v27 = vld [vmem:[#allocation2 + $0x6b8] sm:$0xff] }
 0x1af   :  { %3140 = vmatpush1.bf16.msra.mxu1 %v6863_v15  ;;  %3171 = vmatprep.mubr.bf16.mxu1 %v8679_v34  ;;  %v6942_v34 = vcombine.high %v357_v36, %v361_v37  ;;  %v397_v15 = vld [vmem:[#allocation2 + $0x7d0] sm:$0xff]  ;;  %v370_v36 = vld [vmem:[#allocation2 + $0x6f8] sm:$0xff] }
 0x1b0   :  { %3141 = vmatprep.subr.bf16.mxu1 %v6872_v17  ;;  %v350_v17 = vld [vmem:[#allocation2 + $0x658] sm:$0xff]  ;;  %v6982_v22 = vcombine.high %v397_v15, %v401_v16  ;;  %v6981_v28 = vcombine.low %v397_v15, %v401_v16  ;;  %v457_v15 = vld [vmem:[#allocation2 + $0x9b0] sm:$0xff] }
 0x1b1   :  { %2982 = vmatpush1.bf16.msra.mxu0 %v6917_v23  ;;  %v6936_v23 = vcombine.high %v350_v17, %v354_v19  ;;  %v6935_v29 = vcombine.low %v350_v17, %v354_v19  ;;  %v402_v6 = vld [vmem:[#allocation2 + $0x7f8] sm:$0xff] }
 0x1b2   :  { %2983 = vmatprep.subr.bf16.mxu0 %v6926_v25  ;;  %v409_v25 = vld [vmem:[#allocation2 + $0x830] sm:$0xff]  ;;  %v406_v16 = vld [vmem:[#allocation2 + $0x818] sm:$0xff] }
 0x1b3   :  { %3142 = vmatpush1.bf16.msra.mxu1 %v6871_v24  ;;  %v405_v24 = vld [vmem:[#allocation2 + $0x810] sm:$0xff]  ;;  %v410_v17 = vld [vmem:[#allocation2 + $0x838] sm:$0xff] }
 0x1b4   :  { %3143 = vmatprep.subr.bf16.mxu1 %v6880_v26  ;;  %v358_v26 = vld [vmem:[#allocation2 + $0x698] sm:$0xff]  ;;  %v6990_v31 = vcombine.high %v405_v24, %v409_v25  ;;  %v6989_v37 = vcombine.low %v405_v24, %v409_v25  ;;  %v465_v24 = vld [vmem:[#allocation2 + $0x9f0] sm:$0xff] }
 0x1b5   :  { %2984 = vmatpush1.bf16.msra.mxu0 %v6925_v32  ;;  %v6944_v32 = vcombine.high %v358_v26, %v362_v27  ;;  %v6943_v38 = vcombine.low %v358_v26, %v362_v27  ;;  %v414_v25 = vld [vmem:[#allocation2 + $0x858] sm:$0xff] }
 0x1b6   :  { %2985 = vmatprep.subr.bf16.mxu0 %v6934_v30  ;;  %v417_v30 = vld [vmem:[#allocation2 + $0x870] sm:$0xff]  ;;  %v418_v26 = vld [vmem:[#allocation2 + $0x878] sm:$0xff] }
 0x1b7   :  { %3144 = vmatpush1.bf16.msra.mxu1 %v6879_v33  ;;  %v413_v33 = vld [vmem:[#allocation2 + $0x850] sm:$0xff] }
 0x1b8   :  { %3145 = vmatprep.subr.bf16.mxu1 %v6888_v35  ;;  %v366_v35 = vld [vmem:[#allocation2 + $0x6d8] sm:$0xff]  ;;  %v6998_v39 = vcombine.high %v413_v33, %v417_v30  ;;  %v6997_v45 = vcombine.low %v413_v33, %v417_v30  ;;  %v473_v33 = vld [vmem:[#allocation2 + $0xa30] sm:$0xff] }
 0x1b9   :  { %2986 = vmatpush1.bf16.msra.mxu0 %v6933_v40  ;;  %v6952_v40 = vcombine.high %v366_v35, %v370_v36  ;;  %v422_v30 = vld [vmem:[#allocation2 + $0x898] sm:$0xff] }
 0x1ba   :  { %2987 = vmatprep.subr.bf16.mxu0 %v6942_v34  ;;  %v425_v34 = vld [vmem:[#allocation2 + $0x8b0] sm:$0xff] }
 0x1bb   :  { %3146 = vmatpush1.bf16.msra.mxu1 %v6887_v41  ;;  %v421_v41 = vld [vmem:[#allocation2 + $0x890] sm:$0xff] }
 0x1bc   :  { %3147 = vmatprep.subr.bf16.mxu1 %v6896_v42  ;;  %v8687_v42 = vld [vmem:[%s9211_s0 + $0x8] ss:$28 sps:$4 sm:$0xff]   ;;  %v7005_v54 = vcombine.low %v421_v41, %v425_v34 }
 0x1bd   :  { %2988 = vmatpush1.bf16.msra.mxu0 %v6941_v47  ;;  %v6951_v47 = vcombine.low %v366_v35, %v370_v36  ;;  %v426_v35 = vld [vmem:[#allocation2 + $0x8b8] sm:$0xff] }
 0x1be   :  { %2989 = vmatprep.subr.bf16.mxu0 %v6950_v49  ;;  %v6960_v49 = vcombine.high %v374_v43, %v378_v44 }
 0x1bf   :  { %3148 = vmatpush1.bf16.msra.mxu1 %v6895_v48  ;;  %v7006_v48 = vcombine.high %v421_v41, %v425_v34  ;;  %v481_v41 = vld [vmem:[#allocation2 + $0xa70] sm:$0xff]  ;;  %v430_v34 = vld [vmem:[#allocation2 + $0x8d8] sm:$0xff] }
 0x1c0   :  { %3149 = vmatprep.subr.bf16.mxu1 %v6904_v50  ;;  %v429_v50 = vld [vmem:[#allocation2 + $0x8d0] sm:$0xff] }
 0x1c1   :  { %2990 = vmatpush1.bf16.msra.mxu0 %v6949_v55  ;;  %v6959_v55 = vcombine.low %v374_v43, %v378_v44  ;;  %v7013_v62 = vcombine.low %v429_v50, %v433_v51  ;;  %v434_v43 = vld [vmem:[#allocation2 + $0x8f8] sm:$0xff] }
 0x1c2   :  { %2991 = vmatprep.subr.bf16.mxu0 %v6958_v57  ;;  %v6968_v57 = vcombine.high %v382_v52, %v386_v53 }
 0x1c3   :  { %3150 = vmatpush1.bf16.msra.mxu1 %v6903_v56  ;;  %v7014_v56 = vcombine.high %v429_v50, %v433_v51  ;;  %v438_v50 = vld [vmem:[#allocation2 + $0x918] sm:$0xff] }
 0x1c4   :  { %3151 = vmatprep.subr.bf16.mxu1 %v6912_v58  ;;  %v437_v58 = vld [vmem:[#allocation2 + $0x910] sm:$0xff]  ;;  %v442_v51 = vld [vmem:[#allocation2 + $0x938] sm:$0xff] }
 0x1c5   :  { %2992 = vmatpush1.bf16.msra.mxu0 %v6957_v63  ;;  %v6967_v63 = vcombine.low %v382_v52, %v386_v53  ;;  %v7021_v8 = vcombine.low %v437_v58, %v441_v59  ;;  %v7015_v53 = vcombine.low %v430_v34, %v434_v43 }
 0x1c6   :  { %2993 = vmatprep.subr.bf16.mxu0 %v6966_v2  ;;  %v6976_v2 = vcombine.high %v390_v60, %v394_v61 }
 0x1c7   :  { %3152 = vmatpush1.bf16.msra.mxu1 %v6911_v1  ;;  %v7022_v1 = vcombine.high %v437_v58, %v441_v59  ;;  %v450_v58 = vld [vmem:[#allocation2 + $0x978] sm:$0xff] }
 0x1c8   :  { %3153 = vmatprep.subr.bf16.mxu1 %v6920_v3  ;;  %v445_v3 = vld [vmem:[#allocation2 + $0x950] sm:$0xff] }
 0x1c9   :  { %2994 = vmatpush1.bf16.msra.mxu0 %v6965_v10  ;;  %v6975_v10 = vcombine.low %v390_v60, %v394_v61  ;;  %v7029_v19 = vcombine.low %v445_v3, %v449_v4  ;;  %v7023_v60 = vcombine.low %v438_v50, %v442_v51 }
 0x1ca   :  { %2995 = vmatprep.subr.bf16.mxu0 %v6974_v12  ;;  %v6984_v12 = vcombine.high %v398_v5, %v402_v6 }
 0x1cb   :  { %3154 = vmatpush1.bf16.msra.mxu1 %v6919_v11  ;;  %v7030_v11 = vcombine.high %v445_v3, %v449_v4  ;;  %v458_v3 = vld [vmem:[#allocation2 + $0x9b8] sm:$0xff] }
 0x1cc   :  { %3155 = vmatprep.subr.bf16.mxu1 %v6928_v13  ;;  %v453_v13 = vld [vmem:[#allocation2 + $0x990] sm:$0xff] }
 0x1cd   :  { %2996 = vmatpush1.bf16.msra.mxu0 %v6973_v20  ;;  %v6983_v20 = vcombine.low %v398_v5, %v402_v6  ;;  %v7037_v27 = vcombine.low %v453_v13, %v457_v15 }
 0x1ce   :  { %2997 = vmatprep.subr.bf16.mxu0 %v6982_v22  ;;  %v6992_v22 = vcombine.high %v406_v16, %v410_v17 }
 0x1cf   :  { %3156 = vmatpush1.bf16.msra.mxu1 %v6927_v21  ;;  %v7038_v21 = vcombine.high %v453_v13, %v457_v15  ;;  %v466_v13 = vld [vmem:[#allocation2 + $0x9f8] sm:$0xff] }
 0x1d0   :  { %3157 = vmatprep.subr.bf16.mxu1 %v6936_v23  ;;  %v461_v23 = vld [vmem:[#allocation2 + $0x9d0] sm:$0xff] }
 0x1d1   :  { %2998 = vmatpush1.bf16.msra.mxu0 %v6981_v28  ;;  %v6991_v28 = vcombine.low %v406_v16, %v410_v17  ;;  %v7045_v36 = vcombine.low %v461_v23, %v465_v24 }
 0x1d2   :  { %3010 = vmatprep.subr.bf16.mxu0 %v6990_v31  ;;  %v7000_v31 = vcombine.high %v414_v25, %v418_v26 }
 0x1d3   :  { %3158 = vmatpush1.bf16.msra.mxu1 %v6935_v29  ;;  %v7046_v29 = vcombine.high %v461_v23, %v465_v24  ;;  %v474_v23 = vld [vmem:[#allocation2 + $0xa38] sm:$0xff] }
 0x1d4   :  { %3159 = vmatprep.subr.bf16.mxu1 %v6944_v32  ;;  %3000 = vmatmul.mubr.bf16.vlgmr.msra.gmra.mrb[4].mxu0 %v8687_v42  ;;  %v469_v32 = vld [vmem:[#allocation2 + $0xa10] sm:$0xff] }
 0x1d5   :  { %3011 = vmatpush1.bf16.msra.mxu0 %v6989_v37  ;;  %3042 = vmatprep.mubr.bf16.mxu0 %v8693_v46  ;;  %v6999_v37 = vcombine.low %v414_v25, %v418_v26  ;;  %v7053_v44 = vcombine.low %v469_v32, %v473_v33 }
 0x1d6   :  { %3012 = vmatprep.subr.bf16.mxu0 %v6998_v39  ;;  %v7008_v39 = vcombine.high %v422_v30, %v426_v35 }
 0x1d7   :  { %3160 = vmatpush1.bf16.msra.mxu1 %v6943_v38  ;;  %v7054_v38 = vcombine.high %v469_v32, %v473_v33  ;;  %v482_v32 = vld [vmem:[#allocation2 + $0xa78] sm:$0xff] }
 0x1d8   :  { %3161 = vmatprep.subr.bf16.mxu1 %v6952_v40  ;;  %v477_v40 = vld [vmem:[#allocation2 + $0xa50] sm:$0xff] }
 0x1d9   :  { %3013 = vmatpush1.bf16.msra.mxu0 %v6997_v45  ;;  %v7007_v45 = vcombine.low %v422_v30, %v426_v35  ;;  %v7061_v52 = vcombine.low %v477_v40, %v481_v41 }
 0x1da   :  { %3014 = vmatprep.subr.bf16.mxu0 %v7006_v48  ;;  %v485_v48 = vld [vmem:[#allocation2 + $0xa90] sm:$0xff] }
 0x1db   :  { %3162 = vmatpush1.bf16.msra.mxu1 %v6951_v47  ;;  %v7016_v47 = vcombine.high %v430_v34, %v434_v43  ;;  %v494_v43 = vld [vmem:[#allocation2 + $0xad8] sm:$0xff] }
 0x1dc   :  { %3163 = vmatprep.subr.bf16.mxu1 %v6960_v49  ;;  %v489_v49 = vld [vmem:[#allocation2 + $0xab0] sm:$0xff] }
 0x1dd   :  { %3015 = vmatpush1.bf16.msra.mxu0 %v7005_v54  ;;  %v7024_v54 = vcombine.high %v438_v50, %v442_v51  ;;  %v7069_v59 = vcombine.low %v485_v48, %v489_v49  ;;  %v502_v50 = vld [vmem:[#allocation2 + $0xb18] sm:$0xff] }
 0x1de   :  { %3016 = vmatprep.subr.bf16.mxu0 %v7014_v56  ;;  %v497_v56 = vld [vmem:[#allocation2 + $0xaf0] sm:$0xff]  ;;  %v506_v51 = vld [vmem:[#allocation2 + $0xb38] sm:$0xff] }
 0x1df   :  { %3164 = vmatpush1.bf16.msra.mxu1 %v6959_v55  ;;  %v493_v55 = vld [vmem:[#allocation2 + $0xad0] sm:$0xff] }
 0x1e0   :  { %3165 = vmatprep.subr.bf16.mxu1 %v6968_v57  ;;  %v446_v57 = vld [vmem:[#allocation2 + $0x958] sm:$0xff]  ;;  %v7078_v61 = vcombine.high %v493_v55, %v497_v56  ;;  %v7077_v4 = vcombine.low %v493_v55, %v497_v56 }
 0x1e1   :  { %3017 = vmatpush1.bf16.msra.mxu0 %v7013_v62  ;;  %v7032_v62 = vcombine.high %v446_v57, %v450_v58  ;;  %v7031_v5 = vcombine.low %v446_v57, %v450_v58  ;;  %v510_v55 = vld [vmem:[#allocation2 + $0xb58] sm:$0xff]  ;;  %v541_v57 = vlaneseq }
 0x1e2   :  { %3018 = vmatprep.subr.bf16.mxu0 %v7022_v1  ;;  %v505_v1 = vld [vmem:[#allocation2 + $0xb30] sm:$0xff]  ;;  %v514_v56 = vld [vmem:[#allocation2 + $0xb78] sm:$0xff] }
 0x1e3   :  { %3166 = vmatpush1.bf16.msra.mxu1 %v6967_v63  ;;  %v501_v63 = vld [vmem:[#allocation2 + $0xb10] sm:$0xff]  ;;  %v7614_v58 = vld [vmem:[#allocation6 + $0x40] ss:$16 sps:$4 sm:$0xff]  }
 0x1e4   :  { %3167 = vmatprep.subr.bf16.mxu1 %v6976_v2  ;;  %v454_v2 = vld [vmem:[#allocation2 + $0x998] sm:$0xff]  ;;  %v7086_v6 = vcombine.high %v501_v63, %v505_v1  ;;  %v7085_v15 = vcombine.low %v501_v63, %v505_v1  ;;  %v8705_v1 = vshrl.u32 %v541_v57, 7 }
 0x1e5   :  { %3019 = vmatpush1.bf16.msra.mxu0 %v7021_v8  ;;  %v7040_v8 = vcombine.high %v454_v2, %v458_v3  ;;  %v7039_v16 = vcombine.low %v454_v2, %v458_v3  ;;  %v522_v63 = vld [vmem:[#allocation2 + $0xbb8] sm:$0xff]  ;;  %v7095_v3 = vcombine.low %v510_v55, %v514_v56 }
 0x1e6   :  { %3020 = vmatprep.subr.bf16.mxu0 %v7030_v11  ;;  %v513_v11 = vld [vmem:[#allocation2 + $0xb70] sm:$0xff]  ;;  %v7617_v2 = vld [vmem:[#allocation6 + $0x60] ss:$16 sps:$4 sm:$0xff]  }
 0x1e7   :  { %3168 = vmatpush1.bf16.msra.mxu1 %v6975_v10  ;;  %v509_v10 = vld [vmem:[#allocation2 + $0xb50] sm:$0xff] }
 0x1e8   :  { %3169 = vmatprep.subr.bf16.mxu1 %v6984_v12  ;;  %v462_v12 = vld [vmem:[#allocation2 + $0x9d8] sm:$0xff]  ;;  %v7094_v17 = vcombine.high %v509_v10, %v513_v11  ;;  %v7093_v24 = vcombine.low %v509_v10, %v513_v11  ;;  %v8710_v11 = vld [vmem:[#allocation4] sm:$0xff] }
 0x1e9   :  { %3021 = vmatpush1.bf16.msra.mxu0 %v7029_v19  ;;  %v7048_v19 = vcombine.high %v462_v12, %v466_v13  ;;  %v7047_v25 = vcombine.low %v462_v12, %v466_v13  ;;  %v530_v10 = vld [vmem:[#allocation2 + $0xbf8] sm:$0xff]  ;;  %v8713_v12 = vsub.s32 1, %v8705_v1 }
 0x1ea   :  { %3022 = vmatprep.subr.bf16.mxu0 %v7038_v21  ;;  %v521_v21 = vld [vmem:[#allocation2 + $0xbb0] sm:$0xff]  ;;  %v7620_v13 = vld [vmem:[#allocation6 + $0x80] ss:$16 sps:$4 sm:$0xff]  }
 0x1eb   :  { %3170 = vmatpush1.bf16.msra.mxu1 %v6983_v20  ;;  %v517_v20 = vld [vmem:[#allocation2 + $0xb90] sm:$0xff] }
 0x1ec   :  { %3182 = vmatprep.subr.bf16.mxu1 %v6992_v22  ;;  %v470_v22 = vld [vmem:[#allocation2 + $0xa18] sm:$0xff]  ;;  %v7102_v26 = vcombine.high %v517_v20, %v521_v21  ;;  %v7101_v33 = vcombine.low %v517_v20, %v521_v21 }
 0x1ed   :  { %3023 = vmatpush1.bf16.msra.mxu0 %v7037_v27  ;;  %v7056_v27 = vcombine.high %v470_v22, %v474_v23  ;;  %v7055_v30 = vcombine.low %v470_v22, %v474_v23  ;;  %v534_v20 = vld [vmem:[#allocation2 + $0xc18] sm:$0xff]  ;;  %v548_v22 = vrot.slane %v8710_v11, %v8713_v12 }
 0x1ee   :  { %3172 = vmatmul.mubr.bf16.vlgmr.msra.gmra.mrb[12].mxu1 %v8687_v42  ;;  %3024 = vmatprep.subr.bf16.mxu0 %v7046_v29  ;;  %v7062_v42 = vcombine.high %v477_v40, %v481_v41  ;;  %v529_v29 = vld [vmem:[#allocation2 + $0xbf0] sm:$0xff]  ;;  %v7610_v41 = vld [vmem:[#allocation6 + $0x4] ss:$16 sps:$4 sm:$0xff]   ;;  %v7623_v23 = vld [vmem:[#allocation6 + $0xa0] ss:$16 sps:$4 sm:$0xff]  }
 0x1ef   :  { %3183 = vmatpush1.bf16.msra.mxu1 %v6991_v28  ;;  %3214 = vmatprep.mubr.bf16.mxu1 %v8693_v46  ;;  %v7070_v46 = vcombine.high %v485_v48, %v489_v49  ;;  %v525_v28 = vld [vmem:[#allocation2 + $0xbd0] sm:$0xff]  ;;  %v538_v21 = vld [vmem:[#allocation2 + $0xc38] sm:$0xff] }
 0x1f0   :  { %3184 = vmatprep.subr.bf16.mxu1 %v7000_v31  ;;  %v478_v31 = vld [vmem:[#allocation2 + $0xa58] sm:$0xff]  ;;  %v7110_v35 = vcombine.high %v525_v28, %v529_v29  ;;  %v8701_v49 = vld [vmem:[%s9211_s0 + $0x10] ss:$28 sps:$4 sm:$0xff]  }
 0x1f1   :  { %3025 = vmatpush1.bf16.msra.mxu0 %v7045_v36  ;;  %v7064_v36 = vcombine.high %v478_v31, %v482_v32  ;;  %v7063_v40 = vcombine.low %v478_v31, %v482_v32 }
 0x1f2   :  { %3026 = vmatprep.subr.bf16.mxu0 %v7054_v38  ;;  %v490_v38 = vld [vmem:[#allocation2 + $0xab8] sm:$0xff] }
 0x1f3   :  { %3185 = vmatpush1.bf16.msra.mxu1 %v6999_v37  ;;  %v486_v37 = vld [vmem:[#allocation2 + $0xa98] sm:$0xff] }
 0x1f4   :  { %3186 = vmatprep.subr.bf16.mxu1 %v7008_v39  ;;  %v7109_v39 = vcombine.low %v525_v28, %v529_v29  ;;  %v7072_v34 = vcombine.high %v486_v37, %v490_v38 }
 0x1f5   :  { %3027 = vmatpush1.bf16.msra.mxu0 %v7053_v44  ;;  %v498_v44 = vld [vmem:[#allocation2 + $0xaf8] sm:$0xff] }
 0x1f6   :  { %3028 = vmatprep.subr.bf16.mxu0 %v7062_v42  ;;  %v7071_v42 = vcombine.low %v486_v37, %v490_v38  ;;  %v7080_v48 = vcombine.high %v494_v43, %v498_v44  ;;  %v7119_v37 = vcombine.low %v534_v20, %v538_v21 }
 0x1f7   :  { %3187 = vmatpush1.bf16.msra.mxu1 %v7007_v45  ;;  %v7608_v45 = vld [vmem:[#allocation6] ss:$16 sps:$4 sm:$0xff]  }
 0x1f8   :  { %3188 = vmatprep.subr.bf16.mxu1 %v7016_v47  ;;  %v7613_v47 = vld [vmem:[#allocation6 + $0x24] ss:$16 sps:$4 sm:$0xff]  }
 0x1f9   :  { %3029 = vmatpush1.bf16.msra.mxu0 %v7061_v52  ;;  %v7611_v52 = vld [vmem:[#allocation6 + $0x20] ss:$16 sps:$4 sm:$0xff]  }
 0x1fa   :  { %3030 = vmatprep.subr.bf16.mxu0 %v7070_v46  ;;  %v7616_v46 = vld [vmem:[#allocation6 + $0x44] ss:$16 sps:$4 sm:$0xff]  }
 0x1fb   :  { %3189 = vmatpush1.bf16.msra.mxu1 %v7015_v53  ;;  %v7079_v53 = vcombine.low %v494_v43, %v498_v44 }
 0x1fc   :  { %3190 = vmatprep.subr.bf16.mxu1 %v7024_v54  ;;  %v7088_v54 = vcombine.high %v502_v50, %v506_v51 }
 0x1fd   :  { %3031 = vmatpush1.bf16.msra.mxu0 %v7069_v59  ;;  %v7087_v59 = vcombine.low %v502_v50, %v506_v51  ;;  %v551_v50 = vsub.s32 2, %v8705_v1 }
 0x1fe   :  { %3032 = vmatprep.subr.bf16.mxu0 %v7078_v61  ;;  %v7096_v61 = vcombine.high %v510_v55, %v514_v56  ;;  %v555_v55 = vsub.s32 3, %v8705_v1 }
 0x1ff   :  { %3191 = vmatpush1.bf16.msra.mxu1 %v7023_v60  ;;  %v7619_v60 = vld [vmem:[#allocation6 + $0x64] ss:$16 sps:$4 sm:$0xff]  }
 0x200   :  { %3192 = vmatprep.subr.bf16.mxu1 %v7032_v62  ;;  %v518_v62 = vld [vmem:[#allocation2 + $0xb98] sm:$0xff] }
 0x201   :  { %3033 = vmatpush1.bf16.msra.mxu0 %v7077_v4  ;;  %v7622_v4 = vld [vmem:[#allocation6 + $0x84] ss:$16 sps:$4 sm:$0xff]  }
 0x202   :  { %3034 = vmatprep.subr.bf16.mxu0 %v7086_v6  ;;  %v8708_v6 = vsub.s32 0, %v8705_v1 }
 0x203   :  { %3193 = vmatpush1.bf16.msra.mxu1 %v7031_v5  ;;  %v7104_v5 = vcombine.high %v518_v62, %v522_v63 }
 0x204   :  { %3194 = vmatprep.subr.bf16.mxu1 %v7040_v8  ;;  %v526_v8 = vld [vmem:[#allocation2 + $0xbd8] sm:$0xff] }
 0x205   :  { %3035 = vmatpush1.bf16.msra.mxu0 %v7085_v15  ;;  %v7103_v15 = vcombine.low %v518_v62, %v522_v63  ;;  %v7626_v63 = vld [vmem:[#allocation6 + $0x8] ss:$16 sps:$4 sm:$0xff]  }
 0x206   :  { %3036 = vmatprep.subr.bf16.mxu0 %v7094_v17  ;;  %v7112_v17 = vcombine.high %v526_v8, %v530_v10 }
 0x207   :  { %3195 = vmatpush1.bf16.msra.mxu1 %v7039_v16  ;;  %v7625_v16 = vld [vmem:[#allocation6 + $0xa4] ss:$16 sps:$4 sm:$0xff]  }
 0x208   :  { %3196 = vmatprep.subr.bf16.mxu1 %v7048_v19  ;;  %v544_v19 = vrot.slane %v8710_v11, %v8708_v6 }
 0x209   :  { %3037 = vmatpush1.bf16.msra.mxu0 %v7093_v24  ;;  %v7111_v24 = vcombine.low %v526_v8, %v530_v10 }
 0x20a   :  { %3038 = vmatprep.subr.bf16.mxu0 %v7102_v26 }
 0x20b   :  { %3197 = vmatpush1.bf16.msra.mxu1 %v7047_v25  ;;  %v7631_v25 = vld [vmem:[#allocation6 + $0xc4] ss:$16 sps:$4 sm:$0xff]  }
 0x20c   :  { %3198 = vmatprep.subr.bf16.mxu1 %v7056_v27  ;;  %v7120_v27 = vcombine.high %v534_v20, %v538_v21  ;;  %v7632_v21 = vld [vmem:[#allocation6 + $0x28] ss:$16 sps:$4 sm:$0xff]  }
 0x20d   :  { %3039 = vmatpush1.bf16.msra.mxu0 %v7101_v33  ;;  %v7629_v33 = vld [vmem:[#allocation6 + $0xc0] ss:$16 sps:$4 sm:$0xff]  }
 0x20e   :  { %3040 = vmatprep.subr.bf16.mxu0 %v7110_v35 }
 0x20f   :  { %3199 = vmatpush1.bf16.msra.mxu1 %v7055_v30 }
 0x210   :  { %3200 = vmatprep.subr.bf16.mxu1 %v7064_v36 }
 0x211   :  { %3041 = vmatpush1.bf16.msra.mxu0 %v7109_v39 }
 0x212   :  { %5266 = vmatprep.subr.bf16.mxu0 %v7610_v41  ;;  %v7637_v41 = vld [vmem:[#allocation6 + $0xe4] ss:$16 sps:$4 sm:$0xff]  }
 0x213   :  { %3201 = vmatpush1.bf16.msra.mxu1 %v7063_v40  ;;  %v7628_v40 = vld [vmem:[#allocation6 + $0xc] ss:$16 sps:$4 sm:$0xff]  }
 0x214   :  { %3202 = vmatprep.subr.bf16.mxu1 %v7072_v34  ;;  %3043 = vmatmul.mubr.bf16.vlgmr.msra.gmra.mrb[4].mxu0 %v8701_v49 }
 0x215   :  { %5267 = vmatpush1.bf16.msra.mxu0 %v7608_v45 }
 0x216   :  { %5268 = vmatprep.subr.bf16.mxu0 %v7613_v47 }
 0x217   :  { %3203 = vmatpush1.bf16.msra.mxu1 %v7071_v42 }
 0x218   :  { %3204 = vmatprep.subr.bf16.mxu1 %v7080_v48 }
 0x219   :  { %5269 = vmatpush1.bf16.msra.mxu0 %v7611_v52  ;;  %v7641_v52 = vld [vmem:[#allocation6 + $0x100] ss:$16 sps:$4 sm:$0xff]  }
 0x21a   :  { %5270 = vmatprep.subr.bf16.mxu0 %v7616_v46 }
 0x21b   :  { %3205 = vmatpush1.bf16.msra.mxu1 %v7079_v53  ;;  %v7649_v53 = vld [vmem:[#allocation6 + $0x124] ss:$16 sps:$4 sm:$0xff]  }
 0x21c   :  { %3206 = vmatprep.subr.bf16.mxu1 %v7088_v54 }
 0x21d   :  { %5271 = vmatpush1.bf16.msra.mxu0 %v7614_v58 }
 0x21e   :  { %5272 = vmatprep.subr.bf16.mxu0 %v7619_v60  ;;  %v7647_v60 = vld [vmem:[#allocation6 + $0x120] ss:$16 sps:$4 sm:$0xff]  }
 0x21f   :  { %3207 = vmatpush1.bf16.msra.mxu1 %v7087_v59  ;;  %v552_v59 = vrot.slane %v8710_v11, %v551_v50 }
 0x220   :  { %3208 = vmatprep.subr.bf16.mxu1 %v7096_v61 }
 0x221   :  { %5273 = vmatpush1.bf16.msra.mxu0 %v7617_v2  ;;  %v556_v2 = vrot.slane %v8710_v11, %v555_v55 }
 0x222   :  { %5274 = vmatprep.subr.bf16.mxu0 %v7622_v4 }
 0x223   :  { %3209 = vmatpush1.bf16.msra.mxu1 %v7095_v3  ;;  %v7655_v3 = vld [vmem:[#allocation6 + $0x144] ss:$16 sps:$4 sm:$0xff]  }
 0x224   :  { %3210 = vmatprep.subr.bf16.mxu1 %v7104_v5  ;;  %v7634_v5 = vld [vmem:[#allocation6 + $0x2c] ss:$16 sps:$4 sm:$0xff]  }
 0x225   :  { %5275 = vmatpush1.bf16.msra.mxu0 %v7620_v13 }
 0x226   :  { %5276 = vmatprep.subr.bf16.mxu0 %v7625_v16 }
 0x227   :  { %3211 = vmatpush1.bf16.msra.mxu1 %v7103_v15  ;;  %v2700_v26 = vpop.f32.mrb[0].mxu0  ;;  %v8259_v15 = vld [vmem:[%s9211_s0 + $0x18] ss:$28 sps:$4 sm:$0xff]  }
 0x228   :  { %3212 = vmatprep.subr.bf16.mxu1 %v7112_v17  ;;  %v7479_v28 = vadd.f32 %v2700_v26, %v544_v19  ;;  %v2702_v29 = vpop.f32.mrb[1].mxu0  ;;  %v7653_v17 = vld [vmem:[#allocation6 + $0x140] ss:$16 sps:$4 sm:$0xff]   ;;  %v7640_v26 = vld [vmem:[#allocation6 + $0x4c] ss:$16 sps:$4 sm:$0xff]  }
 0x229   :  { %v7481_v31 = vadd.f32 %v2702_v29, %v548_v22  ;;  %v2704_v32 = vpop.f32.mrb[2].mxu0  ;;  %5277 = vmatpush1.bf16.msra.mxu0 %v7623_v23  ;;  %v7638_v29 = vld [vmem:[#allocation6 + $0x48] ss:$16 sps:$4 sm:$0xff]  }
 0x22a   :  { %v8720_v30 = vadd.f32 %v7479_v28, %v8660_v7  ;;  %v7483_v35 = vadd.f32 %v2704_v32, %v544_v19  ;;  %v2706_v36 = vpop.f32.mrb[3].mxu0  ;;  %5278 = vmatprep.subr.bf16.mxu0 %v7631_v25  ;;  %v7667_v32 = vld [vmem:[#allocation6 + $0x184] ss:$16 sps:$4 sm:$0xff]  }
 0x22b   :  { %3213 = vmatpush1.bf16.msra.mxu1 %v7111_v24  ;;  %v8723_v38 = vadd.f32 %v7481_v31, %v8663_v9  ;;  %v7485_v39 = vadd.f32 %v2706_v36, %v548_v22  ;;  %v7635_v9 = vld [vmem:[#allocation6 + $0xe0] ss:$16 sps:$4 sm:$0xff]   ;;  %v7661_v22 = vld [vmem:[#allocation6 + $0x164] ss:$16 sps:$4 sm:$0xff]  }
 0x22c   :  { %3225 = vmatprep.subr.bf16.mxu1 %v7120_v27  ;;  %v8726_v34 = vmul.f32 0.70710677, %v8720_v30  ;;  %v8729_v43 = vadd.f32 %v7483_v35, %v8665_v14  ;;  %v7643_v14 = vld [vmem:[#allocation6 + $0x104] ss:$16 sps:$4 sm:$0xff]   ;;  %v7659_v31 = vld [vmem:[#allocation6 + $0x160] ss:$16 sps:$4 sm:$0xff]  }
 0x22d   :  { %v8732_v7 = vmul.f32 0.70710677, %v8723_v38  ;;  %v8735_v44 = vadd.f32 %v7485_v39, %v8667_v18  ;;  %5279 = vmatpush1.bf16.msra.mxu0 %v7629_v33  ;;  %v7646_v39 = vld [vmem:[#allocation6 + $0x6c] ss:$16 sps:$4 sm:$0xff]  }
 0x22e   :  { %3215 = vmatmul.mubr.bf16.vlgmr.msra.gmra.mrb[12].mxu1 %v8701_v49  ;;  %v3300_v45 = vand.u32 2147483647, %v8726_v34  ;;  %v8740_v42 = vmul.f32 0.70710677, %v8729_v43  ;;  %5280 = vmatprep.subr.bf16.mxu0 %v7637_v41  ;;  %vm3620_vm1 = vcmp.lt.f32.partialorder %v8726_v34, 0.0 }
 0x22f   :  { %3226 = vmatpush1.bf16.msra.mxu1 %v7119_v37  ;;  %3257 = vmatprep.mubr.bf16.mxu1 %v8461_v0  ;;  %v3301_v47 = vand.u32 2147483647, %v8732_v7  ;;  %v8745_v48 = vmul.f32 0.70710677, %v8735_v44  ;;  %vm3621_vm3 = vcmp.lt.f32.partialorder %v8732_v7, 0.0 }
 0x230   :  { %5438 = vmatprep.subr.bf16.mxu1 %v7628_v40  ;;  %v3316_v18 = vmul.f32 0.3275911, %v3300_v45  ;;  %v3308_v49 = vand.u32 2147483647, %v8740_v42  ;;  %v3524_v61 = vmul.f32 %v3300_v45, %v3300_v45  ;;  %vm3628_vm2 = vcmp.lt.f32.partialorder %v8740_v42, 0.0 }
 0x231   :  { %v3309_v51 = vand.u32 2147483647, %v8745_v48  ;;  %5281 = vmatpush1.bf16.msra.mxu0 %v7635_v9  ;;  %v3317_v0 = vmul.f32 0.3275911, %v3301_v47  ;;  %v8757_v10 = vmul.f32 %v3301_v47, %v3301_v47  ;;  %vm3629_vm4 = vcmp.lt.f32.partialorder %v8745_v48, 0.0 }
 0x232   :  { %v3332_v46 = vadd.f32 1.0, %v3316_v18  ;;  %v3324_v54 = vmul.f32 0.3275911, %v3308_v49  ;;  %5282 = vmatprep.subr.bf16.mxu0 %v7643_v14  ;;  %v3540_v11 = vsub.f32 0.0, %v3524_v61  ;;  %v3532_v35 = vmul.f32 %v3308_v49, %v3308_v49 }
 0x233   :  { %v3325_v56 = vmul.f32 0.3275911, %v3309_v51  ;;  %v3333_v62 = vadd.f32 1.0, %v3317_v0  ;;  %v3541_v33 = vsub.f32 0.0, %v8757_v10  ;;  %v3533_v9 = vmul.f32 %v3309_v51, %v3309_v51  ;;  %v7673_v51 = vld [vmem:[#allocation6 + $0x1a4] ss:$16 sps:$4 sm:$0xff]  }
 0x234   :  { %8136 = vrcp.f32 %v3332_v46  ;;  %v3340_v58 = vadd.f32 1.0, %v3324_v54  ;;  %v3556_v41 = vmul.f32 1.442695, %v3540_v11  ;;  %v7644_v54 = vld [vmem:[#allocation6 + $0x68] ss:$16 sps:$4 sm:$0xff]  }
 0x235   :  { %5283 = vmatpush1.bf16.msra.mxu0 %v7641_v52  ;;  %v3341_v4 = vadd.f32 1.0, %v3325_v56  ;;  %v7665_v52 = vld [vmem:[#allocation6 + $0x180] ss:$16 sps:$4 sm:$0xff]  }
 0x236   :  { %5284 = vmatprep.subr.bf16.mxu0 %v7649_v53  ;;  %8138 = vrcp.f32 %v3340_v58 }
 0x237   :  { %8140 = vrcp.f32 %v3333_v62  ;;  %v7652_v62 = vld [vmem:[#allocation6 + $0x8c] ss:$16 sps:$4 sm:$0xff]  }
 0x238   :  { %8142 = vrcp.f32 %v3341_v4 }
 0x239   :  { %v2915_v8 = vpop.f32.mrb[4].mxu1  ;;  %5285 = vmatpush1.bf16.msra.mxu0 %v7647_v60 }
 0x23a   :  { %v8759_v13 = vadd.f32 %v2915_v8, %v552_v59  ;;  %7124 = vmatmul.mubr.msk.bf16.vlgmr.msra.gmra.mrb[12].mxu1 %vm2576_vm0, %v8259_v15  ;;  %v2917_v16 = vpop.f32.mrb[5].mxu1  ;;  %5286 = vmatprep.subr.bf16.mxu0 %v7655_v3  ;;  %v3558_v15 = vmul.f32 1.442695, %v3541_v33 }
 0x23b   :  { %5439 = vmatpush1.bf16.msra.mxu1 %v7626_v63  ;;  %v8765_v19 = vadd.f32 %v2917_v16, %v556_v2  ;;  %v2919_v20 = vpop.f32.mrb[6].mxu1 }
 0x23c   :  { %v8768_v23 = vmul.f32 0.70710677, %v8759_v13  ;;  %v8770_v24 = vadd.f32 %v2919_v20, %v552_v59  ;;  %v2921_v25 = vpop.f32.mrb[7].mxu1  ;;  %5440 = vmatprep.subr.bf16.mxu1 %v7634_v5  ;;  %v3548_v59 = vsub.f32 0.0, %v3532_v35 }
 0x23d   :  { %v8773_v27 = vmul.f32 0.70710677, %v8765_v19  ;;  %v8775_v28 = vadd.f32 %v2921_v25, %v556_v2  ;;  %5287 = vmatpush1.bf16.msra.mxu0 %v7653_v17  ;;  %v3549_v2 = vsub.f32 0.0, %v3533_v9  ;;  %v7671_v17 = vld [vmem:[#allocation6 + $0x1a0] ss:$16 sps:$4 sm:$0xff]  }
 0x23e   :  { %v3302_v36 = vand.u32 2147483647, %v8768_v23  ;;  %v8780_v37 = vmul.f32 0.70710677, %v8770_v24  ;;  %v8782_v40 = vpop.eup %8136  ;;  %5288 = vmatprep.subr.bf16.mxu0 %v7661_v22  ;;  %vm3622_vm5 = vcmp.lt.f32.partialorder %v8768_v23, 0.0 }
 0x23f   :  { %v3303_v45 = vand.u32 2147483647, %v8773_v27  ;;  %v8786_v14 = vmul.f32 0.70710677, %v8775_v28  ;;  %5441 = vmatpush1.bf16.msra.mxu1 %v7632_v21  ;;  %v3380_v47 = vmul.f32 1.0614054, %v8782_v40 }
 0x240   :  { %v3318_v18 = vmul.f32 0.3275911, %v3302_v36  ;;  %v3310_v49 = vand.u32 2147483647, %v8780_v37  ;;  %5442 = vmatprep.subr.bf16.mxu1 %v7640_v26  ;;  %v3526_v53 = vmul.f32 %v3302_v36, %v3302_v36  ;;  %v8793_v63 = vpop.eup %8138  ;;  %v7650_v26 = vld [vmem:[#allocation6 + $0x88] ss:$16 sps:$4 sm:$0xff]  }
 0x241   :  { %v3319_v46 = vmul.f32 0.3275911, %v3303_v45  ;;  %v3311_v0 = vand.u32 2147483647, %v8786_v14  ;;  %v8791_v56 = vpop.f32.mrb[8].mxu1  ;;  %5289 = vmatpush1.bf16.msra.mxu0 %v7659_v31  ;;  %v3527_v4 = vmul.f32 %v3303_v45, %v3303_v45  ;;  %v8801_v20 = vpop.eup %8140  ;;  %vm3623_vm6 = vcmp.lt.f32.partialorder %v8773_v27, 0.0 }
 0x242   :  { %v3396_v58 = vadd.f32 -1.4531521, %v3380_v47  ;;  %v3334_v60 = vadd.f32 1.0, %v3318_v18  ;;  %v3326_v61 = vmul.f32 0.3275911, %v3310_v49  ;;  %5290 = vmatprep.subr.bf16.mxu0 %v7667_v32  ;;  %v8795_v8 = vpop.f32.mrb[9].mxu1  ;;  %v3534_v25 = vmul.f32 %v3310_v49, %v3310_v49  ;;  %v8805_v32 = vpop.eup %8142 }
 0x243   :  { %v3335_v3 = vadd.f32 1.0, %v3319_v46  ;;  %v3327_v5 = vmul.f32 0.3275911, %v3311_v0  ;;  %5443 = vmatpush1.bf16.msra.mxu1 %v7638_v29  ;;  %v3388_v16 = vmul.f32 1.0614054, %v8793_v63  ;;  %v8799_v11 = vpop.f32.mrb[10].mxu1 }
 0x244   :  { %v3412_v10 = vmul.f32 %v8782_v40, %v3396_v58  ;;  %8144 = vrcp.f32 %v3334_v60  ;;  %5444 = vmatprep.subr.bf16.mxu1 %v7646_v39  ;;  %v3542_v21 = vsub.f32 0.0, %v3526_v53  ;;  %v3342_v22 = vadd.f32 1.0, %v3326_v61  ;;  %v7679_v29 = vld [vmem:[#allocation6 + $0x1c4] ss:$16 sps:$4 sm:$0xff]   ;;  %v8803_v31 = vpop.f32.mrb[11].mxu1 }
 0x245   :  { %8146 = vrcp.f32 %v3335_v3  ;;  %v3404_v35 = vadd.f32 -1.4531521, %v3388_v16  ;;  %v3343_v36 = vadd.f32 1.0, %v3327_v5  ;;  %5291 = vmatpush1.bf16.msra.mxu0 %v7665_v52  ;;  %v3572_v39 = vmul.f32 1.442695, %v3548_v59 }
 0x246   :  { %v3428_v33 = vadd.f32 1.4214138, %v3412_v10  ;;  %8148 = vpow2.f32 %v3556_v41  ;;  %v3574_v9 = vmul.f32 1.442695, %v3549_v2  ;;  %v3543_v45 = vsub.f32 0.0, %v3527_v4  ;;  %5292 = vmatprep.subr.bf16.mxu0 %v7673_v51 }
 0x247   :  { %5445 = vmatpush1.bf16.msra.mxu1 %v7644_v54  ;;  %v3420_v18 = vmul.f32 %v8793_v63, %v3404_v35  ;;  %8150 = vrcp.f32 %v3342_v22  ;;  %v7658_v49 = vld [vmem:[#allocation6 + $0xac] ss:$16 sps:$4 sm:$0xff]   ;;  %v7677_v53 = vld [vmem:[#allocation6 + $0x1c0] ss:$16 sps:$4 sm:$0xff]   ;;  %v3381_v46 = vmul.f32 1.0614054, %v8801_v20 }
 0x248   :  { %v3444_v47 = vmul.f32 %v8782_v40, %v3428_v33  ;;  %5446 = vmatprep.subr.bf16.mxu1 %v7652_v62  ;;  %v8811_v58 = vmul.f32 0.5, %v8720_v30  ;;  %v3560_v52 = vmul.f32 1.442695, %v3542_v21  ;;  %v3550_v41 = vsub.f32 0.0, %v3534_v25  ;;  %v7656_v59 = vld [vmem:[#allocation6 + $0xa8] ss:$16 sps:$4 sm:$0xff]  }
 0x249   :  { %v3389_v60 = vmul.f32 1.0614054, %v8805_v32  ;;  %v3436_v51 = vadd.f32 1.4214138, %v3420_v18  ;;  %8152 = vrcp.f32 %v3343_v36  ;;  %5293 = vmatpush1.bf16.msra.mxu0 %v7671_v17  ;;  %v3397_v61 = vadd.f32 -1.4531521, %v3381_v46 }
 0x24a   :  { %v3460_v54 = vadd.f32 -0.28449672, %v3444_v47  ;;  %8154 = vpow2.f32 %v3572_v39  ;;  %v3562_v2 = vmul.f32 1.442695, %v3543_v45  ;;  %v3535_v62 = vmul.f32 %v3311_v0, %v3311_v0  ;;  %5294 = vmatprep.subr.bf16.mxu0 %v7679_v29  ;;  %v7685_v3 = vld [vmem:[#allocation6 + $0x1e4] ss:$16 sps:$4 sm:$0xff]  }
 0x24b   :  { %5447 = vmatpush1.bf16.msra.mxu1 %v7650_v26  ;;  %v3405_v4 = vadd.f32 -1.4531521, %v3389_v60  ;;  %8156 = vpow2.f32 %v3558_v15  ;;  %v3452_v5 = vmul.f32 %v8793_v63, %v3436_v51  ;;  %v7664_v10 = vld [vmem:[#allocation6 + $0xcc] ss:$16 sps:$4 sm:$0xff]   ;;  %v7683_v16 = vld [vmem:[#allocation6 + $0x1e0] ss:$16 sps:$4 sm:$0xff]   ;;  %v3413_v21 = vmul.f32 %v8801_v20, %v3397_v61 }
 0x24c   :  { %v3476_v30 = vmul.f32 %v8782_v40, %v3460_v54  ;;  %5448 = vmatprep.subr.bf16.mxu1 %v7658_v49  ;;  %v8818_v17 = vmul.f32 0.5, %v8723_v38  ;;  %8158 = vpow2.f32 %v3574_v9  ;;  %v3576_v22 = vmul.f32 1.442695, %v3550_v41  ;;  %v7662_v0 = vld [vmem:[#allocation6 + $0xc8] ss:$16 sps:$4 sm:$0xff]  }
 0x24d   :  { %v3421_v25 = vmul.f32 %v8805_v32, %v3405_v4  ;;  %v7691_v26 = vld [vmem:[#allocation6 + $0x204] ss:$16 sps:$4 sm:$0xff]   ;;  %v3468_v15 = vadd.f32 -0.28449672, %v3452_v5  ;;  %8160 = vpow2.f32 %v3560_v52  ;;  %5295 = vmatpush1.bf16.msra.mxu0 %v7677_v53  ;;  %v3429_v35 = vadd.f32 1.4214138, %v3413_v21 }
 0x24e   :  { %v8821_v29 = vpop.eup %8144  ;;  %v3492_v33 = vadd.f32 0.2548296, %v3476_v30  ;;  %8162 = vpow2.f32 %v3562_v2  ;;  %v3551_v39 = vsub.f32 0.0, %v3535_v62  ;;  %5296 = vmatprep.subr.bf16.mxu0 %v7685_v3  ;;  %v7670_v49 = vld [vmem:[#allocation6 + $0xec] ss:$16 sps:$4 sm:$0xff]   ;;  %v8832_v52 = vmul.f32 0.5, %v8729_v43 }
 0x24f   :  { %v8823_v36 = vpop.eup %8146  ;;  %v3382_v38 = vmul.f32 1.0614054, %v8821_v29  ;;  %5449 = vmatpush1.bf16.msra.mxu1 %v7656_v59  ;;  %v3437_v9 = vadd.f32 1.4214138, %v3421_v25  ;;  %v3484_v47 = vmul.f32 %v8793_v63, %v3468_v15  ;;  %v3445_v53 = vmul.f32 %v8801_v20, %v3429_v35  ;;  %v7668_v60 = vld [vmem:[#allocation6 + $0xe8] ss:$16 sps:$4 sm:$0xff]  }
 0x250   :  { %v3508_v45 = vmul.f32 %v8782_v40, %v3492_v33  ;;  %v3383_v18 = vmul.f32 1.0614054, %v8823_v36  ;;  %5450 = vmatprep.subr.bf16.mxu1 %v7664_v10  ;;  %v8149_v46 = vpop.eup %8148  ;;  %8164 = vpow2.f32 %v3576_v22  ;;  %v3578_v43 = vmul.f32 1.442695, %v3551_v39  ;;  %v7695_v23 = vld [vmem:[#allocation6 + $0x220] ss:$16 sps:$4 sm:$0xff]  }
 0x251   :  { %v3398_v41 = vadd.f32 -1.4531521, %v3382_v38  ;;  %v3453_v59 = vmul.f32 %v8805_v32, %v3437_v9  ;;  %v8835_v54 = vpop.eup %8150  ;;  %v3500_v51 = vadd.f32 0.2548296, %v3484_v47  ;;  %5297 = vmatpush1.bf16.msra.mxu0 %v7683_v16  ;;  %v3461_v2 = vadd.f32 -0.28449672, %v3445_v53 }
 0x252   :  { %v3588_v40 = vmul.f32 %v8149_v46, %v3508_v45  ;;  %v3399_v61 = vadd.f32 -1.4531521, %v3383_v18  ;;  %v3390_v3 = vmul.f32 1.0614054, %v8835_v54  ;;  %5309 = vmatprep.subr.bf16.mxu0 %v7691_v26  ;;  %v7676_v16 = vld [vmem:[#allocation6 + $0x10c] ss:$16 sps:$4 sm:$0xff]   ;;  %8166 = vpow2.f32 %v3578_v43 }
 0x253   :  { %v3414_v62 = vmul.f32 %v8821_v29, %v3398_v41  ;;  %5451 = vmatpush1.bf16.msra.mxu1 %v7662_v0  ;;  %v3469_v4 = vadd.f32 -0.28449672, %v3453_v59  ;;  %v8840_v30 = vpop.eup %8152  ;;  %v3516_v10 = vmul.f32 %v8793_v63, %v3500_v51  ;;  %v3477_v22 = vmul.f32 %v8801_v20, %v3461_v2  ;;  %v7674_v53 = vld [vmem:[#allocation6 + $0x108] ss:$16 sps:$4 sm:$0xff]   ;;  %v7688_v43 = vld [vmem:[#allocation6 + $0x14c] ss:$16 sps:$4 sm:$0xff]  }
 0x254   :  { %v3604_v5 = vsub.f32 1.0, %v3588_v40  ;;  %v3415_v21 = vmul.f32 %v8823_v36, %v3399_v61  ;;  %5452 = vmatprep.subr.bf16.mxu1 %v7670_v49  ;;  %v8155_v25 = vpop.eup %8154  ;;  %v3406_v15 = vadd.f32 -1.4531521, %v3390_v3  ;;  %v3391_v35 = vmul.f32 1.0614054, %v8840_v30 }
 0x255   :  { %v3430_v33 = vadd.f32 1.4214138, %v3414_v62  ;;  %v3485_v0 = vmul.f32 %v8805_v32, %v3469_v4  ;;  %v8157_v38 = vpop.eup %8156  ;;  %v3596_v39 = vmul.f32 %v8155_v25, %v3516_v10  ;;  %v3493_v45 = vadd.f32 0.2548296, %v3477_v22  ;;  %v7682_v61 = vld [vmem:[#allocation6 + $0x12c] ss:$16 sps:$4 sm:$0xff]  }
 0x256   :  { %v3636_v26 = vsub.f32 0.0, %v3604_v5  ;;  %v3431_v9 = vadd.f32 1.4214138, %v3415_v21  ;;  %v8159_v47 = vpop.eup %8158  ;;  %v3422_v18 = vmul.f32 %v8835_v54, %v3406_v15  ;;  %v3407_v49 = vadd.f32 -1.4531521, %v3391_v35 }
 0x257   :  { %v3446_v63 = vmul.f32 %v8821_v29, %v3430_v33  ;;  %5453 = vmatpush1.bf16.msra.mxu1 %v7668_v60  ;;  %v3501_v46 = vadd.f32 0.2548296, %v3485_v0  ;;  %v8161_v41 = vpop.eup %8160  ;;  %v3612_v40 = vsub.f32 1.0, %v3596_v39  ;;  %v3509_v2 = vmul.f32 %v8801_v20, %v3493_v45  ;;  %v7680_v20 = vld [vmem:[#allocation6 + $0x128] ss:$16 sps:$4 sm:$0xff]  }
 0x258   :  { %v3652_v59 = vsel %vm3620_vm1, %v3636_v26, %v3604_v5  ;;  %v3447_v51 = vmul.f32 %v8823_v36, %v3431_v9  ;;  %5454 = vmatprep.subr.bf16.mxu1 %v7676_v16  ;;  %v8163_v62 = vpop.eup %8162  ;;  %v3438_v4 = vadd.f32 1.4214138, %v3422_v18  ;;  %v3423_v10 = vmul.f32 %v8840_v30, %v3407_v49  ;;  %v7703_v27 = vld [vmem:[#allocation6 + $0x244] ss:$16 sps:$4 sm:$0xff]  }
 0x259   :  { %v3462_v3 = vadd.f32 -0.28449672, %v3446_v63  ;;  %v3644_v60 = vsub.f32 0.0, %v3612_v40  ;;  %v3517_v22 = vmul.f32 %v8805_v32, %v3501_v46  ;;  %v3589_v25 = vmul.f32 %v8157_v38, %v3509_v2 }
 0x25a   :  { %v3463_v21 = vadd.f32 -0.28449672, %v3447_v51  ;;  %v8165_v34 = vpop.eup %8164  ;;  %v3668_v5 = vadd.f32 1.0, %v3652_v59  ;;  %v3454_v16 = vmul.f32 %v8835_v54, %v3438_v4  ;;  %v3439_v15 = vadd.f32 1.4214138, %v3423_v10 }
 0x25b   :  { %v3478_v33 = vmul.f32 %v8821_v29, %v3462_v3  ;;  %5455 = vmatpush1.bf16.msra.mxu1 %v7674_v53  ;;  %v3660_v35 = vsel %vm3628_vm2, %v3644_v60, %v3612_v40  ;;  %v3597_v26 = vmul.f32 %v8159_v47, %v3517_v22  ;;  %v3605_v39 = vsub.f32 1.0, %v3589_v25  ;;  %v7686_v47 = vld [vmem:[#allocation6 + $0x148] ss:$16 sps:$4 sm:$0xff]   ;;  %v7694_v3 = vld [vmem:[#allocation6 + $0x16c] ss:$16 sps:$4 sm:$0xff]  }
 0x25c   :  { %v3479_v0 = vmul.f32 %v8823_v36, %v3463_v21  ;;  %5456 = vmatprep.subr.bf16.mxu1 %v7682_v61  ;;  %v3676_v32 = vadd.f32 1.0, %v3660_v35  ;;  %v3470_v9 = vadd.f32 -0.28449672, %v3454_v16  ;;  %v3455_v45 = vmul.f32 %v8840_v30, %v3439_v15 }
 0x25d   :  { %v3494_v38 = vadd.f32 0.2548296, %v3478_v33  ;;  %v3613_v18 = vsub.f32 1.0, %v3597_v26  ;;  %v3637_v49 = vsub.f32 0.0, %v3605_v39  ;;  %v3684_v40 = vmul.f32 %v3668_v5, %v8811_v58 }
 0x25e   :  { %v3495_v63 = vadd.f32 0.2548296, %v3479_v0  ;;  %v3692_v53 = vmul.f32 %v3676_v32, %v8832_v52  ;;  %v3486_v46 = vmul.f32 %v8835_v54, %v3470_v9  ;;  %v3471_v59 = vadd.f32 -0.28449672, %v3455_v45  ;;  %v7689_v32 = vld [vmem:[#allocation6 + $0x200] ss:$16 sps:$4 sm:$0xff]  }
 0x25f   :  { %v3510_v42 = vmul.f32 %v8821_v29, %v3494_v38  ;;  %5457 = vmatpush1.bf16.msra.mxu1 %v7680_v20  ;;  %v3645_v61 = vsub.f32 0.0, %v3613_v18  ;;  %v3653_v2 = vsel %vm3621_vm3, %v3637_v49, %v3605_v39  ;;  %v3277_v60 = vmul.f32 0.5, %v8735_v44  ;;  %v7700_v20 = vld [vmem:[#allocation6 + $0x18c] ss:$16 sps:$4 sm:$0xff]   ;;  %v7698_v38 = vld [vmem:[#allocation6 + $0x188] ss:$16 sps:$4 sm:$0xff]  }
 0x260   :  { %v3511_v51 = vmul.f32 %v8823_v36, %v3495_v63  ;;  %5458 = vmatprep.subr.bf16.mxu1 %v7688_v43  ;;  %v3502_v10 = vadd.f32 0.2548296, %v3486_v46  ;;  %v3487_v52 = vmul.f32 %v8840_v30, %v3471_v59  ;;  %v3669_v29 = vadd.f32 1.0, %v3653_v2  ;;  %v8167_v36 = vpop.eup %8166  ;;  %v7706_v9 = vld [vmem:[#allocation6 + $0x1ac] ss:$16 sps:$4 sm:$0xff]  }
 0x261   :  { %v3590_v4 = vmul.f32 %v8161_v41, %v3510_v42  ;;  %v3661_v22 = vsel %vm3629_vm4, %v3645_v61, %v3613_v18  ;;  %v8874_v58 = vpack.c.bf16 %v3692_v53, %v3684_v40  ;;  %v7692_v41 = vld [vmem:[#allocation6 + $0x168] ss:$16 sps:$4 sm:$0xff]   ;;  %vm3630_vm7 = vcmp.lt.f32.partialorder %v8780_v37, 0.0  ;;  %v7712_v37 = vld [vmem:[#allocation6 + $0x1cc] ss:$16 sps:$4 sm:$0xff]  }
 0x262   :  { %v3591_v21 = vmul.f32 %v8163_v62, %v3511_v51  ;;  %v3518_v5 = vmul.f32 %v8835_v54, %v3502_v10  ;;  %v3503_v7 = vadd.f32 0.2548296, %v3487_v52  ;;  %v3677_v33 = vadd.f32 1.0, %v3661_v22  ;;  %v7704_v42 = vld [vmem:[#allocation6 + $0x1a8] ss:$16 sps:$4 sm:$0xff]  }
 0x263   :  { %v3606_v25 = vsub.f32 1.0, %v3590_v4  ;;  %5459 = vmatpush1.bf16.msra.mxu1 %v7686_v47  ;;  %v3685_v15 = vmul.f32 %v3669_v29, %v8818_v17  ;;  %v7697_v17 = vld [vmem:[#allocation6 + $0x224] ss:$16 sps:$4 sm:$0xff]   ;;  %v3270_v18 = vmul.f32 0.5, %v8759_v13  ;;  %v3278_v59 = vmul.f32 0.5, %v8770_v24 }
 0x264   :  { %v3607_v16 = vsub.f32 1.0, %v3591_v21  ;;  %5460 = vmatprep.subr.bf16.mxu1 %v7694_v3  ;;  %v3598_v62 = vmul.f32 %v8165_v34, %v3518_v5  ;;  %v3519_v48 = vmul.f32 %v8840_v30, %v3503_v7  ;;  %v3693_v35 = vmul.f32 %v3677_v33, %v3277_v60  ;;  %v7701_v4 = vld [vmem:[#allocation6 + $0x240] ss:$16 sps:$4 sm:$0xff]   ;;  %v7710_v10 = vld [vmem:[#allocation6 + $0x1c8] ss:$16 sps:$4 sm:$0xff]  }
 0x265   :  { %v3638_v44 = vsub.f32 0.0, %v3606_v25  ;;  %vm3631_vm8 = vcmp.lt.f32.partialorder %v8786_v14, 0.0  ;;  %v3271_v40 = vmul.f32 0.5, %v8765_v19  ;;  %v3279_v2 = vmul.f32 0.5, %v8775_v28  ;;  %v7709_v14 = vld [vmem:[#allocation6 + $0x264] ss:$16 sps:$4 sm:$0xff]  }
 0x266   :  { %v3639_v0 = vsub.f32 0.0, %v3607_v16  ;;  %v3614_v26 = vsub.f32 1.0, %v3598_v62  ;;  %v3599_v54 = vmul.f32 %v8167_v36, %v3519_v48  ;;  %v3701_v39 = vpack.c.bf16 %v3693_v35, %v3685_v15  ;;  %v7718_v60 = vld [vmem:[#allocation6 + $0x1ec] ss:$16 sps:$4 sm:$0xff]   ;;  %v7707_v19 = vld [vmem:[#allocation6 + $0x260] ss:$16 sps:$4 sm:$0xff]  }
 0x267   :  { %v3654_v43 = vsel %vm3622_vm5, %v3638_v44, %v3606_v25  ;;  %5461 = vmatpush1.bf16.msra.mxu1 %v7692_v41  ;;  %v7716_v22 = vld [vmem:[#allocation6 + $0x1e8] ss:$16 sps:$4 sm:$0xff]   ;;  %v7715_v28 = vld [vmem:[#allocation6 + $0x284] ss:$16 sps:$4 sm:$0xff]   ;;  %v7724_v36 = vld [vmem:[#allocation6 + $0x20c] ss:$16 sps:$4 sm:$0xff]  }
 0x268   :  { %5462 = vmatprep.subr.bf16.mxu1 %v7700_v20  ;;  %v3655_v45 = vsel %vm3623_vm6, %v3639_v0, %v3607_v16  ;;  %v3646_v34 = vsub.f32 0.0, %v3614_v26  ;;  %v3615_v63 = vsub.f32 1.0, %v3599_v54  ;;  %5298 = vmatprep.mubr.bf16.mxu0 %v3701_v39  ;;  %v3670_v30 = vadd.f32 1.0, %v3654_v43  ;;  %v7713_v25 = vld [vmem:[#allocation6 + $0x280] ss:$16 sps:$4 sm:$0xff]  }
 0x269   :  { %5470 = vmatprep.mubr.bf16.mxu1 %v3701_v39  ;;  %5299 = vmatmul.mubr.bf16.vlgmr.msra.gmra.mrb[8].mxu0 %v8874_v58  ;;  %v3671_v46 = vadd.f32 1.0, %v3655_v45  ;;  %v7722_v5 = vld [vmem:[#allocation6 + $0x208] ss:$16 sps:$4 sm:$0xff]   ;;  %v7721_v7 = vld [vmem:[#allocation6 + $0x2a4] ss:$16 sps:$4 sm:$0xff]  }
 0x26a   :  { %v3662_v49 = vsel %vm3630_vm7, %v3646_v34, %v3614_v26  ;;  %v3647_v53 = vsub.f32 0.0, %v3615_v63  ;;  %5310 = vmatpush1.bf16.msra.mxu0 %v7689_v32  ;;  %v3686_v61 = vmul.f32 %v3670_v30, %v3270_v18  ;;  %v7730_v33 = vld [vmem:[#allocation6 + $0x22c] ss:$16 sps:$4 sm:$0xff]   ;;  %v7719_v41 = vld [vmem:[#allocation6 + $0x2a0] ss:$16 sps:$4 sm:$0xff]  }
 0x26b   :  { %5463 = vmatpush1.bf16.msra.mxu1 %v7698_v38  ;;  %v3678_v47 = vadd.f32 1.0, %v3662_v49  ;;  %5311 = vmatprep.subr.bf16.mxu0 %v7697_v17  ;;  %v3687_v52 = vmul.f32 %v3671_v46, %v3271_v40  ;;  %v7728_v16 = vld [vmem:[#allocation6 + $0x228] ss:$16 sps:$4 sm:$0xff]   ;;  %v7727_v15 = vld [vmem:[#allocation6 + $0x2c4] ss:$16 sps:$4 sm:$0xff]  }
 0x26c   :  { %5464 = vmatprep.subr.bf16.mxu1 %v7706_v9  ;;  %v3663_v51 = vsel %vm3631_vm8, %v3647_v53, %v3615_v63  ;;  %v7736_v20 = vld [vmem:[#allocation6 + $0x24c] ss:$16 sps:$4 sm:$0xff]   ;;  %v7725_v44 = vld [vmem:[#allocation6 + $0x2c0] ss:$16 sps:$4 sm:$0xff]   ;;  %v7734_v62 = vld [vmem:[#allocation6 + $0x248] ss:$16 sps:$4 sm:$0xff]  }
 0x26d   :  { %v3694_v13 = vmul.f32 %v3678_v47, %v3278_v59  ;;  %v3679_v3 = vadd.f32 1.0, %v3663_v51  ;;  %v7733_v48 = vld [vmem:[#allocation6 + $0x2e4] ss:$16 sps:$4 sm:$0xff]   ;;  %v7742_v35 = vld [vmem:[#allocation6 + $0x26c] ss:$16 sps:$4 sm:$0xff]  }
 0x26e   :  { %5312 = vmatpush1.bf16.msra.mxu0 %v7695_v23  ;;  %v7731_v0 = vld [vmem:[#allocation6 + $0x2e0] ss:$16 sps:$4 sm:$0xff]   ;;  %v7739_v43 = vld [vmem:[#allocation6 + $0x304] ss:$16 sps:$4 sm:$0xff]   ;;  %v7748_v26 = vld [vmem:[#allocation6 + $0x28c] ss:$16 sps:$4 sm:$0xff]  }
 0x26f   :  { %5465 = vmatpush1.bf16.msra.mxu1 %v7704_v42  ;;  %v8888_v24 = vpack.c.bf16 %v3694_v13, %v3686_v61  ;;  %v3695_v29 = vmul.f32 %v3679_v3, %v3279_v2  ;;  %5313 = vmatprep.subr.bf16.mxu0 %v7703_v27  ;;  %v7737_v54 = vld [vmem:[#allocation6 + $0x300] ss:$16 sps:$4 sm:$0xff]   ;;  %v7746_v39 = vld [vmem:[#allocation6 + $0x288] ss:$16 sps:$4 sm:$0xff]   ;;  %v7745_v32 = vld [vmem:[#allocation6 + $0x324] ss:$16 sps:$4 sm:$0xff]  }
 0x270   :  { %5466 = vmatprep.subr.bf16.mxu1 %v7712_v37  ;;  %v7754_v38 = vld [vmem:[#allocation6 + $0x2ac] ss:$16 sps:$4 sm:$0xff]   ;;  %v7743_v17 = vld [vmem:[#allocation6 + $0x320] ss:$16 sps:$4 sm:$0xff]   ;;  %v7752_v9 = vld [vmem:[#allocation6 + $0x2a8] ss:$16 sps:$4 sm:$0xff]  }
 0x271   :  { %v3703_v21 = vpack.c.bf16 %v3695_v29, %v3687_v52  ;;  %v7751_v45 = vld [vmem:[#allocation6 + $0x344] ss:$16 sps:$4 sm:$0xff]   ;;  %v7760_v34 = vld [vmem:[#allocation6 + $0x2cc] ss:$16 sps:$4 sm:$0xff]   ;;  %v7749_v63 = vld [vmem:[#allocation6 + $0x340] ss:$16 sps:$4 sm:$0xff]  }
 0x272   :  { %5314 = vmatpush1.bf16.msra.mxu0 %v7701_v4  ;;  %v7758_v30 = vld [vmem:[#allocation6 + $0x2c8] ss:$16 sps:$4 sm:$0xff]   ;;  %v7757_v23 = vld [vmem:[#allocation6 + $0x364] ss:$16 sps:$4 sm:$0xff]   ;;  %v7766_v18 = vld [vmem:[#allocation6 + $0x2ec] ss:$16 sps:$4 sm:$0xff]  }
 0x273   :  { %5467 = vmatpush1.bf16.msra.mxu1 %v7710_v10  ;;  %5315 = vmatprep.subr.bf16.mxu0 %v7709_v14  ;;  %v7755_v49 = vld [vmem:[#allocation6 + $0x360] ss:$16 sps:$4 sm:$0xff]   ;;  %v7764_v53 = vld [vmem:[#allocation6 + $0x2e8] ss:$16 sps:$4 sm:$0xff]   ;;  %v7763_v27 = vld [vmem:[#allocation6 + $0x384] ss:$16 sps:$4 sm:$0xff]  }
 0x274   :  { %5341 = vmatprep.mubr.bf16.mxu0 %v3703_v21  ;;  %5468 = vmatprep.subr.bf16.mxu1 %v7718_v60  ;;  %v7772_v42 = vld [vmem:[#allocation6 + $0x30c] ss:$16 sps:$4 sm:$0xff]   ;;  %v7761_v46 = vld [vmem:[#allocation6 + $0x380] ss:$16 sps:$4 sm:$0xff]   ;;  %v7770_v59 = vld [vmem:[#allocation6 + $0x308] ss:$16 sps:$4 sm:$0xff]  }
 0x275   :  { %v7769_v47 = vld [vmem:[#allocation6 + $0x3a4] ss:$16 sps:$4 sm:$0xff]   ;;  %v7778_v37 = vld [vmem:[#allocation6 + $0x32c] ss:$16 sps:$4 sm:$0xff]   ;;  %v7767_v40 = vld [vmem:[#allocation6 + $0x3a0] ss:$16 sps:$4 sm:$0xff]  }
 0x276   :  { %5316 = vmatpush1.bf16.msra.mxu0 %v7707_v19  ;;  %v7776_v51 = vld [vmem:[#allocation6 + $0x328] ss:$16 sps:$4 sm:$0xff]   ;;  %v7775_v61 = vld [vmem:[#allocation6 + $0x3c4] ss:$16 sps:$4 sm:$0xff]   ;;  %v7784_v13 = vld [vmem:[#allocation6 + $0x34c] ss:$16 sps:$4 sm:$0xff]  }
 0x277   :  { %5469 = vmatpush1.bf16.msra.mxu1 %v7716_v22  ;;  %5317 = vmatprep.subr.bf16.mxu0 %v7715_v28  ;;  %v7773_v2 = vld [vmem:[#allocation6 + $0x3c0] ss:$16 sps:$4 sm:$0xff]   ;;  %v7782_v3 = vld [vmem:[#allocation6 + $0x348] ss:$16 sps:$4 sm:$0xff]   ;;  %v7781_v4 = vld [vmem:[#allocation6 + $0x3e4] ss:$16 sps:$4 sm:$0xff]  }
 0x278   :  { %5481 = vmatprep.subr.bf16.mxu1 %v7724_v36  ;;  %v7787_v10 = vld [vmem:[#allocation6 + $0x36c] ss:$16 sps:$4 sm:$0xff]   ;;  %v7779_v52 = vld [vmem:[#allocation6 + $0x3e0] ss:$16 sps:$4 sm:$0xff]   ;;  %v7785_v29 = vld [vmem:[#allocation6 + $0x368] ss:$16 sps:$4 sm:$0xff]  }
 0x279   :  { %v7790_v14 = vld [vmem:[#allocation6 + $0x38c] ss:$16 sps:$4 sm:$0xff]   ;;  %v7802_v60 = vld [vmem:[#allocation6 + $0x404] ss:$16 sps:$4 sm:$0xff]   ;;  %v7800_v19 = vld [vmem:[#allocation6 + $0x400] ss:$16 sps:$4 sm:$0xff]  }
 0x27a   :  { %5471 = vmatmul.mubr.bf16.vlgmr.msra.gmra.mrb[16].mxu1 %v8874_v58  ;;  %5318 = vmatpush1.bf16.msra.mxu0 %v7713_v25  ;;  %v7740_v58 = vld [vmem:[#allocation6 + $0x268] ss:$16 sps:$4 sm:$0xff]   ;;  %v7793_v22 = vld [vmem:[#allocation6 + $0x3ac] ss:$16 sps:$4 sm:$0xff]   ;;  %v7808_v28 = vld [vmem:[#allocation6 + $0x424] ss:$16 sps:$4 sm:$0xff]  }
 0x27b   :  { %5482 = vmatpush1.bf16.msra.mxu1 %v7722_v5  ;;  %5319 = vmatprep.subr.bf16.mxu0 %v7721_v7  ;;  %v7791_v36 = vld [vmem:[#allocation6 + $0x3a8] ss:$16 sps:$4 sm:$0xff]   ;;  %v7806_v25 = vld [vmem:[#allocation6 + $0x420] ss:$16 sps:$4 sm:$0xff]   ;;  %v7796_v5 = vld [vmem:[#allocation6 + $0x3cc] ss:$16 sps:$4 sm:$0xff]  }
 0x27c   :  { %5513 = vmatprep.mubr.bf16.mxu1 %v3703_v21  ;;  %5483 = vmatprep.subr.bf16.mxu1 %v7730_v33  ;;  %v7788_v21 = vld [vmem:[#allocation6 + $0x388] ss:$16 sps:$4 sm:$0xff]   ;;  %v7814_v7 = vld [vmem:[#allocation6 + $0x444] ss:$16 sps:$4 sm:$0xff]  }
 0x27d   :  { %v7794_v33 = vld [vmem:[#allocation6 + $0x3c8] ss:$16 sps:$4 sm:$0xff]  }
 0x27e   :  { %5320 = vmatpush1.bf16.msra.mxu0 %v7719_v41  ;;  %v7812_v41 = vld [vmem:[#allocation6 + $0x440] ss:$16 sps:$4 sm:$0xff]  }
 0x27f   :  { %5484 = vmatpush1.bf16.msra.mxu1 %v7728_v16  ;;  %5321 = vmatprep.subr.bf16.mxu0 %v7727_v15  ;;  %v7799_v16 = vld [vmem:[#allocation6 + $0x3ec] ss:$16 sps:$4 sm:$0xff]   ;;  %v7820_v15 = vld [vmem:[#allocation6 + $0x464] ss:$16 sps:$4 sm:$0xff]  }
 0x280   :  { %5485 = vmatprep.subr.bf16.mxu1 %v7736_v20  ;;  %v7797_v20 = vld [vmem:[#allocation6 + $0x3e8] ss:$16 sps:$4 sm:$0xff]  }
 0x282   :  { %5322 = vmatpush1.bf16.msra.mxu0 %v7725_v44  ;;  %v7818_v44 = vld [vmem:[#allocation6 + $0x460] ss:$16 sps:$4 sm:$0xff]  }
 0x283   :  { %5486 = vmatpush1.bf16.msra.mxu1 %v7734_v62  ;;  %5323 = vmatprep.subr.bf16.mxu0 %v7733_v48  ;;  %v7805_v62 = vld [vmem:[#allocation6 + $0x40c] ss:$16 sps:$4 sm:$0xff]   ;;  %v7826_v48 = vld [vmem:[#allocation6 + $0x484] ss:$16 sps:$4 sm:$0xff]  }
 0x284   :  { %5487 = vmatprep.subr.bf16.mxu1 %v7742_v35  ;;  %v7803_v35 = vld [vmem:[#allocation6 + $0x408] ss:$16 sps:$4 sm:$0xff]  }
 0x286   :  { %5324 = vmatpush1.bf16.msra.mxu0 %v7731_v0  ;;  %v7824_v0 = vld [vmem:[#allocation6 + $0x480] ss:$16 sps:$4 sm:$0xff]  }
 0x287   :  { %5488 = vmatpush1.bf16.msra.mxu1 %v7740_v58  ;;  %5325 = vmatprep.subr.bf16.mxu0 %v7739_v43  ;;  %v7811_v58 = vld [vmem:[#allocation6 + $0x42c] ss:$16 sps:$4 sm:$0xff]   ;;  %v7832_v43 = vld [vmem:[#allocation6 + $0x4a4] ss:$16 sps:$4 sm:$0xff]  }
 0x288   :  { %5489 = vmatprep.subr.bf16.mxu1 %v7748_v26  ;;  %v7809_v26 = vld [vmem:[#allocation6 + $0x428] ss:$16 sps:$4 sm:$0xff]  }
 0x28a   :  { %5326 = vmatpush1.bf16.msra.mxu0 %v7737_v54  ;;  %v7830_v54 = vld [vmem:[#allocation6 + $0x4a0] ss:$16 sps:$4 sm:$0xff]  }
 0x28b   :  { %5490 = vmatpush1.bf16.msra.mxu1 %v7746_v39  ;;  %5327 = vmatprep.subr.bf16.mxu0 %v7745_v32  ;;  %v7817_v39 = vld [vmem:[#allocation6 + $0x44c] ss:$16 sps:$4 sm:$0xff]   ;;  %v7838_v32 = vld [vmem:[#allocation6 + $0x4c4] ss:$16 sps:$4 sm:$0xff]  }
 0x28c   :  { %5491 = vmatprep.subr.bf16.mxu1 %v7754_v38  ;;  %v7815_v38 = vld [vmem:[#allocation6 + $0x448] ss:$16 sps:$4 sm:$0xff]  }
 0x28e   :  { %5328 = vmatpush1.bf16.msra.mxu0 %v7743_v17  ;;  %v7836_v17 = vld [vmem:[#allocation6 + $0x4c0] ss:$16 sps:$4 sm:$0xff]  }
 0x28f   :  { %5492 = vmatpush1.bf16.msra.mxu1 %v7752_v9  ;;  %5329 = vmatprep.subr.bf16.mxu0 %v7751_v45  ;;  %v7823_v9 = vld [vmem:[#allocation6 + $0x46c] ss:$16 sps:$4 sm:$0xff]   ;;  %v7844_v45 = vld [vmem:[#allocation6 + $0x4e4] ss:$16 sps:$4 sm:$0xff]  }
 0x290   :  { %5493 = vmatprep.subr.bf16.mxu1 %v7760_v34  ;;  %v7821_v34 = vld [vmem:[#allocation6 + $0x468] ss:$16 sps:$4 sm:$0xff]  }
 0x292   :  { %5330 = vmatpush1.bf16.msra.mxu0 %v7749_v63  ;;  %v7829_v63 = vld [vmem:[#allocation6 + $0x48c] ss:$16 sps:$4 sm:$0xff]  }
 0x293   :  { %5494 = vmatpush1.bf16.msra.mxu1 %v7758_v30  ;;  %5331 = vmatprep.subr.bf16.mxu0 %v7757_v23  ;;  %v7850_v30 = vld [vmem:[#allocation6 + $0x504] ss:$16 sps:$4 sm:$0xff]   ;;  %v7827_v23 = vld [vmem:[#allocation6 + $0x488] ss:$16 sps:$4 sm:$0xff]  }
 0x294   :  { %5495 = vmatprep.subr.bf16.mxu1 %v7766_v18  ;;  %v7848_v18 = vld [vmem:[#allocation6 + $0x500] ss:$16 sps:$4 sm:$0xff]  }
 0x296   :  { %5332 = vmatpush1.bf16.msra.mxu0 %v7755_v49  ;;  %v7835_v49 = vld [vmem:[#allocation6 + $0x4ac] ss:$16 sps:$4 sm:$0xff]  }
 0x297   :  { %5496 = vmatpush1.bf16.msra.mxu1 %v7764_v53  ;;  %5333 = vmatprep.subr.bf16.mxu0 %v7763_v27  ;;  %v7856_v53 = vld [vmem:[#allocation6 + $0x524] ss:$16 sps:$4 sm:$0xff]   ;;  %v7833_v27 = vld [vmem:[#allocation6 + $0x4a8] ss:$16 sps:$4 sm:$0xff]  }
 0x298   :  { %5497 = vmatprep.subr.bf16.mxu1 %v7772_v42  ;;  %v7854_v42 = vld [vmem:[#allocation6 + $0x520] ss:$16 sps:$4 sm:$0xff]  }
 0x29a   :  { %5334 = vmatpush1.bf16.msra.mxu0 %v7761_v46  ;;  %v7841_v46 = vld [vmem:[#allocation6 + $0x4cc] ss:$16 sps:$4 sm:$0xff]  }
 0x29b   :  { %5498 = vmatpush1.bf16.msra.mxu1 %v7770_v59  ;;  %5335 = vmatprep.subr.bf16.mxu0 %v7769_v47  ;;  %v7862_v59 = vld [vmem:[#allocation6 + $0x544] ss:$16 sps:$4 sm:$0xff]   ;;  %v7839_v47 = vld [vmem:[#allocation6 + $0x4c8] ss:$16 sps:$4 sm:$0xff]  }
 0x29c   :  { %5499 = vmatprep.subr.bf16.mxu1 %v7778_v37  ;;  %v7860_v37 = vld [vmem:[#allocation6 + $0x540] ss:$16 sps:$4 sm:$0xff]  }
 0x29e   :  { %5336 = vmatpush1.bf16.msra.mxu0 %v7767_v40  ;;  %v7847_v40 = vld [vmem:[#allocation6 + $0x4ec] ss:$16 sps:$4 sm:$0xff]  }
 0x29f   :  { %5500 = vmatpush1.bf16.msra.mxu1 %v7776_v51  ;;  %5337 = vmatprep.subr.bf16.mxu0 %v7775_v61  ;;  %v7868_v51 = vld [vmem:[#allocation6 + $0x564] ss:$16 sps:$4 sm:$0xff]   ;;  %v7845_v61 = vld [vmem:[#allocation6 + $0x4e8] ss:$16 sps:$4 sm:$0xff]  }
 0x2a0   :  { %5501 = vmatprep.subr.bf16.mxu1 %v7784_v13  ;;  %v7866_v13 = vld [vmem:[#allocation6 + $0x560] ss:$16 sps:$4 sm:$0xff]  }
 0x2a2   :  { %5338 = vmatpush1.bf16.msra.mxu0 %v7773_v2  ;;  %v7853_v2 = vld [vmem:[#allocation6 + $0x50c] ss:$16 sps:$4 sm:$0xff]  }
 0x2a3   :  { %5502 = vmatpush1.bf16.msra.mxu1 %v7782_v3  ;;  %5339 = vmatprep.subr.bf16.mxu0 %v7781_v4  ;;  %v7874_v3 = vld [vmem:[#allocation6 + $0x584] ss:$16 sps:$4 sm:$0xff]   ;;  %v7851_v4 = vld [vmem:[#allocation6 + $0x508] ss:$16 sps:$4 sm:$0xff]  }
 0x2a4   :  { %5503 = vmatprep.subr.bf16.mxu1 %v7787_v10  ;;  %v7872_v10 = vld [vmem:[#allocation6 + $0x580] ss:$16 sps:$4 sm:$0xff]  }
 0x2a6   :  { %5340 = vmatpush1.bf16.msra.mxu0 %v7779_v52  ;;  %v7859_v52 = vld [vmem:[#allocation6 + $0x52c] ss:$16 sps:$4 sm:$0xff]  }
 0x2a7   :  { %5504 = vmatpush1.bf16.msra.mxu1 %v7785_v29  ;;  %5352 = vmatprep.subr.bf16.mxu0 %v7802_v60  ;;  %v7880_v29 = vld [vmem:[#allocation6 + $0x5a4] ss:$16 sps:$4 sm:$0xff]   ;;  %v7878_v60 = vld [vmem:[#allocation6 + $0x5a0] ss:$16 sps:$4 sm:$0xff]  }
 0x2a8   :  { %5505 = vmatprep.subr.bf16.mxu1 %v7790_v14  ;;  %v7857_v14 = vld [vmem:[#allocation6 + $0x528] ss:$16 sps:$4 sm:$0xff]  }
 0x2a9   :  { %5342 = vmatmul.mubr.bf16.vlgmr.msra.gmra.mrb[8].mxu0 %v8888_v24 }
 0x2aa   :  { %5353 = vmatpush1.bf16.msra.mxu0 %v7800_v19  ;;  %v7886_v19 = vld [vmem:[#allocation6 + $0x5c4] ss:$16 sps:$4 sm:$0xff]  }
 0x2ab   :  { %5506 = vmatpush1.bf16.msra.mxu1 %v7788_v21  ;;  %5354 = vmatprep.subr.bf16.mxu0 %v7808_v28  ;;  %v7865_v21 = vld [vmem:[#allocation6 + $0x54c] ss:$16 sps:$4 sm:$0xff]   ;;  %v7884_v28 = vld [vmem:[#allocation6 + $0x5c0] ss:$16 sps:$4 sm:$0xff]  }
 0x2ac   :  { %5507 = vmatprep.subr.bf16.mxu1 %v7793_v22  ;;  %v7863_v22 = vld [vmem:[#allocation6 + $0x548] ss:$16 sps:$4 sm:$0xff]  }
 0x2ae   :  { %5355 = vmatpush1.bf16.msra.mxu0 %v7806_v25  ;;  %v7892_v25 = vld [vmem:[#allocation6 + $0x5e4] ss:$16 sps:$4 sm:$0xff]  }
 0x2af   :  { %5508 = vmatpush1.bf16.msra.mxu1 %v7791_v36  ;;  %5356 = vmatprep.subr.bf16.mxu0 %v7814_v7  ;;  %v7871_v36 = vld [vmem:[#allocation6 + $0x56c] ss:$16 sps:$4 sm:$0xff]   ;;  %v563_v7 = vsub.s32 5, %v8705_v1 }
 0x2b0   :  { %5509 = vmatprep.subr.bf16.mxu1 %v7796_v5  ;;  %v559_v5 = vsub.s32 4, %v8705_v1 }
 0x2b2   :  { %5357 = vmatpush1.bf16.msra.mxu0 %v7812_v41  ;;  %v7890_v41 = vld [vmem:[#allocation6 + $0x5e0] ss:$16 sps:$4 sm:$0xff]  }
 0x2b3   :  { %5510 = vmatpush1.bf16.msra.mxu1 %v7794_v33  ;;  %5358 = vmatprep.subr.bf16.mxu0 %v7820_v15  ;;  %v7869_v33 = vld [vmem:[#allocation6 + $0x568] ss:$16 sps:$4 sm:$0xff]   ;;  %v7898_v15 = vld [vmem:[#allocation6 + $0x604] ss:$16 sps:$4 sm:$0xff]  }
 0x2b4   :  { %5511 = vmatprep.subr.bf16.mxu1 %v7799_v16  ;;  %v7877_v16 = vld [vmem:[#allocation6 + $0x58c] ss:$16 sps:$4 sm:$0xff]  }
 0x2b6   :  { %5359 = vmatpush1.bf16.msra.mxu0 %v7818_v44 }
 0x2b7   :  { %5512 = vmatpush1.bf16.msra.mxu1 %v7797_v20  ;;  %5360 = vmatprep.subr.bf16.mxu0 %v7826_v48  ;;  %v8895_v20 = vld [vmem:[#allocation4] sm:$0xff] }
 0x2b8   :  { %5524 = vmatprep.subr.bf16.mxu1 %v7805_v62  ;;  %v560_v44 = vrot.slane %v8895_v20, %v559_v5  ;;  %v564_v62 = vrot.slane %v8895_v20, %v563_v7  ;;  %v7875_v48 = vld [vmem:[#allocation6 + $0x588] ss:$16 sps:$4 sm:$0xff]  }
 0x2ba   :  { %5514 = vmatmul.mubr.bf16.vlgmr.msra.gmra.mrb[16].mxu1 %v8888_v24  ;;  %5361 = vmatpush1.bf16.msra.mxu0 %v7824_v0  ;;  %v7842_v24 = vld [vmem:[#allocation6 + $0x4e0] ss:$16 sps:$4 sm:$0xff]   ;;  %v7883_v0 = vld [vmem:[#allocation6 + $0x5ac] ss:$16 sps:$4 sm:$0xff]  }
 0x2bb   :  { %5525 = vmatpush1.bf16.msra.mxu1 %v7803_v35  ;;  %5362 = vmatprep.subr.bf16.mxu0 %v7832_v43 }
 0x2bc   :  { %5526 = vmatprep.subr.bf16.mxu1 %v7811_v58 }
 0x2be   :  { %5363 = vmatpush1.bf16.msra.mxu0 %v7830_v54 }
 0x2bf   :  { %5527 = vmatpush1.bf16.msra.mxu1 %v7809_v26  ;;  %5364 = vmatprep.subr.bf16.mxu0 %v7838_v32 }
 0x2c0   :  { %5528 = vmatprep.subr.bf16.mxu1 %v7817_v39 }
 0x2c2   :  { %5365 = vmatpush1.bf16.msra.mxu0 %v7836_v17  ;;  %v7881_v17 = vld [vmem:[#allocation6 + $0x5a8] ss:$16 sps:$4 sm:$0xff]  }
 0x2c3   :  { %5529 = vmatpush1.bf16.msra.mxu1 %v7815_v38  ;;  %5366 = vmatprep.subr.bf16.mxu0 %v7844_v45 }
 0x2c4   :  { %5530 = vmatprep.subr.bf16.mxu1 %v7823_v9 }
 0x2c6   :  { %5367 = vmatpush1.bf16.msra.mxu0 %v7842_v24 }
 0x2c7   :  { %5531 = vmatpush1.bf16.msra.mxu1 %v7821_v34  ;;  %5368 = vmatprep.subr.bf16.mxu0 %v7850_v30  ;;  %v7889_v34 = vld [vmem:[#allocation6 + $0x5cc] ss:$16 sps:$4 sm:$0xff]  }
 0x2c8   :  { %5532 = vmatprep.subr.bf16.mxu1 %v7829_v63 }
 0x2ca   :  { %5369 = vmatpush1.bf16.msra.mxu0 %v7848_v18  ;;  %v7887_v18 = vld [vmem:[#allocation6 + $0x5c8] ss:$16 sps:$4 sm:$0xff]  }
 0x2cb   :  { %5533 = vmatpush1.bf16.msra.mxu1 %v7827_v23  ;;  %5370 = vmatprep.subr.bf16.mxu0 %v7856_v53 }
 0x2cc   :  { %5534 = vmatprep.subr.bf16.mxu1 %v7835_v49 }
 0x2ce   :  { %5371 = vmatpush1.bf16.msra.mxu0 %v7854_v42 }
 0x2cf   :  { %5535 = vmatpush1.bf16.msra.mxu1 %v7833_v27  ;;  %5372 = vmatprep.subr.bf16.mxu0 %v7862_v59 }
 0x2d0   :  { %5536 = vmatprep.subr.bf16.mxu1 %v7841_v46 }
 0x2d2   :  { %5373 = vmatpush1.bf16.msra.mxu0 %v7860_v37  ;;  %v7893_v37 = vld [vmem:[#allocation6 + $0x5e8] ss:$16 sps:$4 sm:$0xff]  }
 0x2d3   :  { %5537 = vmatpush1.bf16.msra.mxu1 %v7839_v47  ;;  %5374 = vmatprep.subr.bf16.mxu0 %v7868_v51 }
 0x2d4   :  { %5538 = vmatprep.subr.bf16.mxu1 %v7847_v40 }
 0x2d6   :  { %5375 = vmatpush1.bf16.msra.mxu0 %v7866_v13 }
 0x2d7   :  { %5539 = vmatpush1.bf16.msra.mxu1 %v7845_v61  ;;  %5376 = vmatprep.subr.bf16.mxu0 %v7874_v3  ;;  %v7901_v61 = vld [vmem:[#allocation6 + $0x60c] ss:$16 sps:$4 sm:$0xff]  }
 0x2d8   :  { %5540 = vmatprep.subr.bf16.mxu1 %v7853_v2 }
 0x2da   :  { %5377 = vmatpush1.bf16.msra.mxu0 %v7872_v10 }
 0x2db   :  { %5541 = vmatpush1.bf16.msra.mxu1 %v7851_v4  ;;  %5378 = vmatprep.subr.bf16.mxu0 %v7880_v29 }
 0x2dc   :  { %5542 = vmatprep.subr.bf16.mxu1 %v7859_v52 }
 0x2de   :  { %5379 = vmatpush1.bf16.msra.mxu0 %v7878_v60 }
 0x2df   :  { %5543 = vmatpush1.bf16.msra.mxu1 %v7857_v14  ;;  %5380 = vmatprep.subr.bf16.mxu0 %v7886_v19 }
 0x2e0   :  { %5544 = vmatprep.subr.bf16.mxu1 %v7865_v21 }
 0x2e2   :  { %5381 = vmatpush1.bf16.msra.mxu0 %v7884_v28 }
 0x2e3   :  { %5545 = vmatpush1.bf16.msra.mxu1 %v7863_v22  ;;  %5382 = vmatprep.subr.bf16.mxu0 %v7892_v25 }
 0x2e4   :  { %5546 = vmatprep.subr.bf16.mxu1 %v7871_v36 }
 0x2e6   :  { %5383 = vmatpush1.bf16.msra.mxu0 %v7890_v41 }
 0x2e7   :  { %5547 = vmatpush1.bf16.msra.mxu1 %v7869_v33  ;;  %v3044_v35 = vpop.f32.mrb[4].mxu0  ;;  %5395 = vmatprep.subr.bf16.mxu0 %v7898_v15  ;;  %v567_v15 = vsub.s32 6, %v8705_v1 }
 0x2e8   :  { %5548 = vmatprep.subr.bf16.mxu1 %v7877_v16  ;;  %v7491_v58 = vadd.f32 %v3044_v35, %v560_v44  ;;  %v3046_v43 = vpop.f32.mrb[5].mxu0 }
 0x2e9   :  { %v7493_v26 = vadd.f32 %v3046_v43, %v564_v62  ;;  %v3048_v54 = vpop.f32.mrb[6].mxu0 }
 0x2ea   :  { %v8900_v39 = vadd.f32 %v7491_v58, %v8791_v56  ;;  %v7495_v32 = vadd.f32 %v3048_v54, %v560_v44  ;;  %v3050_v38 = vpop.f32.mrb[7].mxu0  ;;  %v571_v44 = vsub.s32 7, %v8705_v1 }
 0x2eb   :  { %5549 = vmatpush1.bf16.msra.mxu1 %v7875_v48  ;;  %v8903_v9 = vadd.f32 %v7493_v26, %v8795_v8  ;;  %v7497_v45 = vadd.f32 %v3050_v38, %v564_v62  ;;  %v568_v38 = vrot.slane %v8895_v20, %v567_v15 }
 0x2ec   :  { %5550 = vmatprep.subr.bf16.mxu1 %v7883_v0  ;;  %v8906_v24 = vmul.f32 0.70710677, %v8900_v39  ;;  %v8909_v63 = vadd.f32 %v7495_v32, %v8799_v11  ;;  %v7895_v11 = vld [vmem:[#allocation6 + $0x5ec] ss:$16 sps:$4 sm:$0xff]  }
 0x2ed   :  { %v8912_v30 = vmul.f32 0.70710677, %v8903_v9  ;;  %v8915_v56 = vadd.f32 %v7497_v45, %v8803_v31  ;;  %v572_v45 = vrot.slane %v8895_v20, %v571_v44 }
 0x2ee   :  { %v3304_v23 = vand.u32 2147483647, %v8906_v24  ;;  %v8919_v8 = vmul.f32 0.70710677, %v8909_v63  ;;  %vm3624_vm9 = vcmp.lt.f32.partialorder %v8906_v24, 0.0 }
 0x2ef   :  { %5551 = vmatpush1.bf16.msra.mxu1 %v7881_v17  ;;  %v3305_v49 = vand.u32 2147483647, %v8912_v30  ;;  %v8923_v53 = vmul.f32 0.70710677, %v8915_v56  ;;  %vm3625_vm11 = vcmp.lt.f32.partialorder %v8912_v30, 0.0  ;;  %v3281_v30 = vmul.f32 0.5, %v8915_v56 }
 0x2f0   :  { %5552 = vmatprep.subr.bf16.mxu1 %v7889_v34  ;;  %v3320_v27 = vmul.f32 0.3275911, %v3304_v23  ;;  %v3312_v42 = vand.u32 2147483647, %v8919_v8  ;;  %v3528_v3 = vmul.f32 %v3304_v23, %v3304_v23  ;;  %vm3632_vm10 = vcmp.lt.f32.partialorder %v8919_v8, 0.0 }
 0x2f1   :  { %v3321_v46 = vmul.f32 0.3275911, %v3305_v49  ;;  %v3313_v31 = vand.u32 2147483647, %v8923_v53  ;;  %v3529_v62 = vmul.f32 %v3305_v49, %v3305_v49  ;;  %vm3633_vm12 = vcmp.lt.f32.partialorder %v8923_v53, 0.0 }
 0x2f2   :  { %v3336_v59 = vadd.f32 1.0, %v3320_v27  ;;  %v3328_v47 = vmul.f32 0.3275911, %v3312_v42  ;;  %v3544_v10 = vsub.f32 0.0, %v3528_v3  ;;  %v3536_v52 = vmul.f32 %v3312_v42, %v3312_v42 }
 0x2f3   :  { %5553 = vmatpush1.bf16.msra.mxu1 %v7887_v18  ;;  %v3337_v40 = vadd.f32 1.0, %v3321_v46  ;;  %v3329_v51 = vmul.f32 0.3275911, %v3313_v31  ;;  %v3537_v32 = vmul.f32 %v3313_v31, %v3313_v31  ;;  %v3545_v17 = vsub.f32 0.0, %v3529_v62 }
 0x2f4   :  { %5554 = vmatprep.subr.bf16.mxu1 %v7895_v11  ;;  %8168 = vrcp.f32 %v3336_v59  ;;  %v3344_v13 = vadd.f32 1.0, %v3328_v47  ;;  %v3564_v22 = vmul.f32 1.442695, %v3544_v10  ;;  %v3552_v28 = vsub.f32 0.0, %v3536_v52 }
 0x2f5   :  { %8170 = vrcp.f32 %v3337_v40  ;;  %v3345_v2 = vadd.f32 1.0, %v3329_v51  ;;  %v3553_v46 = vsub.f32 0.0, %v3537_v32 }
 0x2f6   :  { %8172 = vrcp.f32 %v3344_v13  ;;  %v3580_v48 = vmul.f32 1.442695, %v3552_v28 }
 0x2f7   :  { %5555 = vmatpush1.bf16.msra.mxu1 %v7893_v37  ;;  %8174 = vrcp.f32 %v3345_v2  ;;  %v3566_v37 = vmul.f32 1.442695, %v3545_v17 }
 0x2f8   :  { %5567 = vmatprep.subr.bf16.mxu1 %v7901_v61  ;;  %8176 = vpow2.f32 %v3564_v22  ;;  %v3582_v22 = vmul.f32 1.442695, %v3553_v46 }
 0x2f9   :  { %8178 = vpow2.f32 %v3580_v48 }
 0x2fa   :  { %8180 = vpow2.f32 %v3566_v37 }
 0x2fb   :  { %8182 = vpow2.f32 %v3582_v22 }
 0x2fe   :  { %v8169_v4 = vpop.eup %8168 }
 0x2ff   :  { %v8927_v29 = vpop.eup %8170  ;;  %v3384_v14 = vmul.f32 1.0614054, %v8169_v4 }
 0x300   :  { %v3385_v60 = vmul.f32 1.0614054, %v8927_v29  ;;  %v8173_v19 = vpop.eup %8172 }
 0x301   :  { %v3400_v21 = vadd.f32 -1.4531521, %v3384_v14  ;;  %v3392_v5 = vmul.f32 1.0614054, %v8173_v19  ;;  %v8930_v7 = vpop.eup %8174 }
 0x302   :  { %v3401_v36 = vadd.f32 -1.4531521, %v3385_v60  ;;  %v3393_v35 = vmul.f32 1.0614054, %v8930_v7  ;;  %v8177_v10 = vpop.eup %8176 }
 0x303   :  { %v3416_v25 = vmul.f32 %v8169_v4, %v3400_v21  ;;  %v3408_v16 = vadd.f32 -1.4531521, %v3392_v5  ;;  %v8179_v15 = vpop.eup %8178 }
 0x304   :  { %v3417_v33 = vmul.f32 %v8927_v29, %v3401_v36  ;;  %v3409_v34 = vadd.f32 -1.4531521, %v3393_v35 }
 0x305   :  { %v3432_v41 = vadd.f32 1.4214138, %v3416_v25  ;;  %v3424_v58 = vmul.f32 %v8173_v19, %v3408_v16 }
 0x306   :  { %v3433_v43 = vadd.f32 1.4214138, %v3417_v33  ;;  %v3425_v51 = vmul.f32 %v8930_v7, %v3409_v34 }
 0x307   :  { %v3448_v0 = vmul.f32 %v8169_v4, %v3432_v41  ;;  %v3440_v54 = vadd.f32 1.4214138, %v3424_v58 }
 0x308   :  { %v3449_v49 = vmul.f32 %v8927_v29, %v3433_v43  ;;  %v3441_v25 = vadd.f32 1.4214138, %v3425_v51 }
 0x309   :  { %v3464_v26 = vadd.f32 -0.28449672, %v3448_v0  ;;  %v3456_v18 = vmul.f32 %v8173_v19, %v3440_v54 }
 0x30a   :  { %v3465_v3 = vadd.f32 -0.28449672, %v3449_v49  ;;  %v3457_v54 = vmul.f32 %v8930_v7, %v3441_v25  ;;  %v3272_v49 = vmul.f32 0.5, %v8900_v39 }
 0x30b   :  { %v3480_v23 = vmul.f32 %v8169_v4, %v3464_v26  ;;  %v3472_v42 = vadd.f32 -0.28449672, %v3456_v18 }
 0x30c   :  { %v3481_v16 = vmul.f32 %v8927_v29, %v3465_v3  ;;  %v3473_v18 = vadd.f32 -0.28449672, %v3457_v54 }
 0x30d   :  { %v3259_v11 = vpop.f32.mrb[12].mxu1  ;;  %v3496_v27 = vadd.f32 0.2548296, %v3480_v23  ;;  %v3488_v20 = vmul.f32 %v8173_v19, %v3472_v42  ;;  %v3280_v42 = vmul.f32 0.5, %v8909_v63 }
 0x30e   :  { %v8939_v59 = vadd.f32 %v3259_v11, %v568_v38  ;;  %v3261_v47 = vpop.f32.mrb[13].mxu1  ;;  %v3489_v37 = vmul.f32 %v8930_v7, %v3473_v18 }
 0x30f   :  { %v8941_v31 = vadd.f32 %v3261_v47, %v572_v45  ;;  %v3263_v40 = vpop.f32.mrb[14].mxu1  ;;  %v3512_v61 = vmul.f32 %v8169_v4, %v3496_v27  ;;  %v3504_v21 = vadd.f32 0.2548296, %v3488_v20  ;;  %v8181_v27 = vpop.eup %8180 }
 0x310   :  { %v8945_v13 = vmul.f32 0.70710677, %v8939_v59  ;;  %v3265_v2 = vpop.f32.mrb[15].mxu1  ;;  %v8950_v14 = vadd.f32 %v3263_v40, %v568_v38  ;;  %v3497_v38 = vadd.f32 0.2548296, %v3481_v16  ;;  %v8183_v39 = vpop.eup %8182 }
 0x311   :  { %v8948_v52 = vmul.f32 0.70710677, %v8941_v31  ;;  %v3592_v60 = vmul.f32 %v8177_v10, %v3512_v61  ;;  %v3520_v33 = vmul.f32 %v8173_v19, %v3504_v21  ;;  %v8960_v26 = vadd.f32 %v3265_v2, %v572_v45 }
 0x312   :  { %v3306_v28 = vand.u32 2147483647, %v8945_v13  ;;  %v8955_v36 = vmul.f32 0.70710677, %v8950_v14  ;;  %v3513_v11 = vmul.f32 %v8927_v29, %v3497_v38  ;;  %v3505_v3 = vadd.f32 0.2548296, %v3489_v37 }
 0x313   :  { %v3307_v4 = vand.u32 2147483647, %v8948_v52  ;;  %v3608_v5 = vsub.f32 1.0, %v3592_v60  ;;  %v3600_v35 = vmul.f32 %v8179_v15, %v3520_v33  ;;  %v8965_v23 = vmul.f32 0.70710677, %v8960_v26 }
 0x314   :  { %v3322_v41 = vmul.f32 0.3275911, %v3306_v28  ;;  %v3314_v62 = vand.u32 2147483647, %v8955_v36  ;;  %v3530_v40 = vmul.f32 %v3306_v28, %v3306_v28  ;;  %v3593_v51 = vmul.f32 %v8181_v27, %v3513_v11  ;;  %v7896_v37 = vld [vmem:[#allocation6 + $0x600] ss:$16 sps:$4 sm:$0xff]  }
 0x315   :  { %v3323_v44 = vmul.f32 0.3275911, %v3307_v4  ;;  %v3640_v48 = vsub.f32 0.0, %v3608_v5  ;;  %v3616_v32 = vsub.f32 1.0, %v3600_v35  ;;  %v3315_v47 = vand.u32 2147483647, %v8965_v23 }
 0x316   :  { %v3338_v0 = vadd.f32 1.0, %v3322_v41  ;;  %v3330_v43 = vmul.f32 0.3275911, %v3314_v62  ;;  %v3531_v8 = vmul.f32 %v3307_v4, %v3307_v4  ;;  %v3609_v10 = vsub.f32 1.0, %v3593_v51 }
 0x317   :  { %v3339_v58 = vadd.f32 1.0, %v3323_v44  ;;  %v3656_v19 = vsel %vm3624_vm9, %v3640_v48, %v3608_v5  ;;  %v3648_v24 = vsub.f32 0.0, %v3616_v32  ;;  %v3331_v2 = vmul.f32 0.3275911, %v3315_v47 }
 0x318   :  { %8184 = vrcp.f32 %v3338_v0  ;;  %v3346_v17 = vadd.f32 1.0, %v3330_v43  ;;  %v3672_v34 = vadd.f32 1.0, %v3656_v19  ;;  %v3521_v29 = vmul.f32 %v8930_v7, %v3505_v3  ;;  %v7899_v3 = vld [vmem:[#allocation6 + $0x608] ss:$16 sps:$4 sm:$0xff]  }
 0x319   :  { %8186 = vrcp.f32 %v3339_v58  ;;  %v3664_v45 = vsel %vm3632_vm10, %v3648_v24, %v3616_v32  ;;  %v3347_v60 = vadd.f32 1.0, %v3331_v2  ;;  %v3546_v22 = vsub.f32 0.0, %v3530_v40 }
 0x31a   :  { %8188 = vrcp.f32 %v3346_v17  ;;  %v3680_v46 = vadd.f32 1.0, %v3664_v45  ;;  %v3688_v61 = vmul.f32 %v3672_v34, %v3272_v49  ;;  %v3538_v25 = vmul.f32 %v3314_v62, %v3314_v62 }
 0x31b   :  { %v3641_v5 = vsub.f32 0.0, %v3609_v10  ;;  %v3547_v4 = vsub.f32 0.0, %v3531_v8  ;;  %8190 = vrcp.f32 %v3347_v60  ;;  %v3601_v41 = vmul.f32 %v8183_v39, %v3521_v29  ;;  %v7904_v60 = vld [vmem:[#allocation6 + $0x624] ss:$16 sps:$4 sm:$0xff]   ;;  %v7907_v29 = vld [vmem:[#allocation6 + $0x62c] ss:$16 sps:$4 sm:$0xff]  }
 0x31c   :  { %v3696_v20 = vmul.f32 %v3680_v46, %v3280_v42  ;;  %v3273_v35 = vmul.f32 0.5, %v8903_v9  ;;  %v3568_v62 = vmul.f32 1.442695, %v3546_v22  ;;  %v3554_v58 = vsub.f32 0.0, %v3538_v25 }
 0x31d   :  { %v3617_v7 = vsub.f32 1.0, %v3601_v41  ;;  %v3657_v44 = vsel %vm3625_vm11, %v3641_v5, %v3609_v10  ;;  %v3570_v54 = vmul.f32 1.442695, %v3547_v4  ;;  %v3539_v18 = vmul.f32 %v3315_v47, %v3315_v47 }
 0x31e   :  { %v8973_v21 = vpack.c.bf16 %v3696_v20, %v3688_v61  ;;  %v3673_v17 = vadd.f32 1.0, %v3657_v44  ;;  %8192 = vpow2.f32 %v3568_v62  ;;  %v3584_v45 = vmul.f32 1.442695, %v3554_v58  ;;  %v7910_v62 = vld [vmem:[#allocation6 + $0x644] ss:$16 sps:$4 sm:$0xff]  }
 0x31f   :  { %v3649_v32 = vsub.f32 0.0, %v3617_v7  ;;  %8194 = vpow2.f32 %v3570_v54  ;;  %v3555_v47 = vsub.f32 0.0, %v3539_v18  ;;  %v7916_v18 = vld [vmem:[#allocation6 + $0x664] ss:$16 sps:$4 sm:$0xff]   ;;  %vm3626_vm13 = vcmp.lt.f32.partialorder %v8945_v13, 0.0 }
 0x320   :  { %v3689_v46 = vmul.f32 %v3673_v17, %v3273_v35  ;;  %8196 = vpow2.f32 %v3584_v45  ;;  %v7911_v17 = vld [vmem:[#allocation6 + $0x648] ss:$16 sps:$4 sm:$0xff]   ;;  %vm3634_vm14 = vcmp.lt.f32.partialorder %v8955_v36, 0.0  ;;  %vm3627_vm15 = vcmp.lt.f32.partialorder %v8948_v52, 0.0  ;;  %v7932_v52 = vld [vmem:[#allocation6 + $0x6c0] ss:$16 sps:$4 sm:$0xff]  }
 0x321   :  { %v3665_v9 = vsel %vm3633_vm12, %v3649_v32, %v3617_v7  ;;  %v3586_v4 = vmul.f32 1.442695, %v3555_v47  ;;  %v7905_v7 = vld [vmem:[#allocation6 + $0x628] ss:$16 sps:$4 sm:$0xff]   ;;  %vm3635_vm0 = vcmp.lt.f32.partialorder %v8965_v23, 0.0 }
 0x322   :  { %v8975_v63 = vpop.eup %8184  ;;  %v3681_v11 = vadd.f32 1.0, %v3665_v9  ;;  %v7919_v9 = vld [vmem:[#allocation6 + $0x66c] ss:$16 sps:$4 sm:$0xff]   ;;  %v7941_v23 = vld [vmem:[#allocation6 + $0x6e8] ss:$16 sps:$4 sm:$0xff]  }
 0x323   :  { %v8977_v33 = vpop.eup %8186  ;;  %v3386_v28 = vmul.f32 1.0614054, %v8975_v63  ;;  %8198 = vpow2.f32 %v3586_v4 }
 0x324   :  { %v3387_v16 = vmul.f32 1.0614054, %v8977_v33  ;;  %v8982_v48 = vpop.eup %8188  ;;  %v3697_v53 = vmul.f32 %v3681_v11, %v3281_v30 }
 0x325   :  { %v3402_v15 = vadd.f32 -1.4531521, %v3386_v28  ;;  %v3394_v19 = vmul.f32 1.0614054, %v8982_v48  ;;  %v8993_v40 = vpop.eup %8190 }
 0x326   :  { %v3403_v0 = vadd.f32 -1.4531521, %v3387_v16  ;;  %v3395_v20 = vmul.f32 1.0614054, %v8993_v40  ;;  %v3705_v2 = vpack.c.bf16 %v3697_v53, %v3689_v46  ;;  %v7917_v46 = vld [vmem:[#allocation6 + $0x668] ss:$16 sps:$4 sm:$0xff]  }
 0x327   :  { %v3418_v43 = vmul.f32 %v8975_v63, %v3402_v15  ;;  %v3410_v34 = vadd.f32 -1.4531521, %v3394_v19  ;;  %v7902_v15 = vld [vmem:[#allocation6 + $0x620] ss:$16 sps:$4 sm:$0xff]  }
 0x328   :  { %v3419_v38 = vmul.f32 %v8977_v33, %v3403_v0  ;;  %v3411_v25 = vadd.f32 -1.4531521, %v3395_v20  ;;  %5384 = vmatprep.mubr.bf16.mxu0 %v3705_v2  ;;  %5556 = vmatprep.mubr.bf16.mxu1 %v3705_v2  ;;  %v7913_v0 = vld [vmem:[#allocation6 + $0x64c] ss:$16 sps:$4 sm:$0xff]   ;;  %v8193_v58 = vpop.eup %8192 }
 0x329   :  { %v3434_v24 = vadd.f32 1.4214138, %v3418_v43  ;;  %v3426_v42 = vmul.f32 %v8982_v48, %v3410_v34  ;;  %5385 = vmatmul.mubr.bf16.vlgmr.msra.gmra.mrb[8].mxu0 %v8973_v21  ;;  %5557 = vmatmul.mubr.bf16.vlgmr.msra.gmra.mrb[16].mxu1 %v8973_v21  ;;  %v8195_v21 = vpop.eup %8194 }
 0x32a   :  { %v3435_v49 = vadd.f32 1.4214138, %v3419_v38  ;;  %v3427_v16 = vmul.f32 %v8993_v40, %v3411_v25  ;;  %5396 = vmatpush1.bf16.msra.mxu0 %v7896_v37  ;;  %5568 = vmatpush1.bf16.msra.mxu1 %v7899_v3  ;;  %v7923_v3 = vld [vmem:[#allocation6 + $0x688] ss:$16 sps:$4 sm:$0xff]   ;;  %v3282_v25 = vmul.f32 0.5, %v8950_v14 }
 0x32b   :  { %v3450_v27 = vmul.f32 %v8975_v63, %v3434_v24  ;;  %v3442_v51 = vadd.f32 1.4214138, %v3426_v42  ;;  %5397 = vmatprep.subr.bf16.mxu0 %v7904_v60  ;;  %5569 = vmatprep.subr.bf16.mxu1 %v7907_v29  ;;  %v7928_v60 = vld [vmem:[#allocation6 + $0x6a4] ss:$16 sps:$4 sm:$0xff]   ;;  %v7931_v29 = vld [vmem:[#allocation6 + $0x6ac] ss:$16 sps:$4 sm:$0xff]  }
 0x32c   :  { %v3451_v56 = vmul.f32 %v8977_v33, %v3435_v49  ;;  %v3443_v54 = vadd.f32 1.4214138, %v3427_v16  ;;  %v7926_v16 = vld [vmem:[#allocation6 + $0x6a0] ss:$16 sps:$4 sm:$0xff]  }
 0x32d   :  { %v3466_v8 = vadd.f32 -0.28449672, %v3450_v27  ;;  %v3458_v10 = vmul.f32 %v8982_v48, %v3442_v51 }
 0x32e   :  { %v3467_v61 = vadd.f32 -0.28449672, %v3451_v56  ;;  %v3459_v38 = vmul.f32 %v8993_v40, %v3443_v54  ;;  %5398 = vmatpush1.bf16.msra.mxu0 %v7902_v15  ;;  %5570 = vmatpush1.bf16.msra.mxu1 %v7905_v7  ;;  %v7914_v56 = vld [vmem:[#allocation6 + $0x660] ss:$16 sps:$4 sm:$0xff]   ;;  %v7929_v15 = vld [vmem:[#allocation6 + $0x6a8] ss:$16 sps:$4 sm:$0xff]  }
 0x32f   :  { %v3482_v39 = vmul.f32 %v8975_v63, %v3466_v8  ;;  %v3474_v28 = vadd.f32 -0.28449672, %v3458_v10  ;;  %5399 = vmatprep.subr.bf16.mxu0 %v7910_v62  ;;  %5571 = vmatprep.subr.bf16.mxu1 %v7913_v0  ;;  %v7925_v8 = vld [vmem:[#allocation6 + $0x68c] ss:$16 sps:$4 sm:$0xff]   ;;  %v7934_v7 = vld [vmem:[#allocation6 + $0x6c4] ss:$16 sps:$4 sm:$0xff]  }
 0x330   :  { %v3483_v22 = vmul.f32 %v8977_v33, %v3467_v61  ;;  %v3475_v49 = vadd.f32 -0.28449672, %v3459_v38  ;;  %v7920_v61 = vld [vmem:[#allocation6 + $0x680] ss:$16 sps:$4 sm:$0xff]   ;;  %v7935_v0 = vld [vmem:[#allocation6 + $0x6c8] ss:$16 sps:$4 sm:$0xff]  }
 0x331   :  { %v3498_v5 = vadd.f32 0.2548296, %v3482_v39  ;;  %v3490_v35 = vmul.f32 %v8982_v48, %v3474_v28  ;;  %v3283_v54 = vmul.f32 0.5, %v8960_v26  ;;  %v7938_v38 = vld [vmem:[#allocation6 + $0x6e0] ss:$16 sps:$4 sm:$0xff]  }
 0x332   :  { %v3499_v41 = vadd.f32 0.2548296, %v3483_v22  ;;  %v3491_v42 = vmul.f32 %v8993_v40, %v3475_v49  ;;  %5572 = vmatpush1.bf16.msra.mxu1 %v7911_v17  ;;  %v3274_v22 = vmul.f32 0.5, %v8939_v59  ;;  %v7949_v17 = vld [vmem:[#allocation6 + $0x70c] ss:$16 sps:$4 sm:$0xff]  }
 0x333   :  { %v3514_v44 = vmul.f32 %v8975_v63, %v3498_v5  ;;  %v3506_v32 = vadd.f32 0.2548296, %v3490_v35  ;;  %v7908_v63 = vld [vmem:[#allocation6 + $0x640] ss:$16 sps:$4 sm:$0xff]   ;;  %5573 = vmatprep.subr.bf16.mxu1 %v7919_v9  ;;  %v7947_v26 = vld [vmem:[#allocation6 + $0x708] ss:$16 sps:$4 sm:$0xff]  }
 0x334   :  { %v3515_v43 = vmul.f32 %v8977_v33, %v3499_v41  ;;  %v8197_v33 = vpop.eup %8196  ;;  %5400 = vmatpush1.bf16.msra.mxu0 %v7908_v63  ;;  %v3507_v51 = vadd.f32 0.2548296, %v3491_v42  ;;  %v7946_v63 = vld [vmem:[#allocation6 + $0x704] ss:$16 sps:$4 sm:$0xff]   ;;  %v7950_v9 = vld [vmem:[#allocation6 + $0x720] ss:$16 sps:$4 sm:$0xff]  }
 0x335   :  { %v3594_v19 = vmul.f32 %v8193_v58, %v3514_v44  ;;  %v3522_v34 = vmul.f32 %v8982_v48, %v3506_v32  ;;  %5401 = vmatprep.subr.bf16.mxu0 %v7916_v18  ;;  %v7922_v48 = vld [vmem:[#allocation6 + $0x684] ss:$16 sps:$4 sm:$0xff]   ;;  %v8199_v39 = vpop.eup %8198  ;;  %v7937_v44 = vld [vmem:[#allocation6 + $0x6cc] ss:$16 sps:$4 sm:$0xff]  }
 0x336   :  { %v3595_v30 = vmul.f32 %v8195_v21, %v3515_v43  ;;  %v3523_v13 = vmul.f32 %v8993_v40, %v3507_v51  ;;  %5574 = vmatpush1.bf16.msra.mxu1 %v7917_v46  ;;  %v7940_v58 = vld [vmem:[#allocation6 + $0x6e4] ss:$16 sps:$4 sm:$0xff]   ;;  %v3275_v43 = vmul.f32 0.5, %v8941_v31  ;;  %v7944_v31 = vld [vmem:[#allocation6 + $0x700] ss:$16 sps:$4 sm:$0xff]  }
 0x337   :  { %v3610_v24 = vsub.f32 1.0, %v3594_v19  ;;  %v3602_v11 = vmul.f32 %v8197_v33, %v3522_v34  ;;  %5575 = vmatprep.subr.bf16.mxu1 %v7925_v8  ;;  %v7943_v19 = vld [vmem:[#allocation6 + $0x6ec] ss:$16 sps:$4 sm:$0xff]   ;;  %v7952_v34 = vld [vmem:[#allocation6 + $0x724] ss:$16 sps:$4 sm:$0xff]  }
 0x338   :  { %v3611_v27 = vsub.f32 1.0, %v3595_v30  ;;  %5402 = vmatpush1.bf16.msra.mxu0 %v7914_v56  ;;  %v3603_v28 = vmul.f32 %v8199_v39, %v3523_v13  ;;  %v7955_v18 = vld [vmem:[#allocation6 + $0x72c] ss:$16 sps:$4 sm:$0xff]   ;;  %v7953_v33 = vld [vmem:[#allocation6 + $0x728] ss:$16 sps:$4 sm:$0xff]  }
 0x339   :  { %v3642_v45 = vsub.f32 0.0, %v3610_v24  ;;  %v3618_v37 = vsub.f32 1.0, %v3602_v11  ;;  %5403 = vmatprep.subr.bf16.mxu0 %v7922_v48  ;;  %v7958_v49 = vld [vmem:[#allocation6 + $0x744] ss:$16 sps:$4 sm:$0xff]   ;;  %v7956_v11 = vld [vmem:[#allocation6 + $0x740] ss:$16 sps:$4 sm:$0xff]  }
 0x33a   :  { %v3643_v2 = vsub.f32 0.0, %v3611_v27  ;;  %v3619_v41 = vsub.f32 1.0, %v3603_v28  ;;  %5576 = vmatpush1.bf16.msra.mxu1 %v7923_v3  ;;  %v7964_v42 = vld [vmem:[#allocation6 + $0x764] ss:$16 sps:$4 sm:$0xff]   ;;  %v7967_v56 = vld [vmem:[#allocation6 + $0x76c] ss:$16 sps:$4 sm:$0xff]  }
 0x33b   :  { %v3658_v53 = vsel %vm3626_vm13, %v3642_v45, %v3610_v24  ;;  %v3650_v47 = vsub.f32 0.0, %v3618_v37  ;;  %5577 = vmatprep.subr.bf16.mxu1 %v7931_v29  ;;  %v7961_v45 = vld [vmem:[#allocation6 + $0x74c] ss:$16 sps:$4 sm:$0xff]   ;;  %v7962_v46 = vld [vmem:[#allocation6 + $0x760] ss:$16 sps:$4 sm:$0xff]   ;;  %vm6700_vm13 = vcmp.lt.s32.totalorder %v8705_v1, 2 }
 0x33c   :  { %v3674_v20 = vadd.f32 1.0, %v3658_v53  ;;  %v3659_v4 = vsel %vm3627_vm15, %v3643_v2, %v3611_v27  ;;  %5404 = vmatpush1.bf16.msra.mxu0 %v7920_v61  ;;  %v3651_v59 = vsub.f32 0.0, %v3619_v41  ;;  %v7959_v27 = vld [vmem:[#allocation6 + $0x748] ss:$16 sps:$4 sm:$0xff]   ;;  %v7973_v48 = vld [vmem:[#allocation6 + $0x78c] ss:$16 sps:$4 sm:$0xff]  }
 0x33d   :  { %v3666_v10 = vsel %vm3634_vm14, %v3650_v47, %v3618_v37  ;;  %5405 = vmatprep.subr.bf16.mxu0 %v7928_v60  ;;  %v3675_v14 = vadd.f32 1.0, %v3659_v4  ;;  %v7965_v53 = vld [vmem:[#allocation6 + $0x768] ss:$16 sps:$4 sm:$0xff]   ;;  %v7970_v37 = vld [vmem:[#allocation6 + $0x784] ss:$16 sps:$4 sm:$0xff]  }
 0x33e   :  { %v3682_v5 = vadd.f32 1.0, %v3666_v10  ;;  %v3690_v36 = vmul.f32 %v3674_v20, %v3274_v22  ;;  %v3667_v62 = vsel %vm3635_vm0, %v3651_v59, %v3619_v41  ;;  %5578 = vmatpush1.bf16.msra.mxu1 %v7929_v15  ;;  %v7968_v8 = vld [vmem:[#allocation6 + $0x780] ss:$16 sps:$4 sm:$0xff]   ;;  %v7971_v51 = vld [vmem:[#allocation6 + $0x788] ss:$16 sps:$4 sm:$0xff]  }
 0x33f   :  { %v3683_v21 = vadd.f32 1.0, %v3667_v62  ;;  %5579 = vmatprep.subr.bf16.mxu1 %v7937_v44  ;;  %v3691_v32 = vmul.f32 %v3675_v14, %v3275_v43  ;;  %v7976_v47 = vld [vmem:[#allocation6 + $0x7a4] ss:$16 sps:$4 sm:$0xff]   ;;  %v7979_v61 = vld [vmem:[#allocation6 + $0x7ac] ss:$16 sps:$4 sm:$0xff]  }
 0x340   :  { %v3698_v40 = vmul.f32 %v3682_v5, %v3282_v25  ;;  %5406 = vmatpush1.bf16.msra.mxu0 %v7926_v16  ;;  %v7974_v20 = vld [vmem:[#allocation6 + $0x7a0] ss:$16 sps:$4 sm:$0xff]   ;;  %v7977_v2 = vld [vmem:[#allocation6 + $0x7a8] ss:$16 sps:$4 sm:$0xff]   ;;  %v7982_v13 = vld [vmem:[#allocation6 + $0x7c4] ss:$16 sps:$4 sm:$0xff]  }
 0x341   :  { %5407 = vmatprep.subr.bf16.mxu0 %v7934_v7  ;;  %v3699_v30 = vmul.f32 %v3683_v21, %v3283_v54  ;;  %v7985_v3 = vld [vmem:[#allocation6 + $0x7cc] ss:$16 sps:$4 sm:$0xff]   ;;  %v7980_v39 = vld [vmem:[#allocation6 + $0x7c0] ss:$16 sps:$4 sm:$0xff]   ;;  %v7983_v10 = vld [vmem:[#allocation6 + $0x7c8] ss:$16 sps:$4 sm:$0xff]  }
 0x342   :  { %v9014_v35 = vpack.c.bf16 %v3698_v40, %v3690_v36  ;;  %5580 = vmatpush1.bf16.msra.mxu1 %v7935_v0  ;;  %v7988_v60 = vld [vmem:[#allocation6 + $0x7e4] ss:$16 sps:$4 sm:$0xff]   ;;  %v7991_v29 = vld [vmem:[#allocation6 + $0x7ec] ss:$16 sps:$4 sm:$0xff]   ;;  %v7986_v22 = vld [vmem:[#allocation6 + $0x7e0] ss:$16 sps:$4 sm:$0xff]  }
 0x343   :  { %5581 = vmatprep.subr.bf16.mxu1 %v7943_v19  ;;  %v3707_v24 = vpack.c.bf16 %v3699_v30, %v3691_v32  ;;  %v7989_v25 = vld [vmem:[#allocation6 + $0x7e8] ss:$16 sps:$4 sm:$0xff]   ;;  %v7992_v28 = vld [vmem:[#allocation9] ss:$8 sps:$4 sm:$0xff]   ;;  %v7995_v4 = vld [vmem:[#allocation9 + $0x10] ss:$8 sps:$4 sm:$0xff]  }
 0x344   :  { %5408 = vmatpush1.bf16.msra.mxu0 %v7932_v52  ;;  %v7994_v5 = vld [vmem:[#allocation9 + $0x4] ss:$8 sps:$4 sm:$0xff]   ;;  %v7997_v36 = vld [vmem:[#allocation9 + $0x14] ss:$8 sps:$4 sm:$0xff]   ;;  %v7998_v41 = vld [vmem:[#allocation9 + $0x20] ss:$8 sps:$4 sm:$0xff]  }
 0x345   :  { %5409 = vmatprep.subr.bf16.mxu0 %v7940_v58  ;;  %5427 = vmatprep.mubr.bf16.mxu0 %v3707_v24  ;;  %v8000_v40 = vld [vmem:[#allocation9 + $0x24] ss:$8 sps:$4 sm:$0xff]   ;;  %v8003_v16 = vld [vmem:[#allocation9 + $0x34] ss:$8 sps:$4 sm:$0xff]   ;;  %v8001_v15 = vld [vmem:[#allocation9 + $0x30] ss:$8 sps:$4 sm:$0xff]  }
 0x346   :  { %5599 = vmatprep.mubr.bf16.mxu1 %v3707_v24  ;;  %5582 = vmatpush1.bf16.msra.mxu1 %v7941_v23  ;;  %v8006_v7 = vld [vmem:[#allocation9 + $0x44] ss:$8 sps:$4 sm:$0xff]   ;;  %v8004_v44 = vld [vmem:[#allocation9 + $0x40] ss:$8 sps:$4 sm:$0xff]   ;;  %v8009_v59 = vld [vmem:[#allocation9 + $0x54] ss:$8 sps:$4 sm:$0xff]  }
 0x347   :  { %5583 = vmatprep.subr.bf16.mxu1 %v7949_v17  ;;  %v8007_v14 = vld [vmem:[#allocation9 + $0x50] ss:$8 sps:$4 sm:$0xff]   ;;  %v8010_v62 = vld [vmem:[#allocation9 + $0x60] ss:$8 sps:$4 sm:$0xff]   ;;  %v8015_v52 = vld [vmem:[#allocation9 + $0x74] ss:$8 sps:$4 sm:$0xff]  }
 0x348   :  { %5410 = vmatpush1.bf16.msra.mxu0 %v7938_v38  ;;  %v8013_v0 = vld [vmem:[#allocation9 + $0x70] ss:$8 sps:$4 sm:$0xff]   ;;  %v8018_v58 = vld [vmem:[#allocation9 + $0x84] ss:$8 sps:$4 sm:$0xff]   ;;  %v8016_v43 = vld [vmem:[#allocation9 + $0x80] ss:$8 sps:$4 sm:$0xff]  }
 0x349   :  { %5411 = vmatprep.subr.bf16.mxu0 %v7946_v63  ;;  %v8021_v54 = vld [vmem:[#allocation9 + $0x94] ss:$8 sps:$4 sm:$0xff]   ;;  %v8019_v21 = vld [vmem:[#allocation9 + $0x90] ss:$8 sps:$4 sm:$0xff]   ;;  %v8024_v19 = vld [vmem:[#allocation9 + $0xa4] ss:$8 sps:$4 sm:$0xff]  }
 0x34a   :  { %5584 = vmatpush1.bf16.msra.mxu1 %v7947_v26  ;;  %v8022_v32 = vld [vmem:[#allocation9 + $0xa0] ss:$8 sps:$4 sm:$0xff]   ;;  %v8027_v30 = vld [vmem:[#allocation9 + $0xb4] ss:$8 sps:$4 sm:$0xff]   ;;  %v8025_v38 = vld [vmem:[#allocation9 + $0xb0] ss:$8 sps:$4 sm:$0xff]  }
 0x34b   :  { %5585 = vmatprep.subr.bf16.mxu1 %v7955_v18  ;;  %v8030_v23 = vld [vmem:[#allocation9 + $0xc4] ss:$8 sps:$4 sm:$0xff]   ;;  %v8028_v63 = vld [vmem:[#allocation9 + $0xc0] ss:$8 sps:$4 sm:$0xff]   ;;  %v8033_v17 = vld [vmem:[#allocation9 + $0xd4] ss:$8 sps:$4 sm:$0xff]  }
 0x34c   :  { %5412 = vmatpush1.bf16.msra.mxu0 %v7944_v31  ;;  %v8031_v24 = vld [vmem:[#allocation9 + $0xd0] ss:$8 sps:$4 sm:$0xff]   ;;  %v8036_v31 = vld [vmem:[#allocation9 + $0xe4] ss:$8 sps:$4 sm:$0xff]   ;;  %v8034_v26 = vld [vmem:[#allocation9 + $0xe0] ss:$8 sps:$4 sm:$0xff]  }
 0x34d   :  { %5413 = vmatprep.subr.bf16.mxu0 %v7952_v34  ;;  %v8039_v34 = vld [vmem:[#allocation9 + $0xf4] ss:$8 sps:$4 sm:$0xff]   ;;  %v8037_v18 = vld [vmem:[#allocation9 + $0xf0] ss:$8 sps:$4 sm:$0xff]  }
 0x34e   :  { %5586 = vmatpush1.bf16.msra.mxu1 %v7953_v33  ;;  %v3964_v33 = vld [vmem:[#allocation7] sm:$0xf] }
 0x34f   :  { %5587 = vmatprep.subr.bf16.mxu1 %v7961_v45  ;;  %v3977_v45 = vrot.slane %v3964_v33, %v551_v50 }
 0x350   :  { %5414 = vmatpush1.bf16.msra.mxu0 %v7950_v9  ;;  %v8042_v9 = vld [vmem:[#allocation9 + $0x104] ss:$8 sps:$4 sm:$0xff]  }
 0x351   :  { %5415 = vmatprep.subr.bf16.mxu0 %v7958_v49  ;;  %v3969_v49 = vrot.slane %v3964_v33, %v8708_v6 }
 0x352   :  { %5588 = vmatpush1.bf16.msra.mxu1 %v7959_v27  ;;  %v3981_v27 = vrot.slane %v3964_v33, %v555_v55 }
 0x353   :  { %5589 = vmatprep.subr.bf16.mxu1 %v7967_v56 }
 0x354   :  { %5416 = vmatpush1.bf16.msra.mxu0 %v7956_v11  ;;  %v3973_v11 = vrot.slane %v3964_v33, %v8713_v12 }
 0x355   :  { %5417 = vmatprep.subr.bf16.mxu0 %v7964_v42 }
 0x356   :  { %5590 = vmatpush1.bf16.msra.mxu1 %v7965_v53 }
 0x357   :  { %5591 = vmatprep.subr.bf16.mxu1 %v7973_v48 }
 0x358   :  { %5418 = vmatpush1.bf16.msra.mxu0 %v7962_v46 }
 0x359   :  { %5419 = vmatprep.subr.bf16.mxu0 %v7970_v37 }
 0x35a   :  { %5592 = vmatpush1.bf16.msra.mxu1 %v7971_v51 }
 0x35b   :  { %5593 = vmatprep.subr.bf16.mxu1 %v7979_v61 }
 0x35c   :  { %5420 = vmatpush1.bf16.msra.mxu0 %v7968_v8 }
 0x35d   :  { %5421 = vmatprep.subr.bf16.mxu0 %v7976_v47 }
 0x35e   :  { %5594 = vmatpush1.bf16.msra.mxu1 %v7977_v2 }
 0x35f   :  { %5595 = vmatprep.subr.bf16.mxu1 %v7985_v3 }
 0x360   :  { %5422 = vmatpush1.bf16.msra.mxu0 %v7974_v20 }
 0x361   :  { %5423 = vmatprep.subr.bf16.mxu0 %v7982_v13 }
 0x362   :  { %5596 = vmatpush1.bf16.msra.mxu1 %v7983_v10 }
 0x363   :  { %5597 = vmatprep.subr.bf16.mxu1 %v7991_v29 }
 0x364   :  { %5424 = vmatpush1.bf16.msra.mxu0 %v7980_v39 }
 0x365   :  { %5425 = vmatprep.subr.bf16.mxu0 %v7988_v60 }
 0x366   :  { %5598 = vmatpush1.bf16.msra.mxu1 %v7989_v25 }
 0x368   :  { %5426 = vmatpush1.bf16.msra.mxu0 %v7986_v22 }
 0x369   :  { %6226 = vmatprep.subr.bf16.mxu0 %v7994_v5  ;;  %5600 = vmatmul.mubr.bf16.vlgmr.msra.gmra.mrb[16].mxu1 %v9014_v35 }
 0x36b   :  { %5428 = vmatmul.mubr.bf16.vlgmr.msra.gmra.mrb[8].mxu0 %v9014_v35  ;;  %v8012_v35 = vld [vmem:[#allocation9 + $0x64] ss:$8 sps:$4 sm:$0xff]  }
 0x36c   :  { %6227 = vmatpush1.bf16.msra.mxu0 %v7992_v28  ;;  %v8088_v28 = vld [vmem:[#allocation12] ss:$8 sps:$4 sm:$0xff]  }
 0x36d   :  { %6228 = vmatprep.subr.bf16.mxu0 %v7997_v36 }
 0x370   :  { %6229 = vmatpush1.bf16.msra.mxu0 %v7995_v4 }
 0x371   :  { %6230 = vmatprep.subr.bf16.mxu0 %v8000_v40 }
 0x374   :  { %6231 = vmatpush1.bf16.msra.mxu0 %v7998_v41  ;;  %v8090_v41 = vld [vmem:[#allocation12 + $0x4] ss:$8 sps:$4 sm:$0xff]  }
 0x375   :  { %6232 = vmatprep.subr.bf16.mxu0 %v8003_v16  ;;  %6626 = vmatprep.subr.bf16.mxu1 %v8090_v41 }
 0x376   :  { %6627 = vmatpush1.bf16.msra.mxu1 %v8088_v28 }
 0x378   :  { %6233 = vmatpush1.bf16.msra.mxu0 %v8001_v15 }
 0x379   :  { %6234 = vmatprep.subr.bf16.mxu0 %v8006_v7  ;;  %v8093_v7 = vld [vmem:[#allocation12 + $0x14] ss:$8 sps:$4 sm:$0xff]  }
 0x37a   :  { %6628 = vmatprep.subr.bf16.mxu1 %v8093_v7 }
 0x37c   :  { %6235 = vmatpush1.bf16.msra.mxu0 %v8004_v44 }
 0x37d   :  { %6236 = vmatprep.subr.bf16.mxu0 %v8009_v59  ;;  %v8091_v59 = vld [vmem:[#allocation12 + $0x10] ss:$8 sps:$4 sm:$0xff]  }
 0x37e   :  { %6629 = vmatpush1.bf16.msra.mxu1 %v8091_v59 }
 0x380   :  { %6237 = vmatpush1.bf16.msra.mxu0 %v8007_v14 }
 0x381   :  { %6238 = vmatprep.subr.bf16.mxu0 %v8012_v35 }
 0x384   :  { %6239 = vmatpush1.bf16.msra.mxu0 %v8010_v62 }
 0x385   :  { %6240 = vmatprep.subr.bf16.mxu0 %v8015_v52 }
 0x388   :  { %6241 = vmatpush1.bf16.msra.mxu0 %v8013_v0 }
 0x389   :  { %6242 = vmatprep.subr.bf16.mxu0 %v8018_v58 }
 0x38c   :  { %6243 = vmatpush1.bf16.msra.mxu0 %v8016_v43 }
 0x38d   :  { %6244 = vmatprep.subr.bf16.mxu0 %v8021_v54 }
 0x390   :  { %6245 = vmatpush1.bf16.msra.mxu0 %v8019_v21 }
 0x391   :  { %6246 = vmatprep.subr.bf16.mxu0 %v8024_v19 }
 0x394   :  { %6247 = vmatpush1.bf16.msra.mxu0 %v8022_v32 }
 0x395   :  { %6248 = vmatprep.subr.bf16.mxu0 %v8027_v30 }
 0x398   :  { %6249 = vmatpush1.bf16.msra.mxu0 %v8025_v38 }
 0x399   :  { %6250 = vmatprep.subr.bf16.mxu0 %v8030_v23 }
 0x39c   :  { %6251 = vmatpush1.bf16.msra.mxu0 %v8028_v63 }
 0x39d   :  { %6252 = vmatprep.subr.bf16.mxu0 %v8033_v17 }
 0x3a0   :  { %6253 = vmatpush1.bf16.msra.mxu0 %v8031_v24 }
 0x3a1   :  { %6254 = vmatprep.subr.bf16.mxu0 %v8036_v31 }
 0x3a4   :  { %6255 = vmatpush1.bf16.msra.mxu0 %v8034_v26 }
 0x3a5   :  { %6256 = vmatprep.subr.bf16.mxu0 %v8039_v34 }
 0x3a8   :  { %6257 = vmatpush1.bf16.msra.mxu0 %v8037_v18 }
 0x3a9   :  { %6269 = vmatprep.subr.bf16.mxu0 %v8042_v9 }
 0x43c   :  { %v5601_v56 = vpop.f32.mrb[16].mxu1 }
 0x43d   :  { %v9029_v53 = vadd.f32 %v5601_v56, %v3977_v45  ;;  %v5603_v48 = vpop.f32.mrb[17].mxu1 }
 0x43e   :  { %v5429_v42 = vpop.f32.mrb[8].mxu0  ;;  %v9033_v51 = vadd.f32 %v5603_v48, %v3981_v27  ;;  %v5605_v61 = vpop.f32.mrb[18].mxu1 }
 0x43f   :  { %v9027_v46 = vadd.f32 %v5429_v42, %v3969_v49  ;;  %v5431_v37 = vpop.f32.mrb[9].mxu0  ;;  %v9039_v20 = vmul.f32 0.70710677, %v9029_v53  ;;  %v5607_v25 = vpop.f32.mrb[19].mxu1  ;;  %v9053_v44 = vadd.f32 %v5605_v61, %v3977_v45 }
 0x440   :  { %v9031_v8 = vadd.f32 %v5431_v37, %v3973_v11  ;;  %v5433_v47 = vpop.f32.mrb[10].mxu0  ;;  %v9045_v2 = vmul.f32 0.70710677, %v9033_v51  ;;  %v9064_v43 = vadd.f32 %v5607_v25, %v3981_v27 }
 0x441   :  { %v9036_v50 = vmul.f32 0.70710677, %v9027_v46  ;;  %v5628_v3 = vand.u32 2147483647, %v9039_v20  ;;  %v5435_v22 = vpop.f32.mrb[11].mxu0  ;;  %v9051_v15 = vadd.f32 %v5433_v47, %v3969_v49  ;;  %vm5788_vm2 = vcmp.lt.f32.partialorder %v9039_v20, 0.0 }
 0x442   :  { %v9042_v55 = vmul.f32 0.70710677, %v9031_v8  ;;  %v5629_v10 = vand.u32 2147483647, %v9045_v2  ;;  %v9058_v62 = vadd.f32 %v5435_v22, %v3973_v11  ;;  %v9061_v52 = vmul.f32 0.70710677, %v9053_v44 }
 0x443   :  { %v5626_v13 = vand.u32 2147483647, %v9036_v50  ;;  %v5636_v29 = vmul.f32 0.3275911, %v5628_v3  ;;  %v9056_v35 = vmul.f32 0.70710677, %v9051_v15  ;;  %v5740_v54 = vmul.f32 %v5628_v3, %v5628_v3 }
 0x444   :  { %v5627_v39 = vand.u32 2147483647, %v9042_v55  ;;  %v5637_v40 = vmul.f32 0.3275911, %v5629_v10  ;;  %v5632_v21 = vand.u32 2147483647, %v9061_v52  ;;  %v5741_v38 = vmul.f32 %v5629_v10, %v5629_v10 }
 0x445   :  { %v5634_v60 = vmul.f32 0.3275911, %v5626_v13  ;;  %v5644_v4 = vadd.f32 1.0, %v5636_v29  ;;  %v5738_v0 = vmul.f32 %v5626_v13, %v5626_v13  ;;  %v5630_v58 = vand.u32 2147483647, %v9056_v35 }
 0x446   :  { %v5635_v5 = vmul.f32 0.3275911, %v5627_v39  ;;  %v5645_v14 = vadd.f32 1.0, %v5637_v40  ;;  %v9068_v19 = vmul.f32 0.70710677, %v9058_v62  ;;  %v5739_v32 = vmul.f32 %v5627_v39, %v5627_v39 }
 0x447   :  { %v5642_v36 = vadd.f32 1.0, %v5634_v60  ;;  %v5638_v30 = vmul.f32 0.3275911, %v5630_v58  ;;  %v5640_v23 = vmul.f32 0.3275911, %v5632_v21  ;;  %v5746_v17 = vsub.f32 0.0, %v5738_v0 }
 0x448   :  { %v5643_v16 = vadd.f32 1.0, %v5635_v5  ;;  %v5631_v63 = vand.u32 2147483647, %v9068_v19  ;;  %v9072_v31 = vmul.f32 0.70710677, %v9064_v43  ;;  %v5748_v26 = vsub.f32 0.0, %v5740_v54 }
 0x449   :  { %8200 = vrcp.f32 %v5642_v36  ;;  %v5646_v24 = vadd.f32 1.0, %v5638_v30  ;;  %v5648_v34 = vadd.f32 1.0, %v5640_v23  ;;  %v5747_v33 = vsub.f32 0.0, %v5739_v32 }
 0x44a   :  { %8202 = vrcp.f32 %v5644_v4  ;;  %v5639_v18 = vmul.f32 0.3275911, %v5631_v63  ;;  %v5742_v49 = vmul.f32 %v5630_v58, %v5630_v58  ;;  %v5633_v45 = vand.u32 2147483647, %v9072_v31 }
 0x44b   :  { %8204 = vrcp.f32 %v5643_v16  ;;  %v5749_v42 = vsub.f32 0.0, %v5741_v38  ;;  %v5754_v37 = vmul.f32 1.442695, %v5746_v17  ;;  %v5744_v47 = vmul.f32 %v5632_v21, %v5632_v21 }
 0x44c   :  { %8206 = vrcp.f32 %v5645_v14  ;;  %v5647_v56 = vadd.f32 1.0, %v5639_v18  ;;  %v5641_v61 = vmul.f32 0.3275911, %v5633_v45  ;;  %v5758_v3 = vmul.f32 1.442695, %v5748_v26 }
 0x44d   :  { %8208 = vrcp.f32 %v5646_v24  ;;  %v5750_v60 = vsub.f32 0.0, %v5742_v49  ;;  %v5756_v5 = vmul.f32 1.442695, %v5747_v33  ;;  %v5760_v28 = vmul.f32 1.442695, %v5749_v42 }
 0x44e   :  { %8210 = vrcp.f32 %v5648_v34  ;;  %v5649_v29 = vadd.f32 1.0, %v5641_v61  ;;  %v5752_v40 = vsub.f32 0.0, %v5744_v47  ;;  %v5743_v41 = vmul.f32 %v5631_v63, %v5631_v63 }
 0x44f   :  { %8212 = vrcp.f32 %v5647_v56  ;;  %v5762_v0 = vmul.f32 1.442695, %v5750_v60  ;;  %v5745_v49 = vmul.f32 %v5633_v45, %v5633_v45  ;;  %vm5786_vm1 = vcmp.lt.f32.partialorder %v9036_v50, 0.0 }
 0x450   :  { %8214 = vpow2.f32 %v5754_v37  ;;  %v5766_v38 = vmul.f32 1.442695, %v5752_v40  ;;  %v5751_v23 = vsub.f32 0.0, %v5743_v41  ;;  %vm5787_vm3 = vcmp.lt.f32.partialorder %v9042_v55, 0.0 }
 0x451   :  { %8216 = vrcp.f32 %v5649_v29  ;;  %vm5790_vm4 = vcmp.lt.f32.partialorder %v9056_v35, 0.0  ;;  %vm5792_vm5 = vcmp.lt.f32.partialorder %v9061_v52, 0.0  ;;  %vm5791_vm6 = vcmp.lt.f32.partialorder %v9068_v19, 0.0 }
 0x452   :  { %8218 = vpow2.f32 %v5758_v3  ;;  %vm5789_vm7 = vcmp.lt.f32.partialorder %v9045_v2, 0.0  ;;  %vm5793_vm8 = vcmp.lt.f32.partialorder %v9072_v31, 0.0  ;;  %v5613_v2 = vmul.f32 0.5, %v9033_v51  ;;  %v8046_v31 = vld [vmem:[#allocation9 + $0x120] ss:$8 sps:$4 sm:$0xff]  }
 0x453   :  { %v9074_v9 = vpop.eup %8200  ;;  %8220 = vpow2.f32 %v5756_v5  ;;  %v8049_v51 = vld [vmem:[#allocation9 + $0x130] ss:$8 sps:$4 sm:$0xff]  }
 0x454   :  { %v9077_v11 = vpop.eup %8202  ;;  %v5666_v27 = vmul.f32 1.0614054, %v9074_v9  ;;  %8222 = vpow2.f32 %v5760_v28  ;;  %v5753_v28 = vsub.f32 0.0, %v5745_v49 }
 0x455   :  { %v5668_v48 = vmul.f32 1.0614054, %v9077_v11  ;;  %v9081_v39 = vpop.eup %8204  ;;  %8224 = vpow2.f32 %v5762_v0 }
 0x456   :  { %v5674_v13 = vadd.f32 -1.4531521, %v5666_v27  ;;  %v5667_v25 = vmul.f32 1.0614054, %v9081_v39  ;;  %v9085_v36 = vpop.eup %8206  ;;  %8226 = vpow2.f32 %v5766_v38 }
 0x457   :  { %v5676_v10 = vadd.f32 -1.4531521, %v5668_v48  ;;  %v5669_v59 = vmul.f32 1.0614054, %v9085_v36  ;;  %v9091_v32 = vpop.eup %8208 }
 0x458   :  { %v5682_v22 = vmul.f32 %v9074_v9, %v5674_v13  ;;  %v5675_v7 = vadd.f32 -1.4531521, %v5667_v25  ;;  %v9094_v63 = vpop.eup %8210  ;;  %v5670_v34 = vmul.f32 1.0614054, %v9091_v32  ;;  %v5764_v13 = vmul.f32 1.442695, %v5751_v23 }
 0x459   :  { %v5684_v4 = vmul.f32 %v9077_v11, %v5676_v10  ;;  %v5677_v21 = vadd.f32 -1.4531521, %v5669_v59  ;;  %v5672_v33 = vmul.f32 1.0614054, %v9094_v63  ;;  %v9101_v48 = vpop.eup %8212 }
 0x45a   :  { %v5690_v16 = vadd.f32 1.4214138, %v5682_v22  ;;  %v5683_v54 = vmul.f32 %v9081_v39, %v5675_v7  ;;  %v5678_v37 = vadd.f32 -1.4531521, %v5670_v34  ;;  %v8215_v45 = vpop.eup %8214  ;;  %v5671_v5 = vmul.f32 1.0614054, %v9101_v48 }
 0x45b   :  { %v5692_v14 = vadd.f32 1.4214138, %v5684_v4  ;;  %v5685_v26 = vmul.f32 %v9085_v36, %v5677_v21  ;;  %v5680_v61 = vadd.f32 -1.4531521, %v5672_v33  ;;  %v9108_v4 = vpop.eup %8216  ;;  %8228 = vpow2.f32 %v5764_v13 }
 0x45c   :  { %v5698_v58 = vmul.f32 %v9074_v9, %v5690_v16  ;;  %v5691_v24 = vadd.f32 1.4214138, %v5683_v54  ;;  %v5686_v29 = vmul.f32 %v9091_v32, %v5678_v37  ;;  %v8219_v59 = vpop.eup %8218  ;;  %v5673_v54 = vmul.f32 1.0614054, %v9108_v4 }
 0x45d   :  { %v5700_v30 = vmul.f32 %v9077_v11, %v5692_v14  ;;  %v5693_v56 = vadd.f32 1.4214138, %v5685_v26  ;;  %v5688_v25 = vmul.f32 %v9094_v63, %v5680_v61  ;;  %v8221_v21 = vpop.eup %8220 }
 0x45e   :  { %v5706_v17 = vadd.f32 -0.28449672, %v5698_v58  ;;  %v5699_v42 = vmul.f32 %v9081_v39, %v5691_v24  ;;  %v5694_v7 = vadd.f32 1.4214138, %v5686_v29  ;;  %v5679_v58 = vadd.f32 -1.4531521, %v5671_v5  ;;  %v8223_v24 = vpop.eup %8222 }
 0x45f   :  { %v5708_v18 = vadd.f32 -0.28449672, %v5700_v30  ;;  %v5701_v60 = vmul.f32 %v9085_v36, %v5693_v56  ;;  %v5696_v0 = vadd.f32 1.4214138, %v5688_v25 }
 0x460   :  { %v5714_v27 = vmul.f32 %v9074_v9, %v5706_v17  ;;  %v5707_v10 = vadd.f32 -0.28449672, %v5699_v42  ;;  %v5702_v17 = vmul.f32 %v9091_v32, %v5694_v7  ;;  %v5687_v34 = vmul.f32 %v9101_v48, %v5679_v58 }
 0x461   :  { %v5716_v47 = vmul.f32 %v9077_v11, %v5708_v18  ;;  %v5709_v16 = vadd.f32 -0.28449672, %v5701_v60  ;;  %v5704_v26 = vmul.f32 %v9094_v63, %v5696_v0  ;;  %v5681_v18 = vadd.f32 -1.4531521, %v5673_v54 }
 0x462   :  { %v5722_v3 = vadd.f32 0.2548296, %v5714_v27  ;;  %v5715_v41 = vmul.f32 %v9081_v39, %v5707_v10  ;;  %v5710_v49 = vadd.f32 -0.28449672, %v5702_v17  ;;  %v8225_v27 = vpop.eup %8224  ;;  %v5695_v56 = vadd.f32 1.4214138, %v5687_v34 }
 0x463   :  { %v5724_v22 = vadd.f32 0.2548296, %v5716_v47  ;;  %v5717_v23 = vmul.f32 %v9085_v36, %v5709_v16  ;;  %v5712_v42 = vadd.f32 -0.28449672, %v5704_v26  ;;  %v5689_v37 = vmul.f32 %v9108_v4, %v5681_v18  ;;  %v8227_v60 = vpop.eup %8226 }
 0x464   :  { %v5730_v40 = vmul.f32 %v9074_v9, %v5722_v3  ;;  %v5723_v38 = vadd.f32 0.2548296, %v5715_v41  ;;  %v5718_v3 = vmul.f32 %v9091_v32, %v5710_v49  ;;  %v5768_v10 = vmul.f32 1.442695, %v5753_v28 }
 0x465   :  { %v5732_v14 = vmul.f32 %v9077_v11, %v5724_v22  ;;  %v5725_v33 = vadd.f32 0.2548296, %v5717_v23  ;;  %v5703_v22 = vmul.f32 %v9101_v48, %v5695_v56  ;;  %v5612_v54 = vmul.f32 0.5, %v9029_v53  ;;  %v8229_v17 = vpop.eup %8228 }
 0x466   :  { %v5770_v30 = vmul.f32 %v8215_v45, %v5730_v40  ;;  %v5731_v11 = vmul.f32 %v9081_v39, %v5723_v38  ;;  %v5720_v45 = vmul.f32 %v9094_v63, %v5712_v42  ;;  %v5697_v39 = vadd.f32 1.4214138, %v5689_v37 }
 0x467   :  { %v5772_v9 = vmul.f32 %v8219_v59, %v5732_v14  ;;  %v5733_v25 = vmul.f32 %v9085_v36, %v5725_v33  ;;  %v5726_v5 = vadd.f32 0.2548296, %v5718_v3  ;;  %v5610_v40 = vmul.f32 0.5, %v9027_v46 }
 0x468   :  { %v5778_v47 = vsub.f32 1.0, %v5770_v30  ;;  %v5771_v29 = vmul.f32 %v8221_v21, %v5731_v11  ;;  %v5728_v13 = vadd.f32 0.2548296, %v5720_v45  ;;  %v5711_v41 = vadd.f32 -0.28449672, %v5703_v22 }
 0x469   :  { %v5780_v61 = vsub.f32 1.0, %v5772_v9  ;;  %v5734_v59 = vmul.f32 %v9091_v32, %v5726_v5  ;;  %8230 = vpow2.f32 %v5768_v10  ;;  %v5705_v58 = vmul.f32 %v9108_v4, %v5697_v39 }
 0x46a   :  { %v5794_v16 = vsub.f32 0.0, %v5778_v47  ;;  %v5779_v28 = vsub.f32 1.0, %v5771_v29  ;;  %v5736_v14 = vmul.f32 %v9094_v63, %v5728_v13  ;;  %v5719_v0 = vmul.f32 %v9101_v48, %v5711_v41 }
 0x46b   :  { %v5796_v7 = vsub.f32 0.0, %v5780_v61  ;;  %v5611_v36 = vmul.f32 0.5, %v9031_v8  ;;  %v5773_v21 = vmul.f32 %v8223_v24, %v5733_v25  ;;  %v5774_v46 = vmul.f32 %v8225_v27, %v5734_v59 }
 0x46c   :  { %v5776_v30 = vmul.f32 %v8227_v60, %v5736_v14  ;;  %v5727_v38 = vadd.f32 0.2548296, %v5719_v0  ;;  %v5713_v23 = vadd.f32 -0.28449672, %v5705_v58  ;;  %v5802_v32 = vsel %vm5786_vm1, %v5794_v16, %v5778_v47  ;;  %v8040_v0 = vld [vmem:[#allocation9 + $0x100] ss:$8 sps:$4 sm:$0xff]  }
 0x46d   :  { %v5782_v63 = vsub.f32 1.0, %v5774_v46  ;;  %v5804_v9 = vsel %vm5788_vm2, %v5796_v7, %v5780_v61  ;;  %v5795_v26 = vsub.f32 0.0, %v5779_v28  ;;  %v5781_v8 = vsub.f32 1.0, %v5773_v21 }
 0x46e   :  { %v5784_v34 = vsub.f32 1.0, %v5776_v30  ;;  %v5735_v53 = vmul.f32 %v9101_v48, %v5727_v38  ;;  %v5614_v24 = vmul.f32 0.5, %v9051_v15  ;;  %v5721_v50 = vmul.f32 %v9108_v4, %v5713_v23  ;;  %v8048_v38 = vld [vmem:[#allocation9 + $0x124] ss:$8 sps:$4 sm:$0xff]   ;;  %v8051_v23 = vld [vmem:[#allocation9 + $0x134] ss:$8 sps:$4 sm:$0xff]  }
 0x46f   :  { %v5798_v18 = vsub.f32 0.0, %v5782_v63  ;;  %v5810_v11 = vadd.f32 1.0, %v5802_v32  ;;  %v5812_v49 = vadd.f32 1.0, %v5804_v9  ;;  %v5803_v56 = vsel %vm5787_vm3, %v5795_v26, %v5779_v28  ;;  %v8052_v32 = vld [vmem:[#allocation9 + $0x140] ss:$8 sps:$4 sm:$0xff]  }
 0x470   :  { %v5800_v33 = vsub.f32 0.0, %v5784_v34  ;;  %v5775_v20 = vmul.f32 %v8229_v17, %v5735_v53  ;;  %v5729_v42 = vadd.f32 0.2548296, %v5721_v50  ;;  %v5797_v61 = vsub.f32 0.0, %v5781_v8  ;;  %v8055_v17 = vld [vmem:[#allocation9 + $0x150] ss:$8 sps:$4 sm:$0xff]  }
 0x471   :  { %v5806_v27 = vsel %vm5790_vm4, %v5798_v18, %v5782_v63  ;;  %v5616_v3 = vmul.f32 0.5, %v9053_v44  ;;  %v5818_v60 = vmul.f32 %v5810_v11, %v5610_v40  ;;  %v9144_v52 = vmul.f32 %v5812_v49, %v5612_v54  ;;  %v8045_v54 = vld [vmem:[#allocation9 + $0x114] ss:$8 sps:$4 sm:$0xff]   ;;  %v8060_v9 = vld [vmem:[#allocation9 + $0x164] ss:$8 sps:$4 sm:$0xff]  }
 0x472   :  { %v5814_v48 = vadd.f32 1.0, %v5806_v27  ;;  %v5808_v37 = vsel %vm5792_vm5, %v5800_v33, %v5784_v34  ;;  %v5783_v47 = vsub.f32 1.0, %v5775_v20  ;;  %v5737_v35 = vmul.f32 %v9108_v4, %v5729_v42  ;;  %v8057_v63 = vld [vmem:[#allocation9 + $0x154] ss:$8 sps:$4 sm:$0xff]   ;;  %v8058_v26 = vld [vmem:[#allocation9 + $0x160] ss:$8 sps:$4 sm:$0xff]  }
 0x473   :  { %v8231_v15 = vpop.eup %8230  ;;  %v5816_v10 = vadd.f32 1.0, %v5808_v37  ;;  %v5811_v22 = vadd.f32 1.0, %v5803_v56  ;;  %v5615_v5 = vmul.f32 0.5, %v9058_v62  ;;  %v5805_v13 = vsel %vm5789_vm7, %v5797_v61, %v5781_v8  ;;  %v8063_v34 = vld [vmem:[#allocation9 + $0x174] ss:$8 sps:$4 sm:$0xff]  }
 0x474   :  { %v5822_v29 = vmul.f32 %v5814_v48, %v5614_v24  ;;  %v5799_v45 = vsub.f32 0.0, %v5783_v47  ;;  %v5777_v39 = vmul.f32 %v8231_v15, %v5737_v35  ;;  %v5813_v59 = vadd.f32 1.0, %v5805_v13  ;;  %v8061_v53 = vld [vmem:[#allocation9 + $0x170] ss:$8 sps:$4 sm:$0xff]   ;;  %v8066_v8 = vld [vmem:[#allocation9 + $0x184] ss:$8 sps:$4 sm:$0xff]  }
 0x475   :  { %v9146_v55 = vmul.f32 %v5816_v10, %v5616_v3  ;;  %v5819_v19 = vmul.f32 %v5811_v22, %v5611_v36  ;;  %v5617_v62 = vmul.f32 0.5, %v9064_v43  ;;  %v8043_v36 = vld [vmem:[#allocation9 + $0x110] ss:$8 sps:$4 sm:$0xff]   ;;  %v8054_v43 = vld [vmem:[#allocation9 + $0x144] ss:$8 sps:$4 sm:$0xff]  }
 0x476   :  { %v5826_v25 = vpack.c.bf16 %v5822_v29, %v5818_v60  ;;  %v5807_v44 = vsel %vm5791_vm6, %v5799_v45, %v5783_v47  ;;  %v5785_v41 = vsub.f32 1.0, %v5777_v39  ;;  %v5821_v21 = vmul.f32 %v5813_v59, %v5613_v2  ;;  %v8064_v24 = vld [vmem:[#allocation9 + $0x180] ss:$8 sps:$4 sm:$0xff]   ;;  %v8069_v18 = vld [vmem:[#allocation9 + $0x194] ss:$8 sps:$4 sm:$0xff]  }
 0x477   :  { %v5828_v4 = vpack.c.bf16 %v9146_v55, %v9144_v52  ;;  %v5815_v40 = vadd.f32 1.0, %v5807_v44  ;;  %v8067_v50 = vld [vmem:[#allocation9 + $0x190] ss:$8 sps:$4 sm:$0xff]   ;;  %v8072_v11 = vld [vmem:[#allocation9 + $0x1a4] ss:$8 sps:$4 sm:$0xff]  }
 0x478   :  { %v5801_v7 = vsub.f32 0.0, %v5785_v41  ;;  %v8070_v33 = vld [vmem:[#allocation9 + $0x1a0] ss:$8 sps:$4 sm:$0xff]   ;;  %v8075_v20 = vld [vmem:[#allocation9 + $0x1b4] ss:$8 sps:$4 sm:$0xff]  }
 0x479   :  { %v5823_v16 = vmul.f32 %v5815_v40, %v5615_v5  ;;  %v8073_v49 = vld [vmem:[#allocation9 + $0x1b0] ss:$8 sps:$4 sm:$0xff]   ;;  %v8078_v27 = vld [vmem:[#allocation9 + $0x1c4] ss:$8 sps:$4 sm:$0xff]   ;;  %v8076_v42 = vld [vmem:[#allocation9 + $0x1c0] ss:$8 sps:$4 sm:$0xff]  }
 0x47a   :  { %v5809_v28 = vsel %vm5793_vm8, %v5801_v7, %v5785_v41  ;;  %v8081_v56 = vld [vmem:[#allocation9 + $0x1d4] ss:$8 sps:$4 sm:$0xff]   ;;  %v8079_v48 = vld [vmem:[#allocation9 + $0x1d0] ss:$8 sps:$4 sm:$0xff]   ;;  %v8084_v37 = vld [vmem:[#allocation9 + $0x1e4] ss:$8 sps:$4 sm:$0xff]  }
 0x47b   :  { %v5827_v14 = vpack.c.bf16 %v5823_v16, %v5819_v19  ;;  %v5817_v58 = vadd.f32 1.0, %v5809_v28  ;;  %v8082_v47 = vld [vmem:[#allocation9 + $0x1e0] ss:$8 sps:$4 sm:$0xff]   ;;  %v8087_v15 = vld [vmem:[#allocation9 + $0x1f4] ss:$8 sps:$4 sm:$0xff]  }
 0x47c   :  { %v8085_v61 = vld [vmem:[#allocation9 + $0x1f0] ss:$8 sps:$4 sm:$0xff]   ;;  %v8094_v10 = vld [vmem:[#allocation12 + $0x20] ss:$8 sps:$4 sm:$0xff]  }
 0x47d   :  { %6258 = vmatprep.mubr.bf16.mxu0 %v5827_v14  ;;  %v5825_v46 = vmul.f32 %v5817_v58, %v5617_v62  ;;  %v8096_v3 = vld [vmem:[#allocation12 + $0x24] ss:$8 sps:$4 sm:$0xff]   ;;  %v8099_v35 = vld [vmem:[#allocation12 + $0x34] ss:$8 sps:$4 sm:$0xff]   ;;  %v8097_v60 = vld [vmem:[#allocation12 + $0x30] ss:$8 sps:$4 sm:$0xff]  }
 0x47e   :  { %6259 = vmatmul.mubr.bf16.vlgmr.msra.gmra.mrb[12].mxu0 %v5826_v25  ;;  %6630 = vmatprep.subr.bf16.mxu1 %v8096_v3  ;;  %v8102_v29 = vld [vmem:[#allocation12 + $0x44] ss:$8 sps:$4 sm:$0xff]   ;;  %v8100_v45 = vld [vmem:[#allocation12 + $0x40] ss:$8 sps:$4 sm:$0xff]   ;;  %v8105_v22 = vld [vmem:[#allocation12 + $0x54] ss:$8 sps:$4 sm:$0xff]  }
 0x47f   :  { %6270 = vmatpush1.bf16.msra.mxu0 %v8040_v0  ;;  %v5829_v30 = vpack.c.bf16 %v5825_v46, %v5821_v21  ;;  %6631 = vmatpush1.bf16.msra.mxu1 %v8094_v10  ;;  %v8103_v39 = vld [vmem:[#allocation12 + $0x50] ss:$8 sps:$4 sm:$0xff]   ;;  %v8108_v25 = vld [vmem:[#allocation12 + $0x64] ss:$8 sps:$4 sm:$0xff]   ;;  %v8106_v5 = vld [vmem:[#allocation12 + $0x60] ss:$8 sps:$4 sm:$0xff]  }
 0x480   :  { %6271 = vmatprep.subr.bf16.mxu0 %v8045_v54  ;;  %6632 = vmatprep.subr.bf16.mxu1 %v8099_v35  ;;  %v8111_v52 = vld [vmem:[#allocation12 + $0x74] ss:$8 sps:$4 sm:$0xff]   ;;  %v8109_v55 = vld [vmem:[#allocation12 + $0x70] ss:$8 sps:$4 sm:$0xff]   ;;  %v8114_v44 = vld [vmem:[#allocation12 + $0x84] ss:$8 sps:$4 sm:$0xff]  }
 0x481   :  { %6301 = vmatprep.mubr.bf16.mxu0 %v5829_v30  ;;  %v8112_v13 = vld [vmem:[#allocation12 + $0x80] ss:$8 sps:$4 sm:$0xff]   ;;  %v8115_v40 = vld [vmem:[#allocation12 + $0x90] ss:$8 sps:$4 sm:$0xff]   ;;  %v8120_v41 = vld [vmem:[#allocation12 + $0xa4] ss:$8 sps:$4 sm:$0xff]  }
 0x482   :  { %v8118_v19 = vld [vmem:[#allocation12 + $0xa0] ss:$8 sps:$4 sm:$0xff]   ;;  %v8123_v16 = vld [vmem:[#allocation12 + $0xb4] ss:$8 sps:$4 sm:$0xff]   ;;  %v8121_v7 = vld [vmem:[#allocation12 + $0xb0] ss:$8 sps:$4 sm:$0xff]  }
 0x483   :  { %6272 = vmatpush1.bf16.msra.mxu0 %v8043_v36  ;;  %6633 = vmatpush1.bf16.msra.mxu1 %v8097_v60  ;;  %v8126_v59 = vld [vmem:[#allocation12 + $0xc4] ss:$8 sps:$4 sm:$0xff]   ;;  %v8124_v28 = vld [vmem:[#allocation12 + $0xc0] ss:$8 sps:$4 sm:$0xff]   ;;  %v8129_v14 = vld [vmem:[#allocation12 + $0xd4] ss:$8 sps:$4 sm:$0xff]  }
 0x484   :  { %6273 = vmatprep.subr.bf16.mxu0 %v8048_v38  ;;  %6634 = vmatprep.subr.bf16.mxu1 %v8102_v29  ;;  %v8127_v0 = vld [vmem:[#allocation12 + $0xd0] ss:$8 sps:$4 sm:$0xff]   ;;  %v8132_v2 = vld [vmem:[#allocation12 + $0xe4] ss:$8 sps:$4 sm:$0xff]   ;;  %v8130_v62 = vld [vmem:[#allocation12 + $0xe0] ss:$8 sps:$4 sm:$0xff]  }
 0x485   :  { %v8133_v58 = vld [vmem:[#allocation12 + $0xf0] ss:$8 sps:$4 sm:$0xff]   ;;  %v8135_v54 = vld [vmem:[#allocation12 + $0xf4] ss:$8 sps:$4 sm:$0xff]  }
 0x486   :  { %v5894_v21 = vld [vmem:[#allocation10] sm:$0x3] }
 0x487   :  { %6274 = vmatpush1.bf16.msra.mxu0 %v8046_v31  ;;  %6635 = vmatpush1.bf16.msra.mxu1 %v8100_v45  ;;  %v5899_v46 = vrot.slane %v5894_v21, %v8708_v6  ;;  %v5903_v36 = vrot.slane %v5894_v21, %v8713_v12 }
 0x488   :  { %6275 = vmatprep.subr.bf16.mxu0 %v8051_v23  ;;  %6636 = vmatprep.subr.bf16.mxu1 %v8105_v22 }
 0x48b   :  { %6276 = vmatpush1.bf16.msra.mxu0 %v8049_v51  ;;  %6637 = vmatpush1.bf16.msra.mxu1 %v8103_v39 }
 0x48c   :  { %6277 = vmatprep.subr.bf16.mxu0 %v8054_v43  ;;  %6638 = vmatprep.subr.bf16.mxu1 %v8108_v25 }
 0x48f   :  { %6278 = vmatpush1.bf16.msra.mxu0 %v8052_v32  ;;  %6639 = vmatpush1.bf16.msra.mxu1 %v8106_v5 }
 0x490   :  { %6279 = vmatprep.subr.bf16.mxu0 %v8057_v63  ;;  %6640 = vmatprep.subr.bf16.mxu1 %v8111_v52 }
 0x493   :  { %6280 = vmatpush1.bf16.msra.mxu0 %v8055_v17  ;;  %6641 = vmatpush1.bf16.msra.mxu1 %v8109_v55 }
 0x494   :  { %6281 = vmatprep.subr.bf16.mxu0 %v8060_v9  ;;  %6642 = vmatprep.subr.bf16.mxu1 %v8114_v44 }
 0x497   :  { %6282 = vmatpush1.bf16.msra.mxu0 %v8058_v26  ;;  %6643 = vmatpush1.bf16.msra.mxu1 %v8112_v13 }
 0x498   :  { %6283 = vmatprep.subr.bf16.mxu0 %v8063_v34 }
 0x49b   :  { %6284 = vmatpush1.bf16.msra.mxu0 %v8061_v53 }
 0x49c   :  { %6285 = vmatprep.subr.bf16.mxu0 %v8066_v8 }
 0x49f   :  { %6286 = vmatpush1.bf16.msra.mxu0 %v8064_v24 }
 0x4a0   :  { %6287 = vmatprep.subr.bf16.mxu0 %v8069_v18 }
 0x4a3   :  { %6288 = vmatpush1.bf16.msra.mxu0 %v8067_v50 }
 0x4a4   :  { %6289 = vmatprep.subr.bf16.mxu0 %v8072_v11 }
 0x4a7   :  { %6290 = vmatpush1.bf16.msra.mxu0 %v8070_v33 }
 0x4a8   :  { %6291 = vmatprep.subr.bf16.mxu0 %v8075_v20 }
 0x4ab   :  { %6292 = vmatpush1.bf16.msra.mxu0 %v8073_v49 }
 0x4ac   :  { %6293 = vmatprep.subr.bf16.mxu0 %v8078_v27 }
 0x4af   :  { %6294 = vmatpush1.bf16.msra.mxu0 %v8076_v42 }
 0x4b0   :  { %6295 = vmatprep.subr.bf16.mxu0 %v8081_v56 }
 0x4b3   :  { %6296 = vmatpush1.bf16.msra.mxu0 %v8079_v48 }
 0x4b4   :  { %6297 = vmatprep.subr.bf16.mxu0 %v8084_v37 }
 0x4b7   :  { %6298 = vmatpush1.bf16.msra.mxu0 %v8082_v47 }
 0x4b8   :  { %6299 = vmatprep.subr.bf16.mxu0 %v8087_v15 }
 0x4bb   :  { %6300 = vmatpush1.bf16.msra.mxu0 %v8085_v61 }
 0x4be   :  { %6302 = vmatmul.mubr.bf16.vlgmr.msra.gmra.mrb[12].mxu0 %v5828_v4  ;;  %v8117_v4 = vld [vmem:[#allocation12 + $0x94] ss:$8 sps:$4 sm:$0xff]  }
 0x4bf   :  { %6644 = vmatprep.subr.bf16.mxu1 %v8117_v4 }
 0x4c0   :  { %6645 = vmatpush1.bf16.msra.mxu1 %v8115_v40 }
 0x4c1   :  { %6646 = vmatprep.subr.bf16.mxu1 %v8120_v41 }
 0x4c4   :  { %6647 = vmatpush1.bf16.msra.mxu1 %v8118_v19 }
 0x4c5   :  { %6648 = vmatprep.subr.bf16.mxu1 %v8123_v16 }
 0x4c8   :  { %6649 = vmatpush1.bf16.msra.mxu1 %v8121_v7 }
 0x4c9   :  { %6650 = vmatprep.subr.bf16.mxu1 %v8126_v59 }
 0x4cc   :  { %6651 = vmatpush1.bf16.msra.mxu1 %v8124_v28 }
 0x4cd   :  { %6652 = vmatprep.subr.bf16.mxu1 %v8129_v14 }
 0x4d0   :  { %6653 = vmatpush1.bf16.msra.mxu1 %v8127_v0 }
 0x4d1   :  { %6654 = vmatprep.subr.bf16.mxu1 %v8132_v2 }
 0x4d4   :  { %6655 = vmatpush1.bf16.msra.mxu1 %v8130_v62 }
 0x4d5   :  { %6656 = vmatprep.subr.bf16.mxu1 %v8135_v54 }
 0x4d8   :  { %6657 = vmatpush1.bf16.msra.mxu1 %v8133_v58 }
 0x591   :  { %v6303_v30 = vpop.f32.mrb[12].mxu0 }
 0x592   :  { %v9160_v38 = vadd.f32 %v6303_v30, %v5899_v46  ;;  %v6305_v31 = vpop.f32.mrb[13].mxu0 }
 0x593   :  { %v9162_v23 = vadd.f32 %v6305_v31, %v5903_v36  ;;  %v6307_v51 = vpop.f32.mrb[14].mxu0 }
 0x594   :  { %v9165_v43 = vmul.f32 0.70710677, %v9160_v38  ;;  %v9167_v32 = vadd.f32 %v6307_v51, %v5899_v46  ;;  %v6309_v63 = vpop.f32.mrb[15].mxu0 }
 0x595   :  { %v9170_v17 = vmul.f32 0.70710677, %v9162_v23  ;;  %v9172_v9 = vadd.f32 %v6309_v63, %v5903_v36 }
 0x596   :  { %v6320_v26 = vand.u32 2147483647, %v9165_v43  ;;  %v9176_v34 = vmul.f32 0.70710677, %v9167_v32  ;;  %vm6400_vm9 = vcmp.lt.f32.partialorder %v9165_v43, 0.0 }
 0x597   :  { %v6321_v53 = vand.u32 2147483647, %v9170_v17  ;;  %v9180_v8 = vmul.f32 0.70710677, %v9172_v9  ;;  %vm6401_vm10 = vcmp.lt.f32.partialorder %v9170_v17, 0.0 }
 0x598   :  { %v6324_v24 = vmul.f32 0.3275911, %v6320_v26  ;;  %v6322_v18 = vand.u32 2147483647, %v9176_v34  ;;  %v6376_v48 = vmul.f32 %v6320_v26, %v6320_v26  ;;  %vm6402_vm11 = vcmp.lt.f32.partialorder %v9176_v34, 0.0 }
 0x599   :  { %v6325_v50 = vmul.f32 0.3275911, %v6321_v53  ;;  %v6323_v11 = vand.u32 2147483647, %v9180_v8  ;;  %v6377_v37 = vmul.f32 %v6321_v53, %v6321_v53  ;;  %vm6403_vm12 = vcmp.lt.f32.partialorder %v9180_v8, 0.0 }
 0x59a   :  { %v6328_v33 = vadd.f32 1.0, %v6324_v24  ;;  %v6326_v20 = vmul.f32 0.3275911, %v6322_v18  ;;  %v6380_v15 = vsub.f32 0.0, %v6376_v48  ;;  %v6378_v61 = vmul.f32 %v6322_v18, %v6322_v18 }
 0x59b   :  { %v6329_v49 = vadd.f32 1.0, %v6325_v50  ;;  %v6327_v27 = vmul.f32 0.3275911, %v6323_v11  ;;  %v6381_v35 = vsub.f32 0.0, %v6377_v37  ;;  %v6379_v29 = vmul.f32 %v6323_v11, %v6323_v11 }
 0x59c   :  { %8232 = vrcp.f32 %v6328_v33  ;;  %v6330_v42 = vadd.f32 1.0, %v6326_v20  ;;  %v6384_v39 = vmul.f32 1.442695, %v6380_v15  ;;  %v6382_v5 = vsub.f32 0.0, %v6378_v61 }
 0x59d   :  { %8234 = vrcp.f32 %v6329_v49  ;;  %v6331_v56 = vadd.f32 1.0, %v6327_v27  ;;  %v6386_v55 = vmul.f32 1.442695, %v6381_v35  ;;  %v6383_v40 = vsub.f32 0.0, %v6379_v29 }
 0x59e   :  { %8236 = vrcp.f32 %v6330_v42  ;;  %v6388_v59 = vmul.f32 1.442695, %v6382_v5 }
 0x59f   :  { %8238 = vrcp.f32 %v6331_v56  ;;  %v6390_v62 = vmul.f32 1.442695, %v6383_v40 }
 0x5a0   :  { %8240 = vpow2.f32 %v6384_v39 }
 0x5a1   :  { %8242 = vpow2.f32 %v6386_v55 }
 0x5a2   :  { %8244 = vpow2.f32 %v6388_v59 }
 0x5a3   :  { %8246 = vpow2.f32 %v6390_v62  ;;  %v6454_v62 = vld [vmem:[#allocation13] sm:$0x3] }
 0x5a6   :  { %v8233_v47 = vpop.eup %8232 }
 0x5a7   :  { %v8235_v3 = vpop.eup %8234  ;;  %v6340_v10 = vmul.f32 1.0614054, %v8233_v47 }
 0x5a8   :  { %v6341_v60 = vmul.f32 1.0614054, %v8235_v3  ;;  %v8237_v22 = vpop.eup %8236 }
 0x5a9   :  { %v6344_v45 = vadd.f32 -1.4531521, %v6340_v10  ;;  %v6342_v44 = vmul.f32 1.0614054, %v8237_v22  ;;  %v8239_v13 = vpop.eup %8238 }
 0x5aa   :  { %v6345_v25 = vadd.f32 -1.4531521, %v6341_v60  ;;  %v6343_v16 = vmul.f32 1.0614054, %v8239_v13  ;;  %v8241_v33 = vpop.eup %8240 }
 0x5ab   :  { %v6348_v52 = vmul.f32 %v8233_v47, %v6344_v45  ;;  %v6346_v19 = vadd.f32 -1.4531521, %v6342_v44  ;;  %v8243_v49 = vpop.eup %8242 }
 0x5ac   :  { %v6349_v4 = vmul.f32 %v8235_v3, %v6345_v25  ;;  %v6347_v0 = vadd.f32 -1.4531521, %v6343_v16  ;;  %v8245_v10 = vpop.eup %8244  ;;  %v6313_v16 = vmul.f32 0.5, %v9162_v23 }
 0x5ad   :  { %v6352_v41 = vadd.f32 1.4214138, %v6348_v52  ;;  %v6350_v14 = vmul.f32 %v8237_v22, %v6346_v19  ;;  %v8247_v39 = vpop.eup %8246  ;;  %v6314_v19 = vmul.f32 0.5, %v9167_v32  ;;  %v6463_v32 = vrot.slane %v6454_v62, %v8713_v12 }
 0x5ae   :  { %v6353_v7 = vadd.f32 1.4214138, %v6349_v4  ;;  %v6351_v21 = vmul.f32 %v8239_v13, %v6347_v0 }
 0x5af   :  { %v6356_v28 = vmul.f32 %v8233_v47, %v6352_v41  ;;  %v6354_v54 = vadd.f32 1.4214138, %v6350_v14 }
 0x5b0   :  { %v6357_v2 = vmul.f32 %v8235_v3, %v6353_v7  ;;  %v6355_v31 = vadd.f32 1.4214138, %v6351_v21 }
 0x5b1   :  { %v6360_v58 = vadd.f32 -0.28449672, %v6356_v28  ;;  %v6358_v30 = vmul.f32 %v8237_v22, %v6354_v54  ;;  %v6315_v28 = vmul.f32 0.5, %v9172_v9  ;;  %v6459_v9 = vrot.slane %v6454_v62, %v8708_v6 }
 0x5b2   :  { %v6361_v46 = vadd.f32 -0.28449672, %v6357_v2  ;;  %v6359_v53 = vmul.f32 %v8239_v13, %v6355_v31 }
 0x5b3   :  { %v6364_v36 = vmul.f32 %v8233_v47, %v6360_v58  ;;  %v6362_v26 = vadd.f32 -0.28449672, %v6358_v30 }
 0x5b4   :  { %v6365_v51 = vmul.f32 %v8235_v3, %v6361_v46  ;;  %v6363_v11 = vadd.f32 -0.28449672, %v6359_v53 }
 0x5b5   :  { %v6368_v63 = vadd.f32 0.2548296, %v6364_v36  ;;  %v6366_v50 = vmul.f32 %v8237_v22, %v6362_v26  ;;  %v6674_v26 = vld [vmem:[%s9212_s1 + $0x8] sm:$0xff] }
 0x5b6   :  { %v6369_v24 = vadd.f32 0.2548296, %v6365_v51  ;;  %v6367_v56 = vmul.f32 %v8239_v13, %v6363_v11  ;;  %v6673_v51 = vld [vmem:[%s9212_s1] sm:$0xff] }
 0x5b7   :  { %v6372_v18 = vmul.f32 %v8233_v47, %v6368_v63  ;;  %v6370_v42 = vadd.f32 0.2548296, %v6366_v50  ;;  %v6699_v63 = vand.u32 127, %v541_v57 }
 0x5b8   :  { %v6373_v20 = vmul.f32 %v8235_v3, %v6369_v24  ;;  %v6371_v61 = vadd.f32 0.2548296, %v6367_v56 }
 0x5b9   :  { %v6392_v27 = vmul.f32 %v8241_v33, %v6372_v18  ;;  %v6374_v15 = vmul.f32 %v8237_v22, %v6370_v42  ;;  %v6312_v22 = vmul.f32 0.5, %v9160_v38  ;;  %vm6702_vm14 = vcmp.lt.s32.totalorder %v6699_v63, 32 }
 0x5ba   :  { %v6393_v48 = vmul.f32 %v8243_v49, %v6373_v20  ;;  %v6375_v45 = vmul.f32 %v8239_v13, %v6371_v61  ;;  %vm6703_vm15 = vmand %vm6700_vm13, %vm6702_vm14 }
 0x5bb   :  { %v6396_v37 = vsub.f32 1.0, %v6392_v27  ;;  %v6394_v29 = vmul.f32 %v8245_v10, %v6374_v15 }
 0x5bc   :  { %v6397_v35 = vsub.f32 1.0, %v6393_v48  ;;  %v6395_v3 = vmul.f32 %v8247_v39, %v6375_v45 }
 0x5bd   :  { %v6404_v60 = vsub.f32 0.0, %v6396_v37  ;;  %v6398_v5 = vsub.f32 1.0, %v6394_v29 }
 0x5be   :  { %v6405_v47 = vsub.f32 0.0, %v6397_v35  ;;  %v6399_v44 = vsub.f32 1.0, %v6395_v3 }
 0x5bf   :  { %v6408_v25 = vsel %vm6400_vm9, %v6404_v60, %v6396_v37  ;;  %v6406_v55 = vsub.f32 0.0, %v6398_v5 }
 0x5c0   :  { %v6409_v52 = vsel %vm6401_vm10, %v6405_v47, %v6397_v35  ;;  %v6412_v4 = vadd.f32 1.0, %v6408_v25  ;;  %v6407_v41 = vsub.f32 0.0, %v6399_v44 }
 0x5c1   :  { %v6410_v40 = vsel %vm6402_vm11, %v6406_v55, %v6398_v5  ;;  %v6413_v13 = vadd.f32 1.0, %v6409_v52 }
 0x5c2   :  { %v6414_v43 = vadd.f32 1.0, %v6410_v40  ;;  %v6411_v7 = vsel %vm6403_vm12, %v6407_v41, %v6399_v44  ;;  %v6416_v17 = vmul.f32 %v6412_v4, %v6312_v22 }
 0x5c3   :  { %v6415_v14 = vadd.f32 1.0, %v6411_v7  ;;  %v6417_v0 = vmul.f32 %v6413_v13, %v6313_v16 }
 0x5c4   :  { %v6418_v59 = vmul.f32 %v6414_v43, %v6314_v19 }
 0x5c5   :  { %v6419_v2 = vmul.f32 %v6415_v14, %v6315_v28 }
 0x5c6   :  { %v6420_v34 = vpack.c.bf16 %v6418_v59, %v6416_v17 }
 0x5c7   :  { %v6421_v38 = vpack.c.bf16 %v6419_v2, %v6417_v0 }
 0x5c9   :  { %6658 = vmatprep.mubr.bf16.mxu1 %v6421_v38 }
 0x5ca   :  { %6659 = vmatmul.mubr.bf16.vlgmr.msra.gmra.mrb[20].mxu1 %v6420_v34 }
 0x69d   :  { %v6660_v58 = vpop.f32.mrb[20].mxu1 }
 0x69e   :  { %v6662_v54 = vpop.f32.mrb[21].mxu1  ;;  %v6661_v31 = vadd.f32 %v6660_v58, %v6459_v9 }
 0x69f   :  { %v6663_v8 = vadd.f32 %v6662_v54, %v6463_v32  ;;  %v6664_v21 = vpop.f32.mrb[22].mxu1 }
 0x6a0   :  { %v6666_v23 = vpop.f32.mrb[23].mxu1  ;;  %v6683_v53 = vmul.f32 %v6661_v31, %v6661_v31  ;;  %v6665_v33 = vadd.f32 %v6664_v21, %v6459_v9 }
 0x6a1   :  { %v6669_v46 = vmul.f32 1.442695, %v6663_v8  ;;  %v6667_v36 = vadd.f32 %v6666_v23, %v6463_v32 }
 0x6a3   :  { %8248 = vpow2.f32 %v6669_v46  ;;  %v6671_v30 = vmul.f32 1.442695, %v6667_v36 }
 0x6a5   :  { %8250 = vpow2.f32 %v6671_v30 }
 0x6ad   :  { %v8249_v12 = vpop.eup %8248 }
 0x6ae   :  { %v6675_v24 = vmul.f32 %v8249_v12, %v6673_v51  ;;  %v6681_v18 = vmul.f32 %v8249_v12, %v8249_v12 }
 0x6af   :  { %v8251_v50 = vpop.eup %8250 }
 0x6b0   :  { %v6677_v6 = vadd.f32 %v6675_v24, %v6661_v31  ;;  %v6685_v11 = vadd.f32 %v6683_v53, %v6681_v18  ;;  %v6676_v20 = vmul.f32 %v8251_v50, %v6674_v26 }
 0x6b2   :  { %6679 = vst [vmem:[%s9221_s10] sm:$0xff] %v6677_v6  ;;  %v6687_v57 = vsub.f32 %v6685_v11, %v6663_v8  ;;  %v6678_v49 = vadd.f32 %v6676_v20, %v6665_v33 }
 0x6b4   :  { %v7477_v27 = vadd.f32 -0.5, %v6687_v57  ;;  %6680 = vst [vmem:[%s9221_s10 + $0x8] sm:$0xff] %v6678_v49 }
 0x6b6   :  { %v6705_v42 = vsel %vm6703_vm15, %v7477_v27, 0.0 }
 0x6b7   :  { %6708 = vst [vmem:[%s9222_s11] sm:$0xff] %v6705_v42 }
 0x6b8   :  { %6717 = vsyncpa [#allocation3], 1 }
 0x6b9   :  { %6718 = vsyncpa [#allocation5], 1 }
 0x6ba   :  { %6719 = vsyncpa [#allocation8], 1 }
 0x6bb   :  { %6720 = vsyncpa [#allocation11], 1 }
 0x6bc   :  { %6721 = vsyncpa [#allocation14], 1 }

</bundles_post_ra>
